<compile_context>
chip_gen: v7x
topology: tpu7x:2x2x1
jax: 0.10.0
libtpu: 0.0.40
codegen_flags: <defaults>
</compile_context>

<pallas_src>
import functools
import math

import jax
import jax.numpy as jnp
from jax import lax
from jax.experimental import pallas as pl
from jax.experimental.pallas import tpu as pltpu

_INV_SQRT2 = 0.7071067811865476
_GELU_C0 = 0.7978845608028654   # sqrt(2/pi)
_GELU_C1 = 0.044715


# ----------------------------------------------------------------------------- kernel
def _mlp_kernel(x_ref, xt_ref, xb_ref, w1_ref, b1_ref, wdw_ref, bdw_ref,
                w2_ref, b2_ref, o_ref, h_ref, *, TH, W, approx_gelu):
    """One (batch, row-tile) per grid step.

    x_ref  : (1, TH*W, Cin)   row-tile of tokens (row-major H*W layout)
    xt_ref : (1, W, Cin)      image row just above the tile (clamped at the edge)
    xb_ref : (1, W, Cin)      image row just below the tile (clamped at the edge)
    w1_ref : (Cin, Ch) bf16   b1_ref : (1, Ch)  f32
    wdw_ref: (9, Ch)          bdw_ref: (1, Ch)      (elementwise dtype, ky*3+kx)
    w2_ref : (Ch, Cout) bf16  b2_ref : (1, Cout) f32
    o_ref  : (1, TH*W, Cout)
    h_ref  : ((TH+2)*W, Ch)   VMEM scratch: fc1 output incl. 1-row halos
    """
    i = pl.program_id(1)
    nb = pl.num_programs(1)
    M = TH * W
    Ch = h_ref.shape[-1]
    hdt = h_ref.dtype

    w1 = w1_ref[...]
    b1 = b1_ref[...]

    # ---- fc1 on the main tile (bf16 MXU, f32 accumulation) -------------------
    h_ref[pl.ds(W, M), :] = (
        jnp.dot(x_ref[0].astype(jnp.bfloat16), w1,
                preferred_element_type=jnp.float32) + b1).astype(hdt)

    # ---- 1-row halos: recompute fc1 on neighbour image rows, or zero-pad -----
    @pl.when(i == 0)
    def _():
        h_ref[pl.ds(0, W), :] = jnp.zeros((W, Ch), hdt)

    @pl.when(i > 0)
    def _():
        h_ref[pl.ds(0, W), :] = (
            jnp.dot(xt_ref[0].astype(jnp.bfloat16), w1,
                    preferred_element_type=jnp.float32) + b1).astype(hdt)

    @pl.when(i == nb - 1)
    def _():
        h_ref[pl.ds((TH + 1) * W, W), :] = jnp.zeros((W, Ch), hdt)

    @pl.when(i < nb - 1)
    def _():
        h_ref[pl.ds((TH + 1) * W, W), :] = (
            jnp.dot(xb_ref[0].astype(jnp.bfloat16), w1,
                    preferred_element_type=jnp.float32) + b1).astype(hdt)

    # ---- depthwise 3x3 conv, stride 1, pad 1 (channels on the lane dim) ------
    wdw = wdw_ref[...]                                   # (9, Ch)
    cidx = lax.broadcasted_iota(jnp.int32, (M, 1), 0) % W
    mask_l = cidx > 0                                    # left neighbour exists
    mask_r = cidx < (W - 1)                              # right neighbour exists

    acc = None
    for ky in range(3):
        band = h_ref[pl.ds(ky * W, M), :]                # rows y+ky-1 (aligned slice)
        ctr = band * wdw[3 * ky + 1: 3 * ky + 2]
        acc = ctr if acc is None else acc + ctr
        left = jnp.where(mask_l, pltpu.roll(band, 1, 0), 0.0)       # x-1 neighbour
        acc = acc + left * wdw[3 * ky + 0: 3 * ky + 1]
        right = jnp.where(mask_r, pltpu.roll(band, M - 1, 0), 0.0)  # x+1 neighbour
        acc = acc + right * wdw[3 * ky + 2: 3 * ky + 3]
    pre = acc + bdw_ref[...]                             # conv bias added once

    # ---- GELU -----------------------------------------------------------------
    if approx_gelu:
        # tanh form: transcendental lands on the EUP slot, not the VALU slot.
        inner = _GELU_C0 * (pre + _GELU_C1 * (pre * pre * pre))
        act = 0.5 * pre * (1.0 + jnp.tanh(inner))
    else:
        p32 = pre.astype(jnp.float32)
        act = 0.5 * p32 * (1.0 + lax.erf(p32 * _INV_SQRT2))

    # ---- fc2 --------------------------------------------------------------------
    out = jnp.dot(act.astype(jnp.bfloat16), w2_ref[...],
                  preferred_element_type=jnp.float32) + b2_ref[...]
    o_ref[0] = out.astype(o_ref.dtype)


# ----------------------------------------------------------------------------- helpers
def _normalize_dw_weight(wdw):
    """Accept (3, 3, C) or PyTorch depthwise Conv2d layout (C, 1, 3, 3)."""
    wdw = jnp.asarray(wdw)
    if wdw.ndim == 4:
        assert wdw.shape[1] == 1 and wdw.shape[2] == 3 and wdw.shape[3] == 3, wdw.shape
        return jnp.transpose(wdw[:, 0, :, :], (1, 2, 0))
    assert wdw.ndim == 3 and wdw.shape[0] == 3 and wdw.shape[1] == 3, wdw.shape
    return wdw


def _tpu_vmem_and_bf16():
    """(physical VMEM bytes, elementwise-bf16 is profitable?) — best effort."""
    kind = ""
    try:
        kind = jax.devices()[0].device_kind.lower()
    except Exception:
        pass
    vmem_cap = None
    try:
        vmem_cap = int(pltpu.get_tpu_info().vmem_capacity_bytes)
    except Exception:
        vmem_cap = None
    if not vmem_cap or vmem_cap <= 0:
        vmem_cap = (64 << 20) if "7" in kind else (128 << 20)
    # v5e / older generations have no bf16 VPU/EUP -> keep elementwise math in f32.
    old_gen = any(t in kind for t in ("v2", "v3", "v4", "v5 lite", "v5lite", "v5e"))
    return vmem_cap, (not old_gen)


def _estimate_live_bytes(TH, W, Cin, Ch, Cout, in_itm, out_itm, ew_itm, wbufs):
    """Conservative per-step VMEM working set (double-buffered I/O + scratch)."""
    M = TH * W
    io = 2 * ((M * Cin + 2 * W * Cin) * in_itm + M * Cout * out_itm)
    wts = wbufs * ((Cin * Ch + Ch * Cout) * 2 + (11 * Ch + Cout) * 4)
    scratch = (TH + 2) * W * Ch * ew_itm
    interm = M * Ch * (4 + 4 * ew_itm) + M * Cout * 4
    return io + wts + scratch + interm


def _choose_tile_h(H, W, Cin, Ch, Cout, in_itm, out_itm, budget_bytes, batch):
    """Largest divisor of H fitting the budget, preferring >=2 total grid steps."""
    fitting = []
    for th in range(1, H + 1):
        if H % th:
            continue
        if _estimate_live_bytes(th, W, Cin, Ch, Cout, in_itm, out_itm,
                                4, 2) <= budget_bytes:
            fitting.append(th)
    if not fitting:
        return 1
    good = [th for th in fitting if batch * (H // th) >= 2]   # keep both v7x TCs busy
    return max(good) if good else max(fitting)


# ----------------------------------------------------------------------------- wrapper
def mlp_forward(x, params, H, W, tile_h=None, approx_gelu=True, io_dtype=None):
    """x: (B, N, Cin) with N == H*W (row-major).  Returns (B, N, Cout)."""
    w1, b1, wdw_raw, bdw, w2, b2 = params
    wdw = _normalize_dw_weight(wdw_raw)                  # (3, 3, Ch)
    B, N, Cin = x.shape
    Ch = w1.shape[1]
    Cout = w2.shape[1]
    assert N == H * W, (N, H, W)
    # Halo blocks and in-kernel row slices assume sublane-aligned image rows.
    assert W % 8 == 0, "W must be a multiple of 8"

    if io_dtype is not None:
        x = x.astype(io_dtype)
    out_dtype = x.dtype

    vmem_cap, bf16_ok = _tpu_vmem_and_bf16()
    if vmem_cap <= (64 << 20):                           # v7x-class: 64 MiB / TC
        vmem_limit = min(48 << 20, vmem_cap - (8 << 20))
    else:                                                # v5e / v6e: 128 MiB
        vmem_limit = min(104 << 20, vmem_cap - (16 << 20))
    budget = min(int(0.45 * vmem_cap), vmem_limit - (4 << 20))

    in_itm = x.dtype.itemsize
    out_itm = jnp.dtype(out_dtype).itemsize
    if tile_h is None:
        tile_h = _choose_tile_h(H, W, Cin, Ch, Cout, in_itm, out_itm, budget, B)
    assert H % tile_h == 0, "tile_h must divide H"
    TH = tile_h
    nb = H // TH
    M = TH * W

    # Wrapper-side casts / reshapes (weights are tiny).
    w1_bf = w1.astype(jnp.bfloat16)
    w2_bf = w2.astype(jnp.bfloat16)
    b1_2d = b1.reshape(1, Ch).astype(jnp.float32)
    b2_2d = b2.reshape(1, Cout).astype(jnp.float32)

    # Advisory cost estimate for the XLA scheduler.
    flops = 2 * B * N * Ch * (Cin + Cout) + 25 * B * N * Ch
    bytes_accessed = (B * N * Cin * in_itm + B * N * Cout * out_itm
                      + (Cin * Ch + Ch * Cout) * 2 + (11 * Ch + Cout) * 4)
    cost = pl.CostEstimate(flops=int(flops), transcendentals=int(B * N * Ch),
                           bytes_accessed=int(bytes_accessed))

    def build(ew_dtype, single_buffer_weights):
        wdw9 = wdw.reshape(9, Ch).astype(ew_dtype)
        bdw_2d = bdw.reshape(1, Ch).astype(ew_dtype)
        kernel = functools.partial(_mlp_kernel, TH=TH, W=W, approx_gelu=approx_gelu)

        def wspec(shape):
            # Constant (0,0) index_map -> single-buffer to reclaim VMEM.
            if single_buffer_weights:
                return pl.BlockSpec(shape, lambda b, i: (0,) * len(shape),
                                    pipeline_mode=pl.Buffered(buffer_count=1))
            return pl.BlockSpec(shape, lambda b, i: (0,) * len(shape))

        grid_spec = pltpu.PrefetchScalarGridSpec(
            num_scalar_prefetch=0,
            grid=(B, nb),
            in_specs=[
                pl.BlockSpec((1, M, Cin), lambda b, i: (b, i, 0)),        # x tile
                pl.BlockSpec((1, W, Cin),                                 # top halo row
                             lambda b, i: (b, jnp.maximum(i * TH - 1, 0), 0)),
                pl.BlockSpec((1, W, Cin),                                 # bottom halo row
                             lambda b, i: (b, jnp.minimum((i + 1) * TH, H - 1), 0)),
                wspec((Cin, Ch)),          # w1 (bf16)
                wspec((1, Ch)),            # b1
                wspec((9, Ch)),            # dwconv taps
                wspec((1, Ch)),            # dwconv bias
                wspec((Ch, Cout)),         # w2 (bf16)
                wspec((1, Cout)),          # b2
            ],
            out_specs=pl.BlockSpec((1, M, Cout), lambda b, i: (b, i, 0)),
            scratch_shapes=[pltpu.VMEM(((TH + 2) * W, Ch), ew_dtype)],
        )
        call = pl.pallas_call(
            kernel,
            out_shape=jax.ShapeDtypeStruct((B, N, Cout), out_dtype),
            grid_spec=grid_spec,
            compiler_params=pltpu.CompilerParams(
                dimension_semantics=("parallel", "parallel"),
                vmem_limit_bytes=int(vmem_limit)),
            cost_estimate=cost,
        )
        return call(x, x, x, w1_bf, b1_2d, wdw9, bdw_2d, w2_bf, b2_2d)

    # Attempt ladder: preferred (bf16 elementwise, single-buffered weights) first,
    # falling back to double-buffered weights and/or f32 elementwise if the
    # installed Mosaic rejects either feature.  Fallbacks only change performance.
    ew_candidates = [jnp.bfloat16, jnp.float32] if bf16_ok else [jnp.float32]
    last_err = None
    for ew in ew_candidates:
        for sbw in (True, False):
            try:
                return build(ew, sbw)
            except Exception as e:   # conservative retry; last config re-raises
                last_err = e
    raise last_err


# ----------------------------------------------------------------------------- reference
def mlp_reference(x, params, H, W):
    """Pure-JAX f32 reference (matches the PyTorch forward semantics, exact GELU)."""
    w1, b1, wdw_raw, bdw, w2, b2 = params
    wdw = _normalize_dw_weight(wdw_raw).astype(jnp.float32)
    x = x.astype(jnp.float32)
    B, N, Cin = x.shape
    h = x @ w1 + b1                                  # fc1
    hs = h.reshape(B, H, W, -1)                      # NHWC
    kern = wdw.reshape(3, 3, 1, -1)                  # HWIO, depthwise
    conv = lax.conv_general_dilated(
        hs, kern, window_strides=(1, 1), padding=((1, 1), (1, 1)),
        dimension_numbers=("NHWC", "HWIO", "NHWC"),
        feature_group_count=hs.shape[-1]) + bdw
    act = 0.5 * conv * (1.0 + lax.erf(conv * _INV_SQRT2))
    return act.reshape(B, N, -1) @ w2 + b2           # fc2 (dropout p=0 is a no-op)


# ----------------------------------------------------------------------------- test
if __name__ == "__main__":
    B, H, W = 2, 16, 16
    N = H * W
    in_features = 4
    hidden_features = 32
    out_features = in_features                       # module default

    key = jax.random.PRNGKey(0)
    kx, k1, k2, k3 = jax.random.split(key, 4)

    # Deterministic init mirroring Mlp._init_weights:
    #   Linear: trunc_normal(std=0.02) (approximated by normal), bias = 0
    #   Conv2d depthwise: normal(0, sqrt(2 / fan_out)), fan_out = 9
    w1 = jax.random.normal(k1, (in_features, hidden_features), jnp.float32) * 0.02
    b1 = jnp.zeros((hidden_features,), jnp.float32)
    # PyTorch depthwise Conv2d weight layout (C, 1, 3, 3) — wrapper permutes it.
    wdw = (jax.random.normal(k2, (hidden_features, 1, 3, 3), jnp.float32)
           * math.sqrt(2.0 / 9.0))
    bdw = jnp.zeros((hidden_features,), jnp.float32)
    w2 = jax.random.normal(k3, (hidden_features, out_features), jnp.float32) * 0.02
    b2 = jnp.zeros((out_features,), jnp.float32)
    params = (w1, b1, wdw, bdw, w2, b2)

    x = jax.random.normal(kx, (B, N, in_features), jnp.float32)
    ref = mlp_reference(x, params, H, W)

    # Explicit row tiling (exercises the halo paths: grid = (2, 4)).
    out_tiled = jax.block_until_ready(mlp_forward(x, params, H, W, tile_h=4))
    assert out_tiled.shape == (B, N, out_features), out_tiled.shape
    assert jnp.allclose(out_tiled, ref, atol=2e-3, rtol=2e-2), \
        f"tiled: max abs err {jnp.max(jnp.abs(out_tiled - ref))}"

    # Auto-chosen tile (whole image per step at this toy size; grid stays >= 2).
    out_auto = jax.block_until_ready(mlp_forward(x, params, H, W))
    assert jnp.allclose(out_auto, ref, atol=2e-3, rtol=2e-2), \
        f"auto: max abs err {jnp.max(jnp.abs(out_auto - ref))}"

    # Exact-erf GELU path (bit-faithful to torch.nn.GELU() semantics).
    out_exact = jax.block_until_ready(mlp_forward(x, params, H, W, approx_gelu=False))
    assert jnp.allclose(out_exact, ref, atol=2e-3, rtol=2e-2), \
        f"exact: max abs err {jnp.max(jnp.abs(out_exact - ref))}"

    # bf16 activation I/O path (HBM-bound small-channel stages).
    out_bf16 = jax.block_until_ready(
        mlp_forward(x, params, H, W, io_dtype=jnp.bfloat16))
    assert out_bf16.dtype == jnp.bfloat16
    assert jnp.allclose(out_bf16.astype(jnp.float32), ref, atol=1e-2, rtol=5e-2), \
        f"bf16 io: max abs err {jnp.max(jnp.abs(out_bf16.astype(jnp.float32) - ref))}"

    print("KERNEL_OK")
</pallas_src>

<mosaic_0001>
module attributes {stable_mosaic.version = 11 : i64} {
  func.func @_mlp_kernel(%arg0: i32, %arg1: i32, %arg2: memref<1x64x4xf32, #tpu.memory_space<vmem>>, %arg3: memref<1x16x4xf32, #tpu.memory_space<vmem>>, %arg4: memref<1x16x4xf32, #tpu.memory_space<vmem>>, %arg5: memref<4x32xbf16, #tpu.memory_space<vmem>>, %arg6: memref<1x32xf32, #tpu.memory_space<vmem>>, %arg7: memref<9x32xbf16, #tpu.memory_space<vmem>>, %arg8: memref<1x32xbf16, #tpu.memory_space<vmem>>, %arg9: memref<32x4xbf16, #tpu.memory_space<vmem>>, %arg10: memref<1x4xf32, #tpu.memory_space<vmem>>, %arg11: memref<1x64x4xf32, #tpu.memory_space<vmem>>, %arg12: memref<96x32xbf16, #tpu.memory_space<vmem>>) attributes {dimension_semantics = [#tpu.dimension_semantics<parallel>, #tpu.dimension_semantics<parallel>], iteration_bounds = array<i64: 2, 4>, scalar_prefetch = 0 : i64, scratch_operands = 1 : i64, tpu.core_type = #tpu.core_type<tc>, window_params = [{transform_indices = @transform_0, window_bounds = array<i64: 1, 64, 4>}, {transform_indices = @transform_1, window_bounds = array<i64: 1, 16, 4>}, {transform_indices = @transform_2, window_bounds = array<i64: 1, 16, 4>}, {pipeline_mode = #tpu.pipeline_mode<synchronous>, transform_indices = @transform_3, window_bounds = array<i64: 4, 32>}, {pipeline_mode = #tpu.pipeline_mode<synchronous>, transform_indices = @transform_4, window_bounds = array<i64: 1, 32>}, {pipeline_mode = #tpu.pipeline_mode<synchronous>, transform_indices = @transform_5, window_bounds = array<i64: 9, 32>}, {pipeline_mode = #tpu.pipeline_mode<synchronous>, transform_indices = @transform_6, window_bounds = array<i64: 1, 32>}, {pipeline_mode = #tpu.pipeline_mode<synchronous>, transform_indices = @transform_7, window_bounds = array<i64: 32, 4>}, {pipeline_mode = #tpu.pipeline_mode<synchronous>, transform_indices = @transform_8, window_bounds = array<i64: 1, 4>}, {transform_indices = @transform_9, window_bounds = array<i64: 1, 64, 4>}]} {
    %c0 = arith.constant 0 : index
    %c0_0 = arith.constant 0 : index
    %0 = vector.load %arg5[%c0, %c0_0] : memref<4x32xbf16, #tpu.memory_space<vmem>>, vector<4x32xbf16>
    %c0_1 = arith.constant 0 : index
    %c0_2 = arith.constant 0 : index
    %1 = vector.load %arg6[%c0_1, %c0_2] : memref<1x32xf32, #tpu.memory_space<vmem>>, vector<1x32xf32>
    %c0_3 = arith.constant 0 : index
    %c0_4 = arith.constant 0 : index
    %c0_5 = arith.constant 0 : index
    %2 = vector.load %arg2[%c0_3, %c0_4, %c0_5] : memref<1x64x4xf32, #tpu.memory_space<vmem>>, vector<1x64x4xf32>
    %3 = vector.shape_cast %2 : vector<1x64x4xf32> to vector<64x4xf32>
    %4 = arith.truncf %3 : vector<64x4xf32> to vector<64x4xbf16>
    %cst = arith.constant dense<0.000000e+00> : vector<64x32xf32>
    %5 = tpu.matmul %4, %0, %cst {dimension_numbers = #tpu.dot_dimension_numbers<[1], [0], [0], [1], [0, 0, 1, 1], [], []>} : vector<64x4xbf16>, vector<4x32xbf16>, vector<64x32xf32> -> vector<64x32xf32>
    %6 = vector.broadcast %1 : vector<1x32xf32> to vector<64x32xf32>
    %7 = arith.addf %5, %6 : vector<64x32xf32>
    %8 = arith.truncf %7 : vector<64x32xf32> to vector<64x32xbf16>
    %c16 = arith.constant 16 : index
    %c0_6 = arith.constant 0 : index
    %9 = vector.load %arg12[%c16, %c0_6] : memref<96x32xbf16, #tpu.memory_space<vmem>>, vector<64x32xbf16>
    tpu.vector_store %arg12[%c16, %c0_6], %8 {strides = array<i32>} : memref<96x32xbf16, #tpu.memory_space<vmem>>, vector<64x32xbf16>,
    %c0_i32 = arith.constant 0 : i32
    %10 = arith.cmpi eq, %arg1, %c0_i32 : i32
    %11 = arith.extui %10 : i1 to i32
    %c0_i32_7 = arith.constant 0 : i32
    %12 = arith.cmpi ne, %11, %c0_i32_7 : i32
    scf.if %12 {
      %cst_50 = arith.constant 0.000000e+00 : bf16
      %142 = vector.broadcast %cst_50 : bf16 to vector<16x32xbf16>
      %c0_51 = arith.constant 0 : index
      %c0_52 = arith.constant 0 : index
      %143 = vector.load %arg12[%c0_51, %c0_52] : memref<96x32xbf16, #tpu.memory_space<vmem>>, vector<16x32xbf16>
      tpu.vector_store %arg12[%c0_51, %c0_52], %142 {strides = array<i32>} : memref<96x32xbf16, #tpu.memory_space<vmem>>, vector<16x32xbf16>,
    } else {
    }
    %c0_i32_8 = arith.constant 0 : i32
    %13 = arith.cmpi sgt, %arg1, %c0_i32_8 : i32
    %14 = arith.extui %13 : i1 to i32
    %c0_i32_9 = arith.constant 0 : i32
    %15 = arith.cmpi ne, %14, %c0_i32_9 : i32
    scf.if %15 {
      %c0_50 = arith.constant 0 : index
      %c0_51 = arith.constant 0 : index
      %c0_52 = arith.constant 0 : index
      %142 = vector.load %arg3[%c0_50, %c0_51, %c0_52] : memref<1x16x4xf32, #tpu.memory_space<vmem>>, vector<1x16x4xf32>
      %143 = vector.shape_cast %142 : vector<1x16x4xf32> to vector<16x4xf32>
      %144 = arith.truncf %143 : vector<16x4xf32> to vector<16x4xbf16>
      %cst_53 = arith.constant dense<0.000000e+00> : vector<16x32xf32>
      %145 = tpu.matmul %144, %0, %cst_53 {dimension_numbers = #tpu.dot_dimension_numbers<[1], [0], [0], [1], [0, 0, 1, 1], [], []>} : vector<16x4xbf16>, vector<4x32xbf16>, vector<16x32xf32> -> vector<16x32xf32>
      %146 = vector.broadcast %1 : vector<1x32xf32> to vector<16x32xf32>
      %147 = arith.addf %145, %146 : vector<16x32xf32>
      %148 = arith.truncf %147 : vector<16x32xf32> to vector<16x32xbf16>
      %c0_54 = arith.constant 0 : index
      %c0_55 = arith.constant 0 : index
      %149 = vector.load %arg12[%c0_54, %c0_55] : memref<96x32xbf16, #tpu.memory_space<vmem>>, vector<16x32xbf16>
      tpu.vector_store %arg12[%c0_54, %c0_55], %148 {strides = array<i32>} : memref<96x32xbf16, #tpu.memory_space<vmem>>, vector<16x32xbf16>,
    } else {
    }
    %c3_i32 = arith.constant 3 : i32
    %16 = arith.cmpi eq, %arg1, %c3_i32 : i32
    %17 = arith.extui %16 : i1 to i32
    %c0_i32_10 = arith.constant 0 : i32
    %18 = arith.cmpi ne, %17, %c0_i32_10 : i32
    scf.if %18 {
      %cst_50 = arith.constant 0.000000e+00 : bf16
      %142 = vector.broadcast %cst_50 : bf16 to vector<16x32xbf16>
      %c80 = arith.constant 80 : index
      %c0_51 = arith.constant 0 : index
      %143 = vector.load %arg12[%c80, %c0_51] : memref<96x32xbf16, #tpu.memory_space<vmem>>, vector<16x32xbf16>
      tpu.vector_store %arg12[%c80, %c0_51], %142 {strides = array<i32>} : memref<96x32xbf16, #tpu.memory_space<vmem>>, vector<16x32xbf16>,
    } else {
    }
    %c3_i32_11 = arith.constant 3 : i32
    %19 = arith.cmpi slt, %arg1, %c3_i32_11 : i32
    %20 = arith.extui %19 : i1 to i32
    %c0_i32_12 = arith.constant 0 : i32
    %21 = arith.cmpi ne, %20, %c0_i32_12 : i32
    scf.if %21 {
      %c0_50 = arith.constant 0 : index
      %c0_51 = arith.constant 0 : index
      %c0_52 = arith.constant 0 : index
      %142 = vector.load %arg4[%c0_50, %c0_51, %c0_52] : memref<1x16x4xf32, #tpu.memory_space<vmem>>, vector<1x16x4xf32>
      %143 = vector.shape_cast %142 : vector<1x16x4xf32> to vector<16x4xf32>
      %144 = arith.truncf %143 : vector<16x4xf32> to vector<16x4xbf16>
      %cst_53 = arith.constant dense<0.000000e+00> : vector<16x32xf32>
      %145 = tpu.matmul %144, %0, %cst_53 {dimension_numbers = #tpu.dot_dimension_numbers<[1], [0], [0], [1], [0, 0, 1, 1], [], []>} : vector<16x4xbf16>, vector<4x32xbf16>, vector<16x32xf32> -> vector<16x32xf32>
      %146 = vector.broadcast %1 : vector<1x32xf32> to vector<16x32xf32>
      %147 = arith.addf %145, %146 : vector<16x32xf32>
      %148 = arith.truncf %147 : vector<16x32xf32> to vector<16x32xbf16>
      %c80 = arith.constant 80 : index
      %c0_54 = arith.constant 0 : index
      %149 = vector.load %arg12[%c80, %c0_54] : memref<96x32xbf16, #tpu.memory_space<vmem>>, vector<16x32xbf16>
      tpu.vector_store %arg12[%c80, %c0_54], %148 {strides = array<i32>} : memref<96x32xbf16, #tpu.memory_space<vmem>>, vector<16x32xbf16>,
    } else {
    }
    %c0_13 = arith.constant 0 : index
    %c0_14 = arith.constant 0 : index
    %22 = vector.load %arg7[%c0_13, %c0_14] : memref<9x32xbf16, #tpu.memory_space<vmem>>, vector<9x32xbf16>
    %23 = tpu.iota {dimensions = array<i32: 0>} : vector<64x1xi32>
    %c16_i32 = arith.constant 16 : i32
    %c0_i32_15 = arith.constant 0 : i32
    %24 = arith.cmpi eq, %c16_i32, %c0_i32_15 : i32
    %c1_i32 = arith.constant 1 : i32
    %25 = arith.select %24, %c1_i32, %c16_i32 : i32
    %26 = vector.broadcast %25 : i32 to vector<64x1xi32>
    %27 = arith.remsi %23, %26 : vector<64x1xi32>
    %c0_i32_16 = arith.constant 0 : i32
    %28 = vector.broadcast %c0_i32_16 : i32 to vector<64x1xi32>
    %29 = arith.cmpi ne, %27, %28 : vector<64x1xi32>
    %c0_i32_17 = arith.constant 0 : i32
    %30 = vector.broadcast %c0_i32_17 : i32 to vector<64x1xi32>
    %31 = arith.cmpi slt, %27, %30 : vector<64x1xi32>
    %c0_i32_18 = arith.constant 0 : i32
    %32 = arith.cmpi slt, %25, %c0_i32_18 : i32
    %33 = vector.broadcast %32 : i1 to vector<64x1xi1>
    %34 = vector.broadcast %33 : vector<64x1xi1> to vector<64x1xi1>
    %35 = arith.xori %31, %34 : vector<64x1xi1>
    %36 = arith.andi %35, %29 : vector<64x1xi1>
    %37 = vector.broadcast %25 : i32 to vector<64x1xi32>
    %38 = arith.addi %27, %37 : vector<64x1xi32>
    %39 = arith.select %36, %38, %27 : vector<64x1xi1>, vector<64x1xi32>
    %c0_i32_19 = arith.constant 0 : i32
    %40 = vector.broadcast %c0_i32_19 : i32 to vector<64x1xi32>
    %41 = arith.cmpi sgt, %39, %40 : vector<64x1xi32>
    %c15_i32 = arith.constant 15 : i32
    %42 = vector.broadcast %c15_i32 : i32 to vector<64x1xi32>
    %43 = arith.cmpi slt, %39, %42 : vector<64x1xi32>
    %c0_20 = arith.constant 0 : index
    %c0_21 = arith.constant 0 : index
    %44 = vector.load %arg12[%c0_20, %c0_21] : memref<96x32xbf16, #tpu.memory_space<vmem>>, vector<64x32xbf16>
    %45 = vector.extract_strided_slice %22 {offsets = [1, 0], sizes = [1, 32], strides = [1, 1]} : vector<9x32xbf16> to vector<1x32xbf16>
    %46 = vector.broadcast %45 : vector<1x32xbf16> to vector<64x32xbf16>
    %47 = arith.mulf %44, %46 : vector<64x32xbf16>
    %c1_i32_22 = arith.constant 1 : i32
    %48 = tpu.dynamic_rotate %44 by %c1_i32_22 dim 0 : vector<64x32xbf16>, i32 -> vector<64x32xbf16>
    %cst_23 = arith.constant 0.000000e+00 : f32
    %49 = arith.truncf %cst_23 : f32 to bf16
    %50 = vector.shape_cast %41 : vector<64x1xi1> to vector<64x1xi1>
    %51 = vector.broadcast %50 : vector<64x1xi1> to vector<64x32xi1>
    %52 = vector.broadcast %49 : bf16 to vector<64x32xbf16>
    %53 = arith.select %51, %48, %52 : vector<64x32xi1>, vector<64x32xbf16>
    %54 = vector.extract_strided_slice %22 {offsets = [0, 0], sizes = [1, 32], strides = [1, 1]} : vector<9x32xbf16> to vector<1x32xbf16>
    %55 = vector.broadcast %54 : vector<1x32xbf16> to vector<64x32xbf16>
    %56 = arith.mulf %53, %55 : vector<64x32xbf16>
    %57 = arith.addf %47, %56 : vector<64x32xbf16>
    %c63_i32 = arith.constant 63 : i32
    %58 = tpu.dynamic_rotate %44 by %c63_i32 dim 0 : vector<64x32xbf16>, i32 -> vector<64x32xbf16>
    %cst_24 = arith.constant 0.000000e+00 : f32
    %59 = arith.truncf %cst_24 : f32 to bf16
    %60 = vector.shape_cast %43 : vector<64x1xi1> to vector<64x1xi1>
    %61 = vector.broadcast %60 : vector<64x1xi1> to vector<64x32xi1>
    %62 = vector.broadcast %59 : bf16 to vector<64x32xbf16>
    %63 = arith.select %61, %58, %62 : vector<64x32xi1>, vector<64x32xbf16>
    %64 = vector.extract_strided_slice %22 {offsets = [2, 0], sizes = [1, 32], strides = [1, 1]} : vector<9x32xbf16> to vector<1x32xbf16>
    %65 = vector.broadcast %64 : vector<1x32xbf16> to vector<64x32xbf16>
    %66 = arith.mulf %63, %65 : vector<64x32xbf16>
    %67 = arith.addf %57, %66 : vector<64x32xbf16>
    %c16_25 = arith.constant 16 : index
    %c0_26 = arith.constant 0 : index
    %68 = vector.load %arg12[%c16_25, %c0_26] : memref<96x32xbf16, #tpu.memory_space<vmem>>, vector<64x32xbf16>
    %69 = vector.extract_strided_slice %22 {offsets = [4, 0], sizes = [1, 32], strides = [1, 1]} : vector<9x32xbf16> to vector<1x32xbf16>
    %70 = vector.broadcast %69 : vector<1x32xbf16> to vector<64x32xbf16>
    %71 = arith.mulf %68, %70 : vector<64x32xbf16>
    %72 = arith.addf %67, %71 : vector<64x32xbf16>
    %c1_i32_27 = arith.constant 1 : i32
    %73 = tpu.dynamic_rotate %68 by %c1_i32_27 dim 0 : vector<64x32xbf16>, i32 -> vector<64x32xbf16>
    %cst_28 = arith.constant 0.000000e+00 : f32
    %74 = arith.truncf %cst_28 : f32 to bf16
    %75 = vector.shape_cast %41 : vector<64x1xi1> to vector<64x1xi1>
    %76 = vector.broadcast %75 : vector<64x1xi1> to vector<64x32xi1>
    %77 = vector.broadcast %74 : bf16 to vector<64x32xbf16>
    %78 = arith.select %76, %73, %77 : vector<64x32xi1>, vector<64x32xbf16>
    %79 = vector.extract_strided_slice %22 {offsets = [3, 0], sizes = [1, 32], strides = [1, 1]} : vector<9x32xbf16> to vector<1x32xbf16>
    %80 = vector.broadcast %79 : vector<1x32xbf16> to vector<64x32xbf16>
    %81 = arith.mulf %78, %80 : vector<64x32xbf16>
    %82 = arith.addf %72, %81 : vector<64x32xbf16>
    %c63_i32_29 = arith.constant 63 : i32
    %83 = tpu.dynamic_rotate %68 by %c63_i32_29 dim 0 : vector<64x32xbf16>, i32 -> vector<64x32xbf16>
    %cst_30 = arith.constant 0.000000e+00 : f32
    %84 = arith.truncf %cst_30 : f32 to bf16
    %85 = vector.shape_cast %43 : vector<64x1xi1> to vector<64x1xi1>
    %86 = vector.broadcast %85 : vector<64x1xi1> to vector<64x32xi1>
    %87 = vector.broadcast %84 : bf16 to vector<64x32xbf16>
    %88 = arith.select %86, %83, %87 : vector<64x32xi1>, vector<64x32xbf16>
    %89 = vector.extract_strided_slice %22 {offsets = [5, 0], sizes = [1, 32], strides = [1, 1]} : vector<9x32xbf16> to vector<1x32xbf16>
    %90 = vector.broadcast %89 : vector<1x32xbf16> to vector<64x32xbf16>
    %91 = arith.mulf %88, %90 : vector<64x32xbf16>
    %92 = arith.addf %82, %91 : vector<64x32xbf16>
    %c32 = arith.constant 32 : index
    %c0_31 = arith.constant 0 : index
    %93 = vector.load %arg12[%c32, %c0_31] : memref<96x32xbf16, #tpu.memory_space<vmem>>, vector<64x32xbf16>
    %94 = vector.extract_strided_slice %22 {offsets = [7, 0], sizes = [1, 32], strides = [1, 1]} : vector<9x32xbf16> to vector<1x32xbf16>
    %95 = vector.broadcast %94 : vector<1x32xbf16> to vector<64x32xbf16>
    %96 = arith.mulf %93, %95 : vector<64x32xbf16>
    %97 = arith.addf %92, %96 : vector<64x32xbf16>
    %c1_i32_32 = arith.constant 1 : i32
    %98 = tpu.dynamic_rotate %93 by %c1_i32_32 dim 0 : vector<64x32xbf16>, i32 -> vector<64x32xbf16>
    %cst_33 = arith.constant 0.000000e+00 : f32
    %99 = arith.truncf %cst_33 : f32 to bf16
    %100 = vector.shape_cast %41 : vector<64x1xi1> to vector<64x1xi1>
    %101 = vector.broadcast %100 : vector<64x1xi1> to vector<64x32xi1>
    %102 = vector.broadcast %99 : bf16 to vector<64x32xbf16>
    %103 = arith.select %101, %98, %102 : vector<64x32xi1>, vector<64x32xbf16>
    %104 = vector.extract_strided_slice %22 {offsets = [6, 0], sizes = [1, 32], strides = [1, 1]} : vector<9x32xbf16> to vector<1x32xbf16>
    %105 = vector.broadcast %104 : vector<1x32xbf16> to vector<64x32xbf16>
    %106 = arith.mulf %103, %105 : vector<64x32xbf16>
    %107 = arith.addf %97, %106 : vector<64x32xbf16>
    %c63_i32_34 = arith.constant 63 : i32
    %108 = tpu.dynamic_rotate %93 by %c63_i32_34 dim 0 : vector<64x32xbf16>, i32 -> vector<64x32xbf16>
    %cst_35 = arith.constant 0.000000e+00 : f32
    %109 = arith.truncf %cst_35 : f32 to bf16
    %110 = vector.shape_cast %43 : vector<64x1xi1> to vector<64x1xi1>
    %111 = vector.broadcast %110 : vector<64x1xi1> to vector<64x32xi1>
    %112 = vector.broadcast %109 : bf16 to vector<64x32xbf16>
    %113 = arith.select %111, %108, %112 : vector<64x32xi1>, vector<64x32xbf16>
    %114 = vector.extract_strided_slice %22 {offsets = [8, 0], sizes = [1, 32], strides = [1, 1]} : vector<9x32xbf16> to vector<1x32xbf16>
    %115 = vector.broadcast %114 : vector<1x32xbf16> to vector<64x32xbf16>
    %116 = arith.mulf %113, %115 : vector<64x32xbf16>
    %117 = arith.addf %107, %116 : vector<64x32xbf16>
    %c0_36 = arith.constant 0 : index
    %c0_37 = arith.constant 0 : index
    %118 = vector.load %arg8[%c0_36, %c0_37] : memref<1x32xbf16, #tpu.memory_space<vmem>>, vector<1x32xbf16>
    %119 = vector.broadcast %118 : vector<1x32xbf16> to vector<64x32xbf16>
    %120 = arith.addf %117, %119 : vector<64x32xbf16>
    %121 = arith.mulf %120, %120 : vector<64x32xbf16>
    %122 = arith.mulf %121, %120 : vector<64x32xbf16>
    %cst_38 = arith.constant 4.467770e-02 : bf16
    %123 = vector.broadcast %cst_38 : bf16 to vector<64x32xbf16>
    %124 = arith.mulf %123, %122 : vector<64x32xbf16>
    %125 = arith.addf %120, %124 : vector<64x32xbf16>
    %cst_39 = arith.constant 7.968750e-01 : bf16
    %126 = vector.broadcast %cst_39 : bf16 to vector<64x32xbf16>
    %127 = arith.mulf %126, %125 : vector<64x32xbf16>
    %cst_40 = arith.constant 5.000000e-01 : bf16
    %128 = vector.broadcast %cst_40 : bf16 to vector<64x32xbf16>
    %129 = arith.mulf %128, %120 : vector<64x32xbf16>
    %130 = math.tanh %127 : vector<64x32xbf16>
    %cst_41 = arith.constant 1.000000e+00 : bf16
    %131 = vector.broadcast %cst_41 : bf16 to vector<64x32xbf16>
    %132 = arith.addf %131, %130 : vector<64x32xbf16>
    %133 = arith.mulf %129, %132 : vector<64x32xbf16>
    %c0_42 = arith.constant 0 : index
    %c0_43 = arith.constant 0 : index
    %134 = vector.load %arg9[%c0_42, %c0_43] : memref<32x4xbf16, #tpu.memory_space<vmem>>, vector<32x4xbf16>
    %cst_44 = arith.constant dense<0.000000e+00> : vector<64x4xf32>
    %135 = tpu.matmul %133, %134, %cst_44 {dimension_numbers = #tpu.dot_dimension_numbers<[1], [0], [0], [1], [0, 0, 1, 1], [], []>} : vector<64x32xbf16>, vector<32x4xbf16>, vector<64x4xf32> -> vector<64x4xf32>
    %c0_45 = arith.constant 0 : index
    %c0_46 = arith.constant 0 : index
    %136 = vector.load %arg10[%c0_45, %c0_46] : memref<1x4xf32, #tpu.memory_space<vmem>>, vector<1x4xf32>
    %137 = vector.broadcast %136 : vector<1x4xf32> to vector<64x4xf32>
    %138 = arith.addf %135, %137 : vector<64x4xf32>
    %c0_47 = arith.constant 0 : index
    %c0_48 = arith.constant 0 : index
    %c0_49 = arith.constant 0 : index
    %139 = vector.load %arg11[%c0_47, %c0_48, %c0_49] : memref<1x64x4xf32, #tpu.memory_space<vmem>>, vector<1x64x4xf32>
    %140 = vector.shape_cast %139 : vector<1x64x4xf32> to vector<64x4xf32>
    %141 = vector.shape_cast %138 : vector<64x4xf32> to vector<1x64x4xf32>
    tpu.vector_store %arg11[%c0_47, %c0_48, %c0_49], %141 {strides = array<i32>} : memref<1x64x4xf32, #tpu.memory_space<vmem>>, vector<1x64x4xf32>,
    return
  }
  func.func @transform_0(%arg0: i32, %arg1: i32) -> (i32, i32, i32) {
    %c0_i32 = arith.constant 0 : i32
    %c0_i32_0 = arith.constant 0 : i32
    return %arg0, %arg1, %c0_i32 : i32, i32, i32
  }
  func.func @transform_1(%arg0: i32, %arg1: i32) -> (i32, i32, i32) {
    %c4_i32 = arith.constant 4 : i32
    %0 = arith.muli %arg1, %c4_i32 : i32
    %c1_i32 = arith.constant 1 : i32
    %1 = arith.subi %0, %c1_i32 : i32
    %c0_i32 = arith.constant 0 : i32
    %2 = arith.maxsi %1, %c0_i32 : i32
    %c0_i32_0 = arith.constant 0 : i32
    %c0_i32_1 = arith.constant 0 : i32
    return %arg0, %2, %c0_i32_0 : i32, i32, i32
  }
  func.func @transform_2(%arg0: i32, %arg1: i32) -> (i32, i32, i32) {
    %c1_i32 = arith.constant 1 : i32
    %0 = arith.addi %arg1, %c1_i32 : i32
    %c4_i32 = arith.constant 4 : i32
    %1 = arith.muli %0, %c4_i32 : i32
    %c15_i32 = arith.constant 15 : i32
    %2 = arith.minsi %1, %c15_i32 : i32
    %c0_i32 = arith.constant 0 : i32
    %c0_i32_0 = arith.constant 0 : i32
    return %arg0, %2, %c0_i32 : i32, i32, i32
  }
  func.func @transform_3(%arg0: i32, %arg1: i32) -> (i32, i32) {
    %c0_i32 = arith.constant 0 : i32
    %c0_i32_0 = arith.constant 0 : i32
    %c0_i32_1 = arith.constant 0 : i32
    return %c0_i32, %c0_i32_0 : i32, i32
  }
  func.func @transform_4(%arg0: i32, %arg1: i32) -> (i32, i32) {
    %c0_i32 = arith.constant 0 : i32
    %c0_i32_0 = arith.constant 0 : i32
    %c0_i32_1 = arith.constant 0 : i32
    return %c0_i32, %c0_i32_0 : i32, i32
  }
  func.func @transform_5(%arg0: i32, %arg1: i32) -> (i32, i32) {
    %c0_i32 = arith.constant 0 : i32
    %c0_i32_0 = arith.constant 0 : i32
    %c0_i32_1 = arith.constant 0 : i32
    return %c0_i32, %c0_i32_0 : i32, i32
  }
  func.func @transform_6(%arg0: i32, %arg1: i32) -> (i32, i32) {
    %c0_i32 = arith.constant 0 : i32
    %c0_i32_0 = arith.constant 0 : i32
    %c0_i32_1 = arith.constant 0 : i32
    return %c0_i32, %c0_i32_0 : i32, i32
  }
  func.func @transform_7(%arg0: i32, %arg1: i32) -> (i32, i32) {
    %c0_i32 = arith.constant 0 : i32
    %c0_i32_0 = arith.constant 0 : i32
    %c0_i32_1 = arith.constant 0 : i32
    return %c0_i32, %c0_i32_0 : i32, i32
  }
  func.func @transform_8(%arg0: i32, %arg1: i32) -> (i32, i32) {
    %c0_i32 = arith.constant 0 : i32
    %c0_i32_0 = arith.constant 0 : i32
    %c0_i32_1 = arith.constant 0 : i32
    return %c0_i32, %c0_i32_0 : i32, i32
  }
  func.func @transform_9(%arg0: i32, %arg1: i32) -> (i32, i32, i32) {
    %c0_i32 = arith.constant 0 : i32
    %c0_i32_0 = arith.constant 0 : i32
    return %arg0, %arg1, %c0_i32 : i32, i32, i32
  }
}

module attributes {stable_mosaic.version = 11 : i64} {
  func.func @_mlp_kernel(%arg0: i32, %arg1: i32, %arg2: memref<1x64x4xf32, #tpu.memory_space<vmem>>, %arg3: memref<1x16x4xf32, #tpu.memory_space<vmem>>, %arg4: memref<1x16x4xf32, #tpu.memory_space<vmem>>, %arg5: memref<4x32xbf16, #tpu.memory_space<vmem>>, %arg6: memref<1x32xf32, #tpu.memory_space<vmem>>, %arg7: memref<9x32xbf16, #tpu.memory_space<vmem>>, %arg8: memref<1x32xbf16, #tpu.memory_space<vmem>>, %arg9: memref<32x4xbf16, #tpu.memory_space<vmem>>, %arg10: memref<1x4xf32, #tpu.memory_space<vmem>>, %arg11: memref<1x64x4xf32, #tpu.memory_space<vmem>>, %arg12: memref<96x32xbf16, #tpu.memory_space<vmem>>) attributes {dimension_semantics = [#tpu.dimension_semantics<parallel>, #tpu.dimension_semantics<parallel>], iteration_bounds = array<i64: 2, 4>, scalar_prefetch = 0 : i64, scratch_operands = 1 : i64, tpu.core_type = #tpu.core_type<tc>, window_params = [{transform_indices = @transform_0, window_bounds = array<i64: 1, 64, 4>}, {transform_indices = @transform_1, window_bounds = array<i64: 1, 16, 4>}, {transform_indices = @transform_2, window_bounds = array<i64: 1, 16, 4>}, {pipeline_mode = #tpu.pipeline_mode<synchronous>, transform_indices = @transform_3, window_bounds = array<i64: 4, 32>}, {pipeline_mode = #tpu.pipeline_mode<synchronous>, transform_indices = @transform_4, window_bounds = array<i64: 1, 32>}, {pipeline_mode = #tpu.pipeline_mode<synchronous>, transform_indices = @transform_5, window_bounds = array<i64: 9, 32>}, {pipeline_mode = #tpu.pipeline_mode<synchronous>, transform_indices = @transform_6, window_bounds = array<i64: 1, 32>}, {pipeline_mode = #tpu.pipeline_mode<synchronous>, transform_indices = @transform_7, window_bounds = array<i64: 32, 4>}, {pipeline_mode = #tpu.pipeline_mode<synchronous>, transform_indices = @transform_8, window_bounds = array<i64: 1, 4>}, {transform_indices = @transform_9, window_bounds = array<i64: 1, 64, 4>}]} {
    %c0 = arith.constant 0 : index
    %c0_0 = arith.constant 0 : index
    %0 = vector.load %arg5[%c0, %c0_0] : memref<4x32xbf16, #tpu.memory_space<vmem>>, vector<4x32xbf16>
    %c0_1 = arith.constant 0 : index
    %c0_2 = arith.constant 0 : index
    %1 = vector.load %arg6[%c0_1, %c0_2] : memref<1x32xf32, #tpu.memory_space<vmem>>, vector<1x32xf32>
    %c0_3 = arith.constant 0 : index
    %c0_4 = arith.constant 0 : index
    %c0_5 = arith.constant 0 : index
    %2 = vector.load %arg2[%c0_3, %c0_4, %c0_5] : memref<1x64x4xf32, #tpu.memory_space<vmem>>, vector<1x64x4xf32>
    %3 = vector.shape_cast %2 : vector<1x64x4xf32> to vector<64x4xf32>
    %4 = arith.truncf %3 : vector<64x4xf32> to vector<64x4xbf16>
    %cst = arith.constant dense<0.000000e+00> : vector<64x32xf32>
    %5 = tpu.matmul %4, %0, %cst {dimension_numbers = #tpu.dot_dimension_numbers<[1], [0], [0], [1], [0, 0, 1, 1], [], []>} : vector<64x4xbf16>, vector<4x32xbf16>, vector<64x32xf32> -> vector<64x32xf32>
    %6 = vector.broadcast %1 : vector<1x32xf32> to vector<64x32xf32>
    %7 = arith.addf %5, %6 : vector<64x32xf32>
    %8 = arith.truncf %7 : vector<64x32xf32> to vector<64x32xbf16>
    %c16 = arith.constant 16 : index
    %c0_6 = arith.constant 0 : index
    %9 = vector.load %arg12[%c16, %c0_6] : memref<96x32xbf16, #tpu.memory_space<vmem>>, vector<64x32xbf16>
    tpu.vector_store %arg12[%c16, %c0_6], %8 {strides = array<i32>} : memref<96x32xbf16, #tpu.memory_space<vmem>>, vector<64x32xbf16>,
    %c0_i32 = arith.constant 0 : i32
    %10 = arith.cmpi eq, %arg1, %c0_i32 : i32
    %11 = arith.extui %10 : i1 to i32
    %c0_i32_7 = arith.constant 0 : i32
    %12 = arith.cmpi ne, %11, %c0_i32_7 : i32
    scf.if %12 {
      %cst_50 = arith.constant 0.000000e+00 : bf16
      %142 = vector.broadcast %cst_50 : bf16 to vector<16x32xbf16>
      %c0_51 = arith.constant 0 : index
      %c0_52 = arith.constant 0 : index
      %143 = vector.load %arg12[%c0_51, %c0_52] : memref<96x32xbf16, #tpu.memory_space<vmem>>, vector<16x32xbf16>
      tpu.vector_store %arg12[%c0_51, %c0_52], %142 {strides = array<i32>} : memref<96x32xbf16, #tpu.memory_space<vmem>>, vector<16x32xbf16>,
    } else {
    }
    %c0_i32_8 = arith.constant 0 : i32
    %13 = arith.cmpi sgt, %arg1, %c0_i32_8 : i32
    %14 = arith.extui %13 : i1 to i32
    %c0_i32_9 = arith.constant 0 : i32
    %15 = arith.cmpi ne, %14, %c0_i32_9 : i32
    scf.if %15 {
      %c0_50 = arith.constant 0 : index
      %c0_51 = arith.constant 0 : index
      %c0_52 = arith.constant 0 : index
      %142 = vector.load %arg3[%c0_50, %c0_51, %c0_52] : memref<1x16x4xf32, #tpu.memory_space<vmem>>, vector<1x16x4xf32>
      %143 = vector.shape_cast %142 : vector<1x16x4xf32> to vector<16x4xf32>
      %144 = arith.truncf %143 : vector<16x4xf32> to vector<16x4xbf16>
      %cst_53 = arith.constant dense<0.000000e+00> : vector<16x32xf32>
      %145 = tpu.matmul %144, %0, %cst_53 {dimension_numbers = #tpu.dot_dimension_numbers<[1], [0], [0], [1], [0, 0, 1, 1], [], []>} : vector<16x4xbf16>, vector<4x32xbf16>, vector<16x32xf32> -> vector<16x32xf32>
      %146 = vector.broadcast %1 : vector<1x32xf32> to vector<16x32xf32>
      %147 = arith.addf %145, %146 : vector<16x32xf32>
      %148 = arith.truncf %147 : vector<16x32xf32> to vector<16x32xbf16>
      %c0_54 = arith.constant 0 : index
      %c0_55 = arith.constant 0 : index
      %149 = vector.load %arg12[%c0_54, %c0_55] : memref<96x32xbf16, #tpu.memory_space<vmem>>, vector<16x32xbf16>
      tpu.vector_store %arg12[%c0_54, %c0_55], %148 {strides = array<i32>} : memref<96x32xbf16, #tpu.memory_space<vmem>>, vector<16x32xbf16>,
    } else {
    }
    %c3_i32 = arith.constant 3 : i32
    %16 = arith.cmpi eq, %arg1, %c3_i32 : i32
    %17 = arith.extui %16 : i1 to i32
    %c0_i32_10 = arith.constant 0 : i32
    %18 = arith.cmpi ne, %17, %c0_i32_10 : i32
    scf.if %18 {
      %cst_50 = arith.constant 0.000000e+00 : bf16
      %142 = vector.broadcast %cst_50 : bf16 to vector<16x32xbf16>
      %c80 = arith.constant 80 : index
      %c0_51 = arith.constant 0 : index
      %143 = vector.load %arg12[%c80, %c0_51] : memref<96x32xbf16, #tpu.memory_space<vmem>>, vector<16x32xbf16>
      tpu.vector_store %arg12[%c80, %c0_51], %142 {strides = array<i32>} : memref<96x32xbf16, #tpu.memory_space<vmem>>, vector<16x32xbf16>,
    } else {
    }
    %c3_i32_11 = arith.constant 3 : i32
    %19 = arith.cmpi slt, %arg1, %c3_i32_11 : i32
    %20 = arith.extui %19 : i1 to i32
    %c0_i32_12 = arith.constant 0 : i32
    %21 = arith.cmpi ne, %20, %c0_i32_12 : i32
    scf.if %21 {
      %c0_50 = arith.constant 0 : index
      %c0_51 = arith.constant 0 : index
      %c0_52 = arith.constant 0 : index
      %142 = vector.load %arg4[%c0_50, %c0_51, %c0_52] : memref<1x16x4xf32, #tpu.memory_space<vmem>>, vector<1x16x4xf32>
      %143 = vector.shape_cast %142 : vector<1x16x4xf32> to vector<16x4xf32>
      %144 = arith.truncf %143 : vector<16x4xf32> to vector<16x4xbf16>
      %cst_53 = arith.constant dense<0.000000e+00> : vector<16x32xf32>
      %145 = tpu.matmul %144, %0, %cst_53 {dimension_numbers = #tpu.dot_dimension_numbers<[1], [0], [0], [1], [0, 0, 1, 1], [], []>} : vector<16x4xbf16>, vector<4x32xbf16>, vector<16x32xf32> -> vector<16x32xf32>
      %146 = vector.broadcast %1 : vector<1x32xf32> to vector<16x32xf32>
      %147 = arith.addf %145, %146 : vector<16x32xf32>
      %148 = arith.truncf %147 : vector<16x32xf32> to vector<16x32xbf16>
      %c80 = arith.constant 80 : index
      %c0_54 = arith.constant 0 : index
      %149 = vector.load %arg12[%c80, %c0_54] : memref<96x32xbf16, #tpu.memory_space<vmem>>, vector<16x32xbf16>
      tpu.vector_store %arg12[%c80, %c0_54], %148 {strides = array<i32>} : memref<96x32xbf16, #tpu.memory_space<vmem>>, vector<16x32xbf16>,
    } else {
    }
    %c0_13 = arith.constant 0 : index
    %c0_14 = arith.constant 0 : index
    %22 = vector.load %arg7[%c0_13, %c0_14] : memref<9x32xbf16, #tpu.memory_space<vmem>>, vector<9x32xbf16>
    %23 = tpu.iota {dimensions = array<i32: 0>} : vector<64x1xi32>
    %c16_i32 = arith.constant 16 : i32
    %c0_i32_15 = arith.constant 0 : i32
    %24 = arith.cmpi eq, %c16_i32, %c0_i32_15 : i32
    %c1_i32 = arith.constant 1 : i32
    %25 = arith.select %24, %c1_i32, %c16_i32 : i32
    %26 = vector.broadcast %25 : i32 to vector<64x1xi32>
    %27 = arith.remsi %23, %26 : vector<64x1xi32>
    %c0_i32_16 = arith.constant 0 : i32
    %28 = vector.broadcast %c0_i32_16 : i32 to vector<64x1xi32>
    %29 = arith.cmpi ne, %27, %28 : vector<64x1xi32>
    %c0_i32_17 = arith.constant 0 : i32
    %30 = vector.broadcast %c0_i32_17 : i32 to vector<64x1xi32>
    %31 = arith.cmpi slt, %27, %30 : vector<64x1xi32>
    %c0_i32_18 = arith.constant 0 : i32
    %32 = arith.cmpi slt, %25, %c0_i32_18 : i32
    %33 = vector.broadcast %32 : i1 to vector<64x1xi1>
    %34 = vector.broadcast %33 : vector<64x1xi1> to vector<64x1xi1>
    %35 = arith.xori %31, %34 : vector<64x1xi1>
    %36 = arith.andi %35, %29 : vector<64x1xi1>
    %37 = vector.broadcast %25 : i32 to vector<64x1xi32>
    %38 = arith.addi %27, %37 : vector<64x1xi32>
    %39 = arith.select %36, %38, %27 : vector<64x1xi1>, vector<64x1xi32>
    %c0_i32_19 = arith.constant 0 : i32
    %40 = vector.broadcast %c0_i32_19 : i32 to vector<64x1xi32>
    %41 = arith.cmpi sgt, %39, %40 : vector<64x1xi32>
    %c15_i32 = arith.constant 15 : i32
    %42 = vector.broadcast %c15_i32 : i32 to vector<64x1xi32>
    %43 = arith.cmpi slt, %39, %42 : vector<64x1xi32>
    %c0_20 = arith.constant 0 : index
    %c0_21 = arith.constant 0 : index
    %44 = vector.load %arg12[%c0_20, %c0_21] : memref<96x32xbf16, #tpu.memory_space<vmem>>, vector<64x32xbf16>
    %45 = vector.extract_strided_slice %22 {offsets = [1, 0], sizes = [1, 32], strides = [1, 1]} : vector<9x32xbf16> to vector<1x32xbf16>
    %46 = vector.broadcast %45 : vector<1x32xbf16> to vector<64x32xbf16>
    %47 = arith.mulf %44, %46 : vector<64x32xbf16>
    %c1_i32_22 = arith.constant 1 : i32
    %48 = tpu.dynamic_rotate %44 by %c1_i32_22 dim 0 : vector<64x32xbf16>, i32 -> vector<64x32xbf16>
    %cst_23 = arith.constant 0.000000e+00 : f32
    %49 = arith.truncf %cst_23 : f32 to bf16
    %50 = vector.shape_cast %41 : vector<64x1xi1> to vector<64x1xi1>
    %51 = vector.broadcast %50 : vector<64x1xi1> to vector<64x32xi1>
    %52 = vector.broadcast %49 : bf16 to vector<64x32xbf16>
    %53 = arith.select %51, %48, %52 : vector<64x32xi1>, vector<64x32xbf16>
    %54 = vector.extract_strided_slice %22 {offsets = [0, 0], sizes = [1, 32], strides = [1, 1]} : vector<9x32xbf16> to vector<1x32xbf16>
    %55 = vector.broadcast %54 : vector<1x32xbf16> to vector<64x32xbf16>
    %56 = arith.mulf %53, %55 : vector<64x32xbf16>
    %57 = arith.addf %47, %56 : vector<64x32xbf16>
    %c63_i32 = arith.constant 63 : i32
    %58 = tpu.dynamic_rotate %44 by %c63_i32 dim 0 : vector<64x32xbf16>, i32 -> vector<64x32xbf16>
    %cst_24 = arith.constant 0.000000e+00 : f32
    %59 = arith.truncf %cst_24 : f32 to bf16
    %60 = vector.shape_cast %43 : vector<64x1xi1> to vector<64x1xi1>
    %61 = vector.broadcast %60 : vector<64x1xi1> to vector<64x32xi1>
    %62 = vector.broadcast %59 : bf16 to vector<64x32xbf16>
    %63 = arith.select %61, %58, %62 : vector<64x32xi1>, vector<64x32xbf16>
    %64 = vector.extract_strided_slice %22 {offsets = [2, 0], sizes = [1, 32], strides = [1, 1]} : vector<9x32xbf16> to vector<1x32xbf16>
    %65 = vector.broadcast %64 : vector<1x32xbf16> to vector<64x32xbf16>
    %66 = arith.mulf %63, %65 : vector<64x32xbf16>
    %67 = arith.addf %57, %66 : vector<64x32xbf16>
    %c16_25 = arith.constant 16 : index
    %c0_26 = arith.constant 0 : index
    %68 = vector.load %arg12[%c16_25, %c0_26] : memref<96x32xbf16, #tpu.memory_space<vmem>>, vector<64x32xbf16>
    %69 = vector.extract_strided_slice %22 {offsets = [4, 0], sizes = [1, 32], strides = [1, 1]} : vector<9x32xbf16> to vector<1x32xbf16>
    %70 = vector.broadcast %69 : vector<1x32xbf16> to vector<64x32xbf16>
    %71 = arith.mulf %68, %70 : vector<64x32xbf16>
    %72 = arith.addf %67, %71 : vector<64x32xbf16>
    %c1_i32_27 = arith.constant 1 : i32
    %73 = tpu.dynamic_rotate %68 by %c1_i32_27 dim 0 : vector<64x32xbf16>, i32 -> vector<64x32xbf16>
    %cst_28 = arith.constant 0.000000e+00 : f32
    %74 = arith.truncf %cst_28 : f32 to bf16
    %75 = vector.shape_cast %41 : vector<64x1xi1> to vector<64x1xi1>
    %76 = vector.broadcast %75 : vector<64x1xi1> to vector<64x32xi1>
    %77 = vector.broadcast %74 : bf16 to vector<64x32xbf16>
    %78 = arith.select %76, %73, %77 : vector<64x32xi1>, vector<64x32xbf16>
    %79 = vector.extract_strided_slice %22 {offsets = [3, 0], sizes = [1, 32], strides = [1, 1]} : vector<9x32xbf16> to vector<1x32xbf16>
    %80 = vector.broadcast %79 : vector<1x32xbf16> to vector<64x32xbf16>
    %81 = arith.mulf %78, %80 : vector<64x32xbf16>
    %82 = arith.addf %72, %81 : vector<64x32xbf16>
    %c63_i32_29 = arith.constant 63 : i32
    %83 = tpu.dynamic_rotate %68 by %c63_i32_29 dim 0 : vector<64x32xbf16>, i32 -> vector<64x32xbf16>
    %cst_30 = arith.constant 0.000000e+00 : f32
    %84 = arith.truncf %cst_30 : f32 to bf16
    %85 = vector.shape_cast %43 : vector<64x1xi1> to vector<64x1xi1>
    %86 = vector.broadcast %85 : vector<64x1xi1> to vector<64x32xi1>
    %87 = vector.broadcast %84 : bf16 to vector<64x32xbf16>
    %88 = arith.select %86, %83, %87 : vector<64x32xi1>, vector<64x32xbf16>
    %89 = vector.extract_strided_slice %22 {offsets = [5, 0], sizes = [1, 32], strides = [1, 1]} : vector<9x32xbf16> to vector<1x32xbf16>
    %90 = vector.broadcast %89 : vector<1x32xbf16> to vector<64x32xbf16>
    %91 = arith.mulf %88, %90 : vector<64x32xbf16>
    %92 = arith.addf %82, %91 : vector<64x32xbf16>
    %c32 = arith.constant 32 : index
    %c0_31 = arith.constant 0 : index
    %93 = vector.load %arg12[%c32, %c0_31] : memref<96x32xbf16, #tpu.memory_space<vmem>>, vector<64x32xbf16>
    %94 = vector.extract_strided_slice %22 {offsets = [7, 0], sizes = [1, 32], strides = [1, 1]} : vector<9x32xbf16> to vector<1x32xbf16>
    %95 = vector.broadcast %94 : vector<1x32xbf16> to vector<64x32xbf16>
    %96 = arith.mulf %93, %95 : vector<64x32xbf16>
    %97 = arith.addf %92, %96 : vector<64x32xbf16>
    %c1_i32_32 = arith.constant 1 : i32
    %98 = tpu.dynamic_rotate %93 by %c1_i32_32 dim 0 : vector<64x32xbf16>, i32 -> vector<64x32xbf16>
    %cst_33 = arith.constant 0.000000e+00 : f32
    %99 = arith.truncf %cst_33 : f32 to bf16
    %100 = vector.shape_cast %41 : vector<64x1xi1> to vector<64x1xi1>
    %101 = vector.broadcast %100 : vector<64x1xi1> to vector<64x32xi1>
    %102 = vector.broadcast %99 : bf16 to vector<64x32xbf16>
    %103 = arith.select %101, %98, %102 : vector<64x32xi1>, vector<64x32xbf16>
    %104 = vector.extract_strided_slice %22 {offsets = [6, 0], sizes = [1, 32], strides = [1, 1]} : vector<9x32xbf16> to vector<1x32xbf16>
    %105 = vector.broadcast %104 : vector<1x32xbf16> to vector<64x32xbf16>
    %106 = arith.mulf %103, %105 : vector<64x32xbf16>
    %107 = arith.addf %97, %106 : vector<64x32xbf16>
    %c63_i32_34 = arith.constant 63 : i32
    %108 = tpu.dynamic_rotate %93 by %c63_i32_34 dim 0 : vector<64x32xbf16>, i32 -> vector<64x32xbf16>
    %cst_35 = arith.constant 0.000000e+00 : f32
    %109 = arith.truncf %cst_35 : f32 to bf16
    %110 = vector.shape_cast %43 : vector<64x1xi1> to vector<64x1xi1>
    %111 = vector.broadcast %110 : vector<64x1xi1> to vector<64x32xi1>
    %112 = vector.broadcast %109 : bf16 to vector<64x32xbf16>
    %113 = arith.select %111, %108, %112 : vector<64x32xi1>, vector<64x32xbf16>
    %114 = vector.extract_strided_slice %22 {offsets = [8, 0], sizes = [1, 32], strides = [1, 1]} : vector<9x32xbf16> to vector<1x32xbf16>
    %115 = vector.broadcast %114 : vector<1x32xbf16> to vector<64x32xbf16>
    %116 = arith.mulf %113, %115 : vector<64x32xbf16>
    %117 = arith.addf %107, %116 : vector<64x32xbf16>
    %c0_36 = arith.constant 0 : index
    %c0_37 = arith.constant 0 : index
    %118 = vector.load %arg8[%c0_36, %c0_37] : memref<1x32xbf16, #tpu.memory_space<vmem>>, vector<1x32xbf16>
    %119 = vector.broadcast %118 : vector<1x32xbf16> to vector<64x32xbf16>
    %120 = arith.addf %117, %119 : vector<64x32xbf16>
    %121 = arith.mulf %120, %120 : vector<64x32xbf16>
    %122 = arith.mulf %121, %120 : vector<64x32xbf16>
    %cst_38 = arith.constant 4.467770e-02 : bf16
    %123 = vector.broadcast %cst_38 : bf16 to vector<64x32xbf16>
    %124 = arith.mulf %123, %122 : vector<64x32xbf16>
    %125 = arith.addf %120, %124 : vector<64x32xbf16>
    %cst_39 = arith.constant 7.968750e-01 : bf16
    %126 = vector.broadcast %cst_39 : bf16 to vector<64x32xbf16>
    %127 = arith.mulf %126, %125 : vector<64x32xbf16>
    %cst_40 = arith.constant 5.000000e-01 : bf16
    %128 = vector.broadcast %cst_40 : bf16 to vector<64x32xbf16>
    %129 = arith.mulf %128, %120 : vector<64x32xbf16>
    %130 = math.tanh %127 : vector<64x32xbf16>
    %cst_41 = arith.constant 1.000000e+00 : bf16
    %131 = vector.broadcast %cst_41 : bf16 to vector<64x32xbf16>
    %132 = arith.addf %131, %130 : vector<64x32xbf16>
    %133 = arith.mulf %129, %132 : vector<64x32xbf16>
    %c0_42 = arith.constant 0 : index
    %c0_43 = arith.constant 0 : index
    %134 = vector.load %arg9[%c0_42, %c0_43] : memref<32x4xbf16, #tpu.memory_space<vmem>>, vector<32x4xbf16>
    %cst_44 = arith.constant dense<0.000000e+00> : vector<64x4xf32>
    %135 = tpu.matmul %133, %134, %cst_44 {dimension_numbers = #tpu.dot_dimension_numbers<[1], [0], [0], [1], [0, 0, 1, 1], [], []>} : vector<64x32xbf16>, vector<32x4xbf16>, vector<64x4xf32> -> vector<64x4xf32>
    %c0_45 = arith.constant 0 : index
    %c0_46 = arith.constant 0 : index
    %136 = vector.load %arg10[%c0_45, %c0_46] : memref<1x4xf32, #tpu.memory_space<vmem>>, vector<1x4xf32>
    %137 = vector.broadcast %136 : vector<1x4xf32> to vector<64x4xf32>
    %138 = arith.addf %135, %137 : vector<64x4xf32>
    %c0_47 = arith.constant 0 : index
    %c0_48 = arith.constant 0 : index
    %c0_49 = arith.constant 0 : index
    %139 = vector.load %arg11[%c0_47, %c0_48, %c0_49] : memref<1x64x4xf32, #tpu.memory_space<vmem>>, vector<1x64x4xf32>
    %140 = vector.shape_cast %139 : vector<1x64x4xf32> to vector<64x4xf32>
    %141 = vector.shape_cast %138 : vector<64x4xf32> to vector<1x64x4xf32>
    tpu.vector_store %arg11[%c0_47, %c0_48, %c0_49], %141 {strides = array<i32>} : memref<1x64x4xf32, #tpu.memory_space<vmem>>, vector<1x64x4xf32>,
    return
  }
  func.func @transform_0(%arg0: i32, %arg1: i32) -> (i32, i32, i32) {
    %c0_i32 = arith.constant 0 : i32
    %c0_i32_0 = arith.constant 0 : i32
    return %arg0, %arg1, %c0_i32 : i32, i32, i32
  }
  func.func @transform_1(%arg0: i32, %arg1: i32) -> (i32, i32, i32) {
    %c4_i32 = arith.constant 4 : i32
    %0 = arith.muli %arg1, %c4_i32 : i32
    %c1_i32 = arith.constant 1 : i32
    %1 = arith.subi %0, %c1_i32 : i32
    %c0_i32 = arith.constant 0 : i32
    %2 = arith.maxsi %1, %c0_i32 : i32
    %c0_i32_0 = arith.constant 0 : i32
    %c0_i32_1 = arith.constant 0 : i32
    return %arg0, %2, %c0_i32_0 : i32, i32, i32
  }
  func.func @transform_2(%arg0: i32, %arg1: i32) -> (i32, i32, i32) {
    %c1_i32 = arith.constant 1 : i32
    %0 = arith.addi %arg1, %c1_i32 : i32
    %c4_i32 = arith.constant 4 : i32
    %1 = arith.muli %0, %c4_i32 : i32
    %c15_i32 = arith.constant 15 : i32
    %2 = arith.minsi %1, %c15_i32 : i32
    %c0_i32 = arith.constant 0 : i32
    %c0_i32_0 = arith.constant 0 : i32
    return %arg0, %2, %c0_i32 : i32, i32, i32
  }
  func.func @transform_3(%arg0: i32, %arg1: i32) -> (i32, i32) {
    %c0_i32 = arith.constant 0 : i32
    %c0_i32_0 = arith.constant 0 : i32
    %c0_i32_1 = arith.constant 0 : i32
    return %c0_i32, %c0_i32_0 : i32, i32
  }
  func.func @transform_4(%arg0: i32, %arg1: i32) -> (i32, i32) {
    %c0_i32 = arith.constant 0 : i32
    %c0_i32_0 = arith.constant 0 : i32
    %c0_i32_1 = arith.constant 0 : i32
    return %c0_i32, %c0_i32_0 : i32, i32
  }
  func.func @transform_5(%arg0: i32, %arg1: i32) -> (i32, i32) {
    %c0_i32 = arith.constant 0 : i32
    %c0_i32_0 = arith.constant 0 : i32
    %c0_i32_1 = arith.constant 0 : i32
    return %c0_i32, %c0_i32_0 : i32, i32
  }
  func.func @transform_6(%arg0: i32, %arg1: i32) -> (i32, i32) {
    %c0_i32 = arith.constant 0 : i32
    %c0_i32_0 = arith.constant 0 : i32
    %c0_i32_1 = arith.constant 0 : i32
    return %c0_i32, %c0_i32_0 : i32, i32
  }
  func.func @transform_7(%arg0: i32, %arg1: i32) -> (i32, i32) {
    %c0_i32 = arith.constant 0 : i32
    %c0_i32_0 = arith.constant 0 : i32
    %c0_i32_1 = arith.constant 0 : i32
    return %c0_i32, %c0_i32_0 : i32, i32
  }
  func.func @transform_8(%arg0: i32, %arg1: i32) -> (i32, i32) {
    %c0_i32 = arith.constant 0 : i32
    %c0_i32_0 = arith.constant 0 : i32
    %c0_i32_1 = arith.constant 0 : i32
    return %c0_i32, %c0_i32_0 : i32, i32
  }
  func.func @transform_9(%arg0: i32, %arg1: i32) -> (i32, i32, i32) {
    %c0_i32 = arith.constant 0 : i32
    %c0_i32_0 = arith.constant 0 : i32
    return %arg0, %arg1, %c0_i32 : i32, i32, i32
  }
}

module attributes {stable_mosaic.version = 11 : i64} {
  func.func @_mlp_kernel(%arg0: i32, %arg1: i32, %arg2: memref<1x64x4xf32, #tpu.memory_space<vmem>>, %arg3: memref<1x16x4xf32, #tpu.memory_space<vmem>>, %arg4: memref<1x16x4xf32, #tpu.memory_space<vmem>>, %arg5: memref<4x32xbf16, #tpu.memory_space<vmem>>, %arg6: memref<1x32xf32, #tpu.memory_space<vmem>>, %arg7: memref<9x32xf32, #tpu.memory_space<vmem>>, %arg8: memref<1x32xf32, #tpu.memory_space<vmem>>, %arg9: memref<32x4xbf16, #tpu.memory_space<vmem>>, %arg10: memref<1x4xf32, #tpu.memory_space<vmem>>, %arg11: memref<1x64x4xf32, #tpu.memory_space<vmem>>, %arg12: memref<96x32xf32, #tpu.memory_space<vmem>>) attributes {dimension_semantics = [#tpu.dimension_semantics<parallel>, #tpu.dimension_semantics<parallel>], iteration_bounds = array<i64: 2, 4>, scalar_prefetch = 0 : i64, scratch_operands = 1 : i64, tpu.core_type = #tpu.core_type<tc>, window_params = [{transform_indices = @transform_0, window_bounds = array<i64: 1, 64, 4>}, {transform_indices = @transform_1, window_bounds = array<i64: 1, 16, 4>}, {transform_indices = @transform_2, window_bounds = array<i64: 1, 16, 4>}, {pipeline_mode = #tpu.pipeline_mode<synchronous>, transform_indices = @transform_3, window_bounds = array<i64: 4, 32>}, {pipeline_mode = #tpu.pipeline_mode<synchronous>, transform_indices = @transform_4, window_bounds = array<i64: 1, 32>}, {pipeline_mode = #tpu.pipeline_mode<synchronous>, transform_indices = @transform_5, window_bounds = array<i64: 9, 32>}, {pipeline_mode = #tpu.pipeline_mode<synchronous>, transform_indices = @transform_6, window_bounds = array<i64: 1, 32>}, {pipeline_mode = #tpu.pipeline_mode<synchronous>, transform_indices = @transform_7, window_bounds = array<i64: 32, 4>}, {pipeline_mode = #tpu.pipeline_mode<synchronous>, transform_indices = @transform_8, window_bounds = array<i64: 1, 4>}, {transform_indices = @transform_9, window_bounds = array<i64: 1, 64, 4>}]} {
    %c0 = arith.constant 0 : index
    %c0_0 = arith.constant 0 : index
    %0 = vector.load %arg5[%c0, %c0_0] : memref<4x32xbf16, #tpu.memory_space<vmem>>, vector<4x32xbf16>
    %c0_1 = arith.constant 0 : index
    %c0_2 = arith.constant 0 : index
    %1 = vector.load %arg6[%c0_1, %c0_2] : memref<1x32xf32, #tpu.memory_space<vmem>>, vector<1x32xf32>
    %c0_3 = arith.constant 0 : index
    %c0_4 = arith.constant 0 : index
    %c0_5 = arith.constant 0 : index
    %2 = vector.load %arg2[%c0_3, %c0_4, %c0_5] : memref<1x64x4xf32, #tpu.memory_space<vmem>>, vector<1x64x4xf32>
    %3 = vector.shape_cast %2 : vector<1x64x4xf32> to vector<64x4xf32>
    %4 = arith.truncf %3 : vector<64x4xf32> to vector<64x4xbf16>
    %cst = arith.constant dense<0.000000e+00> : vector<64x32xf32>
    %5 = tpu.matmul %4, %0, %cst {dimension_numbers = #tpu.dot_dimension_numbers<[1], [0], [0], [1], [0, 0, 1, 1], [], []>} : vector<64x4xbf16>, vector<4x32xbf16>, vector<64x32xf32> -> vector<64x32xf32>
    %6 = vector.broadcast %1 : vector<1x32xf32> to vector<64x32xf32>
    %7 = arith.addf %5, %6 : vector<64x32xf32>
    %c16 = arith.constant 16 : index
    %c0_6 = arith.constant 0 : index
    %8 = vector.load %arg12[%c16, %c0_6] : memref<96x32xf32, #tpu.memory_space<vmem>>, vector<64x32xf32>
    tpu.vector_store %arg12[%c16, %c0_6], %7 {strides = array<i32>} : memref<96x32xf32, #tpu.memory_space<vmem>>, vector<64x32xf32>,
    %c0_i32 = arith.constant 0 : i32
    %9 = arith.cmpi eq, %arg1, %c0_i32 : i32
    %10 = arith.extui %9 : i1 to i32
    %c0_i32_7 = arith.constant 0 : i32
    %11 = arith.cmpi ne, %10, %c0_i32_7 : i32
    scf.if %11 {
      %cst_50 = arith.constant 0.000000e+00 : f32
      %136 = vector.broadcast %cst_50 : f32 to vector<16x32xf32>
      %c0_51 = arith.constant 0 : index
      %c0_52 = arith.constant 0 : index
      %137 = vector.load %arg12[%c0_51, %c0_52] : memref<96x32xf32, #tpu.memory_space<vmem>>, vector<16x32xf32>
      tpu.vector_store %arg12[%c0_51, %c0_52], %136 {strides = array<i32>} : memref<96x32xf32, #tpu.memory_space<vmem>>, vector<16x32xf32>,
    } else {
    }
    %c0_i32_8 = arith.constant 0 : i32
    %12 = arith.cmpi sgt, %arg1, %c0_i32_8 : i32
    %13 = arith.extui %12 : i1 to i32
    %c0_i32_9 = arith.constant 0 : i32
    %14 = arith.cmpi ne, %13, %c0_i32_9 : i32
    scf.if %14 {
      %c0_50 = arith.constant 0 : index
      %c0_51 = arith.constant 0 : index
      %c0_52 = arith.constant 0 : index
      %136 = vector.load %arg3[%c0_50, %c0_51, %c0_52] : memref<1x16x4xf32, #tpu.memory_space<vmem>>, vector<1x16x4xf32>
      %137 = vector.shape_cast %136 : vector<1x16x4xf32> to vector<16x4xf32>
      %138 = arith.truncf %137 : vector<16x4xf32> to vector<16x4xbf16>
      %cst_53 = arith.constant dense<0.000000e+00> : vector<16x32xf32>
      %139 = tpu.matmul %138, %0, %cst_53 {dimension_numbers = #tpu.dot_dimension_numbers<[1], [0], [0], [1], [0, 0, 1, 1], [], []>} : vector<16x4xbf16>, vector<4x32xbf16>, vector<16x32xf32> -> vector<16x32xf32>
      %140 = vector.broadcast %1 : vector<1x32xf32> to vector<16x32xf32>
      %141 = arith.addf %139, %140 : vector<16x32xf32>
      %c0_54 = arith.constant 0 : index
      %c0_55 = arith.constant 0 : index
      %142 = vector.load %arg12[%c0_54, %c0_55] : memref<96x32xf32, #tpu.memory_space<vmem>>, vector<16x32xf32>
      tpu.vector_store %arg12[%c0_54, %c0_55], %141 {strides = array<i32>} : memref<96x32xf32, #tpu.memory_space<vmem>>, vector<16x32xf32>,
    } else {
    }
    %c3_i32 = arith.constant 3 : i32
    %15 = arith.cmpi eq, %arg1, %c3_i32 : i32
    %16 = arith.extui %15 : i1 to i32
    %c0_i32_10 = arith.constant 0 : i32
    %17 = arith.cmpi ne, %16, %c0_i32_10 : i32
    scf.if %17 {
      %cst_50 = arith.constant 0.000000e+00 : f32
      %136 = vector.broadcast %cst_50 : f32 to vector<16x32xf32>
      %c80 = arith.constant 80 : index
      %c0_51 = arith.constant 0 : index
      %137 = vector.load %arg12[%c80, %c0_51] : memref<96x32xf32, #tpu.memory_space<vmem>>, vector<16x32xf32>
      tpu.vector_store %arg12[%c80, %c0_51], %136 {strides = array<i32>} : memref<96x32xf32, #tpu.memory_space<vmem>>, vector<16x32xf32>,
    } else {
    }
    %c3_i32_11 = arith.constant 3 : i32
    %18 = arith.cmpi slt, %arg1, %c3_i32_11 : i32
    %19 = arith.extui %18 : i1 to i32
    %c0_i32_12 = arith.constant 0 : i32
    %20 = arith.cmpi ne, %19, %c0_i32_12 : i32
    scf.if %20 {
      %c0_50 = arith.constant 0 : index
      %c0_51 = arith.constant 0 : index
      %c0_52 = arith.constant 0 : index
      %136 = vector.load %arg4[%c0_50, %c0_51, %c0_52] : memref<1x16x4xf32, #tpu.memory_space<vmem>>, vector<1x16x4xf32>
      %137 = vector.shape_cast %136 : vector<1x16x4xf32> to vector<16x4xf32>
      %138 = arith.truncf %137 : vector<16x4xf32> to vector<16x4xbf16>
      %cst_53 = arith.constant dense<0.000000e+00> : vector<16x32xf32>
      %139 = tpu.matmul %138, %0, %cst_53 {dimension_numbers = #tpu.dot_dimension_numbers<[1], [0], [0], [1], [0, 0, 1, 1], [], []>} : vector<16x4xbf16>, vector<4x32xbf16>, vector<16x32xf32> -> vector<16x32xf32>
      %140 = vector.broadcast %1 : vector<1x32xf32> to vector<16x32xf32>
      %141 = arith.addf %139, %140 : vector<16x32xf32>
      %c80 = arith.constant 80 : index
      %c0_54 = arith.constant 0 : index
      %142 = vector.load %arg12[%c80, %c0_54] : memref<96x32xf32, #tpu.memory_space<vmem>>, vector<16x32xf32>
      tpu.vector_store %arg12[%c80, %c0_54], %141 {strides = array<i32>} : memref<96x32xf32, #tpu.memory_space<vmem>>, vector<16x32xf32>,
    } else {
    }
    %c0_13 = arith.constant 0 : index
    %c0_14 = arith.constant 0 : index
    %21 = vector.load %arg7[%c0_13, %c0_14] : memref<9x32xf32, #tpu.memory_space<vmem>>, vector<9x32xf32>
    %22 = tpu.iota {dimensions = array<i32: 0>} : vector<64x1xi32>
    %c16_i32 = arith.constant 16 : i32
    %c0_i32_15 = arith.constant 0 : i32
    %23 = arith.cmpi eq, %c16_i32, %c0_i32_15 : i32
    %c1_i32 = arith.constant 1 : i32
    %24 = arith.select %23, %c1_i32, %c16_i32 : i32
    %25 = vector.broadcast %24 : i32 to vector<64x1xi32>
    %26 = arith.remsi %22, %25 : vector<64x1xi32>
    %c0_i32_16 = arith.constant 0 : i32
    %27 = vector.broadcast %c0_i32_16 : i32 to vector<64x1xi32>
    %28 = arith.cmpi ne, %26, %27 : vector<64x1xi32>
    %c0_i32_17 = arith.constant 0 : i32
    %29 = vector.broadcast %c0_i32_17 : i32 to vector<64x1xi32>
    %30 = arith.cmpi slt, %26, %29 : vector<64x1xi32>
    %c0_i32_18 = arith.constant 0 : i32
    %31 = arith.cmpi slt, %24, %c0_i32_18 : i32
    %32 = vector.broadcast %31 : i1 to vector<64x1xi1>
    %33 = vector.broadcast %32 : vector<64x1xi1> to vector<64x1xi1>
    %34 = arith.xori %30, %33 : vector<64x1xi1>
    %35 = arith.andi %34, %28 : vector<64x1xi1>
    %36 = vector.broadcast %24 : i32 to vector<64x1xi32>
    %37 = arith.addi %26, %36 : vector<64x1xi32>
    %38 = arith.select %35, %37, %26 : vector<64x1xi1>, vector<64x1xi32>
    %c0_i32_19 = arith.constant 0 : i32
    %39 = vector.broadcast %c0_i32_19 : i32 to vector<64x1xi32>
    %40 = arith.cmpi sgt, %38, %39 : vector<64x1xi32>
    %c15_i32 = arith.constant 15 : i32
    %41 = vector.broadcast %c15_i32 : i32 to vector<64x1xi32>
    %42 = arith.cmpi slt, %38, %41 : vector<64x1xi32>
    %c0_20 = arith.constant 0 : index
    %c0_21 = arith.constant 0 : index
    %43 = vector.load %arg12[%c0_20, %c0_21] : memref<96x32xf32, #tpu.memory_space<vmem>>, vector<64x32xf32>
    %44 = vector.extract_strided_slice %21 {offsets = [1, 0], sizes = [1, 32], strides = [1, 1]} : vector<9x32xf32> to vector<1x32xf32>
    %45 = vector.broadcast %44 : vector<1x32xf32> to vector<64x32xf32>
    %46 = arith.mulf %43, %45 : vector<64x32xf32>
    %c1_i32_22 = arith.constant 1 : i32
    %47 = tpu.dynamic_rotate %43 by %c1_i32_22 dim 0 : vector<64x32xf32>, i32 -> vector<64x32xf32>
    %cst_23 = arith.constant 0.000000e+00 : f32
    %48 = vector.shape_cast %40 : vector<64x1xi1> to vector<64x1xi1>
    %49 = vector.broadcast %48 : vector<64x1xi1> to vector<64x32xi1>
    %50 = vector.broadcast %cst_23 : f32 to vector<64x32xf32>
    %51 = arith.select %49, %47, %50 : vector<64x32xi1>, vector<64x32xf32>
    %52 = vector.extract_strided_slice %21 {offsets = [0, 0], sizes = [1, 32], strides = [1, 1]} : vector<9x32xf32> to vector<1x32xf32>
    %53 = vector.broadcast %52 : vector<1x32xf32> to vector<64x32xf32>
    %54 = arith.mulf %51, %53 : vector<64x32xf32>
    %55 = arith.addf %46, %54 : vector<64x32xf32>
    %c63_i32 = arith.constant 63 : i32
    %56 = tpu.dynamic_rotate %43 by %c63_i32 dim 0 : vector<64x32xf32>, i32 -> vector<64x32xf32>
    %cst_24 = arith.constant 0.000000e+00 : f32
    %57 = vector.shape_cast %42 : vector<64x1xi1> to vector<64x1xi1>
    %58 = vector.broadcast %57 : vector<64x1xi1> to vector<64x32xi1>
    %59 = vector.broadcast %cst_24 : f32 to vector<64x32xf32>
    %60 = arith.select %58, %56, %59 : vector<64x32xi1>, vector<64x32xf32>
    %61 = vector.extract_strided_slice %21 {offsets = [2, 0], sizes = [1, 32], strides = [1, 1]} : vector<9x32xf32> to vector<1x32xf32>
    %62 = vector.broadcast %61 : vector<1x32xf32> to vector<64x32xf32>
    %63 = arith.mulf %60, %62 : vector<64x32xf32>
    %64 = arith.addf %55, %63 : vector<64x32xf32>
    %c16_25 = arith.constant 16 : index
    %c0_26 = arith.constant 0 : index
    %65 = vector.load %arg12[%c16_25, %c0_26] : memref<96x32xf32, #tpu.memory_space<vmem>>, vector<64x32xf32>
    %66 = vector.extract_strided_slice %21 {offsets = [4, 0], sizes = [1, 32], strides = [1, 1]} : vector<9x32xf32> to vector<1x32xf32>
    %67 = vector.broadcast %66 : vector<1x32xf32> to vector<64x32xf32>
    %68 = arith.mulf %65, %67 : vector<64x32xf32>
    %69 = arith.addf %64, %68 : vector<64x32xf32>
    %c1_i32_27 = arith.constant 1 : i32
    %70 = tpu.dynamic_rotate %65 by %c1_i32_27 dim 0 : vector<64x32xf32>, i32 -> vector<64x32xf32>
    %cst_28 = arith.constant 0.000000e+00 : f32
    %71 = vector.shape_cast %40 : vector<64x1xi1> to vector<64x1xi1>
    %72 = vector.broadcast %71 : vector<64x1xi1> to vector<64x32xi1>
    %73 = vector.broadcast %cst_28 : f32 to vector<64x32xf32>
    %74 = arith.select %72, %70, %73 : vector<64x32xi1>, vector<64x32xf32>
    %75 = vector.extract_strided_slice %21 {offsets = [3, 0], sizes = [1, 32], strides = [1, 1]} : vector<9x32xf32> to vector<1x32xf32>
    %76 = vector.broadcast %75 : vector<1x32xf32> to vector<64x32xf32>
    %77 = arith.mulf %74, %76 : vector<64x32xf32>
    %78 = arith.addf %69, %77 : vector<64x32xf32>
    %c63_i32_29 = arith.constant 63 : i32
    %79 = tpu.dynamic_rotate %65 by %c63_i32_29 dim 0 : vector<64x32xf32>, i32 -> vector<64x32xf32>
    %cst_30 = arith.constant 0.000000e+00 : f32
    %80 = vector.shape_cast %42 : vector<64x1xi1> to vector<64x1xi1>
    %81 = vector.broadcast %80 : vector<64x1xi1> to vector<64x32xi1>
    %82 = vector.broadcast %cst_30 : f32 to vector<64x32xf32>
    %83 = arith.select %81, %79, %82 : vector<64x32xi1>, vector<64x32xf32>
    %84 = vector.extract_strided_slice %21 {offsets = [5, 0], sizes = [1, 32], strides = [1, 1]} : vector<9x32xf32> to vector<1x32xf32>
    %85 = vector.broadcast %84 : vector<1x32xf32> to vector<64x32xf32>
    %86 = arith.mulf %83, %85 : vector<64x32xf32>
    %87 = arith.addf %78, %86 : vector<64x32xf32>
    %c32 = arith.constant 32 : index
    %c0_31 = arith.constant 0 : index
    %88 = vector.load %arg12[%c32, %c0_31] : memref<96x32xf32, #tpu.memory_space<vmem>>, vector<64x32xf32>
    %89 = vector.extract_strided_slice %21 {offsets = [7, 0], sizes = [1, 32], strides = [1, 1]} : vector<9x32xf32> to vector<1x32xf32>
    %90 = vector.broadcast %89 : vector<1x32xf32> to vector<64x32xf32>
    %91 = arith.mulf %88, %90 : vector<64x32xf32>
    %92 = arith.addf %87, %91 : vector<64x32xf32>
    %c1_i32_32 = arith.constant 1 : i32
    %93 = tpu.dynamic_rotate %88 by %c1_i32_32 dim 0 : vector<64x32xf32>, i32 -> vector<64x32xf32>
    %cst_33 = arith.constant 0.000000e+00 : f32
    %94 = vector.shape_cast %40 : vector<64x1xi1> to vector<64x1xi1>
    %95 = vector.broadcast %94 : vector<64x1xi1> to vector<64x32xi1>
    %96 = vector.broadcast %cst_33 : f32 to vector<64x32xf32>
    %97 = arith.select %95, %93, %96 : vector<64x32xi1>, vector<64x32xf32>
    %98 = vector.extract_strided_slice %21 {offsets = [6, 0], sizes = [1, 32], strides = [1, 1]} : vector<9x32xf32> to vector<1x32xf32>
    %99 = vector.broadcast %98 : vector<1x32xf32> to vector<64x32xf32>
    %100 = arith.mulf %97, %99 : vector<64x32xf32>
    %101 = arith.addf %92, %100 : vector<64x32xf32>
    %c63_i32_34 = arith.constant 63 : i32
    %102 = tpu.dynamic_rotate %88 by %c63_i32_34 dim 0 : vector<64x32xf32>, i32 -> vector<64x32xf32>
    %cst_35 = arith.constant 0.000000e+00 : f32
    %103 = vector.shape_cast %42 : vector<64x1xi1> to vector<64x1xi1>
    %104 = vector.broadcast %103 : vector<64x1xi1> to vector<64x32xi1>
    %105 = vector.broadcast %cst_35 : f32 to vector<64x32xf32>
    %106 = arith.select %104, %102, %105 : vector<64x32xi1>, vector<64x32xf32>
    %107 = vector.extract_strided_slice %21 {offsets = [8, 0], sizes = [1, 32], strides = [1, 1]} : vector<9x32xf32> to vector<1x32xf32>
    %108 = vector.broadcast %107 : vector<1x32xf32> to vector<64x32xf32>
    %109 = arith.mulf %106, %108 : vector<64x32xf32>
    %110 = arith.addf %101, %109 : vector<64x32xf32>
    %c0_36 = arith.constant 0 : index
    %c0_37 = arith.constant 0 : index
    %111 = vector.load %arg8[%c0_36, %c0_37] : memref<1x32xf32, #tpu.memory_space<vmem>>, vector<1x32xf32>
    %112 = vector.broadcast %111 : vector<1x32xf32> to vector<64x32xf32>
    %113 = arith.addf %110, %112 : vector<64x32xf32>
    %114 = arith.mulf %113, %113 : vector<64x32xf32>
    %115 = arith.mulf %114, %113 : vector<64x32xf32>
    %cst_38 = arith.constant 4.471500e-02 : f32
    %116 = vector.broadcast %cst_38 : f32 to vector<64x32xf32>
    %117 = arith.mulf %116, %115 : vector<64x32xf32>
    %118 = arith.addf %113, %117 : vector<64x32xf32>
    %cst_39 = arith.constant 0.797884583 : f32
    %119 = vector.broadcast %cst_39 : f32 to vector<64x32xf32>
    %120 = arith.mulf %119, %118 : vector<64x32xf32>
    %cst_40 = arith.constant 5.000000e-01 : f32
    %121 = vector.broadcast %cst_40 : f32 to vector<64x32xf32>
    %122 = arith.mulf %121, %113 : vector<64x32xf32>
    %123 = math.tanh %120 : vector<64x32xf32>
    %cst_41 = arith.constant 1.000000e+00 : f32
    %124 = vector.broadcast %cst_41 : f32 to vector<64x32xf32>
    %125 = arith.addf %124, %123 : vector<64x32xf32>
    %126 = arith.mulf %122, %125 : vector<64x32xf32>
    %127 = arith.truncf %126 : vector<64x32xf32> to vector<64x32xbf16>
    %c0_42 = arith.constant 0 : index
    %c0_43 = arith.constant 0 : index
    %128 = vector.load %arg9[%c0_42, %c0_43] : memref<32x4xbf16, #tpu.memory_space<vmem>>, vector<32x4xbf16>
    %cst_44 = arith.constant dense<0.000000e+00> : vector<64x4xf32>
    %129 = tpu.matmul %127, %128, %cst_44 {dimension_numbers = #tpu.dot_dimension_numbers<[1], [0], [0], [1], [0, 0, 1, 1], [], []>} : vector<64x32xbf16>, vector<32x4xbf16>, vector<64x4xf32> -> vector<64x4xf32>
    %c0_45 = arith.constant 0 : index
    %c0_46 = arith.constant 0 : index
    %130 = vector.load %arg10[%c0_45, %c0_46] : memref<1x4xf32, #tpu.memory_space<vmem>>, vector<1x4xf32>
    %131 = vector.broadcast %130 : vector<1x4xf32> to vector<64x4xf32>
    %132 = arith.addf %129, %131 : vector<64x4xf32>
    %c0_47 = arith.constant 0 : index
    %c0_48 = arith.constant 0 : index
    %c0_49 = arith.constant 0 : index
    %133 = vector.load %arg11[%c0_47, %c0_48, %c0_49] : memref<1x64x4xf32, #tpu.memory_space<vmem>>, vector<1x64x4xf32>
    %134 = vector.shape_cast %133 : vector<1x64x4xf32> to vector<64x4xf32>
    %135 = vector.shape_cast %132 : vector<64x4xf32> to vector<1x64x4xf32>
    tpu.vector_store %arg11[%c0_47, %c0_48, %c0_49], %135 {strides = array<i32>} : memref<1x64x4xf32, #tpu.memory_space<vmem>>, vector<1x64x4xf32>,
    return
  }
  func.func @transform_0(%arg0: i32, %arg1: i32) -> (i32, i32, i32) {
    %c0_i32 = arith.constant 0 : i32
    %c0_i32_0 = arith.constant 0 : i32
    return %arg0, %arg1, %c0_i32 : i32, i32, i32
  }
  func.func @transform_1(%arg0: i32, %arg1: i32) -> (i32, i32, i32) {
    %c4_i32 = arith.constant 4 : i32
    %0 = arith.muli %arg1, %c4_i32 : i32
    %c1_i32 = arith.constant 1 : i32
    %1 = arith.subi %0, %c1_i32 : i32
    %c0_i32 = arith.constant 0 : i32
    %2 = arith.maxsi %1, %c0_i32 : i32
    %c0_i32_0 = arith.constant 0 : i32
    %c0_i32_1 = arith.constant 0 : i32
    return %arg0, %2, %c0_i32_0 : i32, i32, i32
  }
  func.func @transform_2(%arg0: i32, %arg1: i32) -> (i32, i32, i32) {
    %c1_i32 = arith.constant 1 : i32
    %0 = arith.addi %arg1, %c1_i32 : i32
    %c4_i32 = arith.constant 4 : i32
    %1 = arith.muli %0, %c4_i32 : i32
    %c15_i32 = arith.constant 15 : i32
    %2 = arith.minsi %1, %c15_i32 : i32
    %c0_i32 = arith.constant 0 : i32
    %c0_i32_0 = arith.constant 0 : i32
    return %arg0, %2, %c0_i32 : i32, i32, i32
  }
  func.func @transform_3(%arg0: i32, %arg1: i32) -> (i32, i32) {
    %c0_i32 = arith.constant 0 : i32
    %c0_i32_0 = arith.constant 0 : i32
    %c0_i32_1 = arith.constant 0 : i32
    return %c0_i32, %c0_i32_0 : i32, i32
  }
  func.func @transform_4(%arg0: i32, %arg1: i32) -> (i32, i32) {
    %c0_i32 = arith.constant 0 : i32
    %c0_i32_0 = arith.constant 0 : i32
    %c0_i32_1 = arith.constant 0 : i32
    return %c0_i32, %c0_i32_0 : i32, i32
  }
  func.func @transform_5(%arg0: i32, %arg1: i32) -> (i32, i32) {
    %c0_i32 = arith.constant 0 : i32
    %c0_i32_0 = arith.constant 0 : i32
    %c0_i32_1 = arith.constant 0 : i32
    return %c0_i32, %c0_i32_0 : i32, i32
  }
  func.func @transform_6(%arg0: i32, %arg1: i32) -> (i32, i32) {
    %c0_i32 = arith.constant 0 : i32
    %c0_i32_0 = arith.constant 0 : i32
    %c0_i32_1 = arith.constant 0 : i32
    return %c0_i32, %c0_i32_0 : i32, i32
  }
  func.func @transform_7(%arg0: i32, %arg1: i32) -> (i32, i32) {
    %c0_i32 = arith.constant 0 : i32
    %c0_i32_0 = arith.constant 0 : i32
    %c0_i32_1 = arith.constant 0 : i32
    return %c0_i32, %c0_i32_0 : i32, i32
  }
  func.func @transform_8(%arg0: i32, %arg1: i32) -> (i32, i32) {
    %c0_i32 = arith.constant 0 : i32
    %c0_i32_0 = arith.constant 0 : i32
    %c0_i32_1 = arith.constant 0 : i32
    return %c0_i32, %c0_i32_0 : i32, i32
  }
  func.func @transform_9(%arg0: i32, %arg1: i32) -> (i32, i32, i32) {
    %c0_i32 = arith.constant 0 : i32
    %c0_i32_0 = arith.constant 0 : i32
    return %arg0, %arg1, %c0_i32 : i32, i32, i32
  }
}

module attributes {stable_mosaic.version = 11 : i64} {
  func.func @_mlp_kernel(%arg0: i32, %arg1: i32, %arg2: memref<1x64x4xf32, #tpu.memory_space<vmem>>, %arg3: memref<1x16x4xf32, #tpu.memory_space<vmem>>, %arg4: memref<1x16x4xf32, #tpu.memory_space<vmem>>, %arg5: memref<4x32xbf16, #tpu.memory_space<vmem>>, %arg6: memref<1x32xf32, #tpu.memory_space<vmem>>, %arg7: memref<9x32xf32, #tpu.memory_space<vmem>>, %arg8: memref<1x32xf32, #tpu.memory_space<vmem>>, %arg9: memref<32x4xbf16, #tpu.memory_space<vmem>>, %arg10: memref<1x4xf32, #tpu.memory_space<vmem>>, %arg11: memref<1x64x4xf32, #tpu.memory_space<vmem>>, %arg12: memref<96x32xf32, #tpu.memory_space<vmem>>) attributes {dimension_semantics = [#tpu.dimension_semantics<parallel>, #tpu.dimension_semantics<parallel>], iteration_bounds = array<i64: 2, 4>, scalar_prefetch = 0 : i64, scratch_operands = 1 : i64, tpu.core_type = #tpu.core_type<tc>, window_params = [{transform_indices = @transform_0, window_bounds = array<i64: 1, 64, 4>}, {transform_indices = @transform_1, window_bounds = array<i64: 1, 16, 4>}, {transform_indices = @transform_2, window_bounds = array<i64: 1, 16, 4>}, {pipeline_mode = #tpu.pipeline_mode<synchronous>, transform_indices = @transform_3, window_bounds = array<i64: 4, 32>}, {pipeline_mode = #tpu.pipeline_mode<synchronous>, transform_indices = @transform_4, window_bounds = array<i64: 1, 32>}, {pipeline_mode = #tpu.pipeline_mode<synchronous>, transform_indices = @transform_5, window_bounds = array<i64: 9, 32>}, {pipeline_mode = #tpu.pipeline_mode<synchronous>, transform_indices = @transform_6, window_bounds = array<i64: 1, 32>}, {pipeline_mode = #tpu.pipeline_mode<synchronous>, transform_indices = @transform_7, window_bounds = array<i64: 32, 4>}, {pipeline_mode = #tpu.pipeline_mode<synchronous>, transform_indices = @transform_8, window_bounds = array<i64: 1, 4>}, {transform_indices = @transform_9, window_bounds = array<i64: 1, 64, 4>}]} {
    %c0 = arith.constant 0 : index
    %c0_0 = arith.constant 0 : index
    %0 = vector.load %arg5[%c0, %c0_0] : memref<4x32xbf16, #tpu.memory_space<vmem>>, vector<4x32xbf16>
    %c0_1 = arith.constant 0 : index
    %c0_2 = arith.constant 0 : index
    %1 = vector.load %arg6[%c0_1, %c0_2] : memref<1x32xf32, #tpu.memory_space<vmem>>, vector<1x32xf32>
    %c0_3 = arith.constant 0 : index
    %c0_4 = arith.constant 0 : index
    %c0_5 = arith.constant 0 : index
    %2 = vector.load %arg2[%c0_3, %c0_4, %c0_5] : memref<1x64x4xf32, #tpu.memory_space<vmem>>, vector<1x64x4xf32>
    %3 = vector.shape_cast %2 : vector<1x64x4xf32> to vector<64x4xf32>
    %4 = arith.truncf %3 : vector<64x4xf32> to vector<64x4xbf16>
    %cst = arith.constant dense<0.000000e+00> : vector<64x32xf32>
    %5 = tpu.matmul %4, %0, %cst {dimension_numbers = #tpu.dot_dimension_numbers<[1], [0], [0], [1], [0, 0, 1, 1], [], []>} : vector<64x4xbf16>, vector<4x32xbf16>, vector<64x32xf32> -> vector<64x32xf32>
    %6 = vector.broadcast %1 : vector<1x32xf32> to vector<64x32xf32>
    %7 = arith.addf %5, %6 : vector<64x32xf32>
    %c16 = arith.constant 16 : index
    %c0_6 = arith.constant 0 : index
    %8 = vector.load %arg12[%c16, %c0_6] : memref<96x32xf32, #tpu.memory_space<vmem>>, vector<64x32xf32>
    tpu.vector_store %arg12[%c16, %c0_6], %7 {strides = array<i32>} : memref<96x32xf32, #tpu.memory_space<vmem>>, vector<64x32xf32>,
    %c0_i32 = arith.constant 0 : i32
    %9 = arith.cmpi eq, %arg1, %c0_i32 : i32
    %10 = arith.extui %9 : i1 to i32
    %c0_i32_7 = arith.constant 0 : i32
    %11 = arith.cmpi ne, %10, %c0_i32_7 : i32
    scf.if %11 {
      %cst_50 = arith.constant 0.000000e+00 : f32
      %136 = vector.broadcast %cst_50 : f32 to vector<16x32xf32>
      %c0_51 = arith.constant 0 : index
      %c0_52 = arith.constant 0 : index
      %137 = vector.load %arg12[%c0_51, %c0_52] : memref<96x32xf32, #tpu.memory_space<vmem>>, vector<16x32xf32>
      tpu.vector_store %arg12[%c0_51, %c0_52], %136 {strides = array<i32>} : memref<96x32xf32, #tpu.memory_space<vmem>>, vector<16x32xf32>,
    } else {
    }
    %c0_i32_8 = arith.constant 0 : i32
    %12 = arith.cmpi sgt, %arg1, %c0_i32_8 : i32
    %13 = arith.extui %12 : i1 to i32
    %c0_i32_9 = arith.constant 0 : i32
    %14 = arith.cmpi ne, %13, %c0_i32_9 : i32
    scf.if %14 {
      %c0_50 = arith.constant 0 : index
      %c0_51 = arith.constant 0 : index
      %c0_52 = arith.constant 0 : index
      %136 = vector.load %arg3[%c0_50, %c0_51, %c0_52] : memref<1x16x4xf32, #tpu.memory_space<vmem>>, vector<1x16x4xf32>
      %137 = vector.shape_cast %136 : vector<1x16x4xf32> to vector<16x4xf32>
      %138 = arith.truncf %137 : vector<16x4xf32> to vector<16x4xbf16>
      %cst_53 = arith.constant dense<0.000000e+00> : vector<16x32xf32>
      %139 = tpu.matmul %138, %0, %cst_53 {dimension_numbers = #tpu.dot_dimension_numbers<[1], [0], [0], [1], [0, 0, 1, 1], [], []>} : vector<16x4xbf16>, vector<4x32xbf16>, vector<16x32xf32> -> vector<16x32xf32>
      %140 = vector.broadcast %1 : vector<1x32xf32> to vector<16x32xf32>
      %141 = arith.addf %139, %140 : vector<16x32xf32>
      %c0_54 = arith.constant 0 : index
      %c0_55 = arith.constant 0 : index
      %142 = vector.load %arg12[%c0_54, %c0_55] : memref<96x32xf32, #tpu.memory_space<vmem>>, vector<16x32xf32>
      tpu.vector_store %arg12[%c0_54, %c0_55], %141 {strides = array<i32>} : memref<96x32xf32, #tpu.memory_space<vmem>>, vector<16x32xf32>,
    } else {
    }
    %c3_i32 = arith.constant 3 : i32
    %15 = arith.cmpi eq, %arg1, %c3_i32 : i32
    %16 = arith.extui %15 : i1 to i32
    %c0_i32_10 = arith.constant 0 : i32
    %17 = arith.cmpi ne, %16, %c0_i32_10 : i32
    scf.if %17 {
      %cst_50 = arith.constant 0.000000e+00 : f32
      %136 = vector.broadcast %cst_50 : f32 to vector<16x32xf32>
      %c80 = arith.constant 80 : index
      %c0_51 = arith.constant 0 : index
      %137 = vector.load %arg12[%c80, %c0_51] : memref<96x32xf32, #tpu.memory_space<vmem>>, vector<16x32xf32>
      tpu.vector_store %arg12[%c80, %c0_51], %136 {strides = array<i32>} : memref<96x32xf32, #tpu.memory_space<vmem>>, vector<16x32xf32>,
    } else {
    }
    %c3_i32_11 = arith.constant 3 : i32
    %18 = arith.cmpi slt, %arg1, %c3_i32_11 : i32
    %19 = arith.extui %18 : i1 to i32
    %c0_i32_12 = arith.constant 0 : i32
    %20 = arith.cmpi ne, %19, %c0_i32_12 : i32
    scf.if %20 {
      %c0_50 = arith.constant 0 : index
      %c0_51 = arith.constant 0 : index
      %c0_52 = arith.constant 0 : index
      %136 = vector.load %arg4[%c0_50, %c0_51, %c0_52] : memref<1x16x4xf32, #tpu.memory_space<vmem>>, vector<1x16x4xf32>
      %137 = vector.shape_cast %136 : vector<1x16x4xf32> to vector<16x4xf32>
      %138 = arith.truncf %137 : vector<16x4xf32> to vector<16x4xbf16>
      %cst_53 = arith.constant dense<0.000000e+00> : vector<16x32xf32>
      %139 = tpu.matmul %138, %0, %cst_53 {dimension_numbers = #tpu.dot_dimension_numbers<[1], [0], [0], [1], [0, 0, 1, 1], [], []>} : vector<16x4xbf16>, vector<4x32xbf16>, vector<16x32xf32> -> vector<16x32xf32>
      %140 = vector.broadcast %1 : vector<1x32xf32> to vector<16x32xf32>
      %141 = arith.addf %139, %140 : vector<16x32xf32>
      %c80 = arith.constant 80 : index
      %c0_54 = arith.constant 0 : index
      %142 = vector.load %arg12[%c80, %c0_54] : memref<96x32xf32, #tpu.memory_space<vmem>>, vector<16x32xf32>
      tpu.vector_store %arg12[%c80, %c0_54], %141 {strides = array<i32>} : memref<96x32xf32, #tpu.memory_space<vmem>>, vector<16x32xf32>,
    } else {
    }
    %c0_13 = arith.constant 0 : index
    %c0_14 = arith.constant 0 : index
    %21 = vector.load %arg7[%c0_13, %c0_14] : memref<9x32xf32, #tpu.memory_space<vmem>>, vector<9x32xf32>
    %22 = tpu.iota {dimensions = array<i32: 0>} : vector<64x1xi32>
    %c16_i32 = arith.constant 16 : i32
    %c0_i32_15 = arith.constant 0 : i32
    %23 = arith.cmpi eq, %c16_i32, %c0_i32_15 : i32
    %c1_i32 = arith.constant 1 : i32
    %24 = arith.select %23, %c1_i32, %c16_i32 : i32
    %25 = vector.broadcast %24 : i32 to vector<64x1xi32>
    %26 = arith.remsi %22, %25 : vector<64x1xi32>
    %c0_i32_16 = arith.constant 0 : i32
    %27 = vector.broadcast %c0_i32_16 : i32 to vector<64x1xi32>
    %28 = arith.cmpi ne, %26, %27 : vector<64x1xi32>
    %c0_i32_17 = arith.constant 0 : i32
    %29 = vector.broadcast %c0_i32_17 : i32 to vector<64x1xi32>
    %30 = arith.cmpi slt, %26, %29 : vector<64x1xi32>
    %c0_i32_18 = arith.constant 0 : i32
    %31 = arith.cmpi slt, %24, %c0_i32_18 : i32
    %32 = vector.broadcast %31 : i1 to vector<64x1xi1>
    %33 = vector.broadcast %32 : vector<64x1xi1> to vector<64x1xi1>
    %34 = arith.xori %30, %33 : vector<64x1xi1>
    %35 = arith.andi %34, %28 : vector<64x1xi1>
    %36 = vector.broadcast %24 : i32 to vector<64x1xi32>
    %37 = arith.addi %26, %36 : vector<64x1xi32>
    %38 = arith.select %35, %37, %26 : vector<64x1xi1>, vector<64x1xi32>
    %c0_i32_19 = arith.constant 0 : i32
    %39 = vector.broadcast %c0_i32_19 : i32 to vector<64x1xi32>
    %40 = arith.cmpi sgt, %38, %39 : vector<64x1xi32>
    %c15_i32 = arith.constant 15 : i32
    %41 = vector.broadcast %c15_i32 : i32 to vector<64x1xi32>
    %42 = arith.cmpi slt, %38, %41 : vector<64x1xi32>
    %c0_20 = arith.constant 0 : index
    %c0_21 = arith.constant 0 : index
    %43 = vector.load %arg12[%c0_20, %c0_21] : memref<96x32xf32, #tpu.memory_space<vmem>>, vector<64x32xf32>
    %44 = vector.extract_strided_slice %21 {offsets = [1, 0], sizes = [1, 32], strides = [1, 1]} : vector<9x32xf32> to vector<1x32xf32>
    %45 = vector.broadcast %44 : vector<1x32xf32> to vector<64x32xf32>
    %46 = arith.mulf %43, %45 : vector<64x32xf32>
    %c1_i32_22 = arith.constant 1 : i32
    %47 = tpu.dynamic_rotate %43 by %c1_i32_22 dim 0 : vector<64x32xf32>, i32 -> vector<64x32xf32>
    %cst_23 = arith.constant 0.000000e+00 : f32
    %48 = vector.shape_cast %40 : vector<64x1xi1> to vector<64x1xi1>
    %49 = vector.broadcast %48 : vector<64x1xi1> to vector<64x32xi1>
    %50 = vector.broadcast %cst_23 : f32 to vector<64x32xf32>
    %51 = arith.select %49, %47, %50 : vector<64x32xi1>, vector<64x32xf32>
    %52 = vector.extract_strided_slice %21 {offsets = [0, 0], sizes = [1, 32], strides = [1, 1]} : vector<9x32xf32> to vector<1x32xf32>
    %53 = vector.broadcast %52 : vector<1x32xf32> to vector<64x32xf32>
    %54 = arith.mulf %51, %53 : vector<64x32xf32>
    %55 = arith.addf %46, %54 : vector<64x32xf32>
    %c63_i32 = arith.constant 63 : i32
    %56 = tpu.dynamic_rotate %43 by %c63_i32 dim 0 : vector<64x32xf32>, i32 -> vector<64x32xf32>
    %cst_24 = arith.constant 0.000000e+00 : f32
    %57 = vector.shape_cast %42 : vector<64x1xi1> to vector<64x1xi1>
    %58 = vector.broadcast %57 : vector<64x1xi1> to vector<64x32xi1>
    %59 = vector.broadcast %cst_24 : f32 to vector<64x32xf32>
    %60 = arith.select %58, %56, %59 : vector<64x32xi1>, vector<64x32xf32>
    %61 = vector.extract_strided_slice %21 {offsets = [2, 0], sizes = [1, 32], strides = [1, 1]} : vector<9x32xf32> to vector<1x32xf32>
    %62 = vector.broadcast %61 : vector<1x32xf32> to vector<64x32xf32>
    %63 = arith.mulf %60, %62 : vector<64x32xf32>
    %64 = arith.addf %55, %63 : vector<64x32xf32>
    %c16_25 = arith.constant 16 : index
    %c0_26 = arith.constant 0 : index
    %65 = vector.load %arg12[%c16_25, %c0_26] : memref<96x32xf32, #tpu.memory_space<vmem>>, vector<64x32xf32>
    %66 = vector.extract_strided_slice %21 {offsets = [4, 0], sizes = [1, 32], strides = [1, 1]} : vector<9x32xf32> to vector<1x32xf32>
    %67 = vector.broadcast %66 : vector<1x32xf32> to vector<64x32xf32>
    %68 = arith.mulf %65, %67 : vector<64x32xf32>
    %69 = arith.addf %64, %68 : vector<64x32xf32>
    %c1_i32_27 = arith.constant 1 : i32
    %70 = tpu.dynamic_rotate %65 by %c1_i32_27 dim 0 : vector<64x32xf32>, i32 -> vector<64x32xf32>
    %cst_28 = arith.constant 0.000000e+00 : f32
    %71 = vector.shape_cast %40 : vector<64x1xi1> to vector<64x1xi1>
    %72 = vector.broadcast %71 : vector<64x1xi1> to vector<64x32xi1>
    %73 = vector.broadcast %cst_28 : f32 to vector<64x32xf32>
    %74 = arith.select %72, %70, %73 : vector<64x32xi1>, vector<64x32xf32>
    %75 = vector.extract_strided_slice %21 {offsets = [3, 0], sizes = [1, 32], strides = [1, 1]} : vector<9x32xf32> to vector<1x32xf32>
    %76 = vector.broadcast %75 : vector<1x32xf32> to vector<64x32xf32>
    %77 = arith.mulf %74, %76 : vector<64x32xf32>
    %78 = arith.addf %69, %77 : vector<64x32xf32>
    %c63_i32_29 = arith.constant 63 : i32
    %79 = tpu.dynamic_rotate %65 by %c63_i32_29 dim 0 : vector<64x32xf32>, i32 -> vector<64x32xf32>
    %cst_30 = arith.constant 0.000000e+00 : f32
    %80 = vector.shape_cast %42 : vector<64x1xi1> to vector<64x1xi1>
    %81 = vector.broadcast %80 : vector<64x1xi1> to vector<64x32xi1>
    %82 = vector.broadcast %cst_30 : f32 to vector<64x32xf32>
    %83 = arith.select %81, %79, %82 : vector<64x32xi1>, vector<64x32xf32>
    %84 = vector.extract_strided_slice %21 {offsets = [5, 0], sizes = [1, 32], strides = [1, 1]} : vector<9x32xf32> to vector<1x32xf32>
    %85 = vector.broadcast %84 : vector<1x32xf32> to vector<64x32xf32>
    %86 = arith.mulf %83, %85 : vector<64x32xf32>
    %87 = arith.addf %78, %86 : vector<64x32xf32>
    %c32 = arith.constant 32 : index
    %c0_31 = arith.constant 0 : index
    %88 = vector.load %arg12[%c32, %c0_31] : memref<96x32xf32, #tpu.memory_space<vmem>>, vector<64x32xf32>
    %89 = vector.extract_strided_slice %21 {offsets = [7, 0], sizes = [1, 32], strides = [1, 1]} : vector<9x32xf32> to vector<1x32xf32>
    %90 = vector.broadcast %89 : vector<1x32xf32> to vector<64x32xf32>
    %91 = arith.mulf %88, %90 : vector<64x32xf32>
    %92 = arith.addf %87, %91 : vector<64x32xf32>
    %c1_i32_32 = arith.constant 1 : i32
    %93 = tpu.dynamic_rotate %88 by %c1_i32_32 dim 0 : vector<64x32xf32>, i32 -> vector<64x32xf32>
    %cst_33 = arith.constant 0.000000e+00 : f32
    %94 = vector.shape_cast %40 : vector<64x1xi1> to vector<64x1xi1>
    %95 = vector.broadcast %94 : vector<64x1xi1> to vector<64x32xi1>
    %96 = vector.broadcast %cst_33 : f32 to vector<64x32xf32>
    %97 = arith.select %95, %93, %96 : vector<64x32xi1>, vector<64x32xf32>
    %98 = vector.extract_strided_slice %21 {offsets = [6, 0], sizes = [1, 32], strides = [1, 1]} : vector<9x32xf32> to vector<1x32xf32>
    %99 = vector.broadcast %98 : vector<1x32xf32> to vector<64x32xf32>
    %100 = arith.mulf %97, %99 : vector<64x32xf32>
    %101 = arith.addf %92, %100 : vector<64x32xf32>
    %c63_i32_34 = arith.constant 63 : i32
    %102 = tpu.dynamic_rotate %88 by %c63_i32_34 dim 0 : vector<64x32xf32>, i32 -> vector<64x32xf32>
    %cst_35 = arith.constant 0.000000e+00 : f32
    %103 = vector.shape_cast %42 : vector<64x1xi1> to vector<64x1xi1>
    %104 = vector.broadcast %103 : vector<64x1xi1> to vector<64x32xi1>
    %105 = vector.broadcast %cst_35 : f32 to vector<64x32xf32>
    %106 = arith.select %104, %102, %105 : vector<64x32xi1>, vector<64x32xf32>
    %107 = vector.extract_strided_slice %21 {offsets = [8, 0], sizes = [1, 32], strides = [1, 1]} : vector<9x32xf32> to vector<1x32xf32>
    %108 = vector.broadcast %107 : vector<1x32xf32> to vector<64x32xf32>
    %109 = arith.mulf %106, %108 : vector<64x32xf32>
    %110 = arith.addf %101, %109 : vector<64x32xf32>
    %c0_36 = arith.constant 0 : index
    %c0_37 = arith.constant 0 : index
    %111 = vector.load %arg8[%c0_36, %c0_37] : memref<1x32xf32, #tpu.memory_space<vmem>>, vector<1x32xf32>
    %112 = vector.broadcast %111 : vector<1x32xf32> to vector<64x32xf32>
    %113 = arith.addf %110, %112 : vector<64x32xf32>
    %114 = arith.mulf %113, %113 : vector<64x32xf32>
    %115 = arith.mulf %114, %113 : vector<64x32xf32>
    %cst_38 = arith.constant 4.471500e-02 : f32
    %116 = vector.broadcast %cst_38 : f32 to vector<64x32xf32>
    %117 = arith.mulf %116, %115 : vector<64x32xf32>
    %118 = arith.addf %113, %117 : vector<64x32xf32>
    %cst_39 = arith.constant 0.797884583 : f32
    %119 = vector.broadcast %cst_39 : f32 to vector<64x32xf32>
    %120 = arith.mulf %119, %118 : vector<64x32xf32>
    %cst_40 = arith.constant 5.000000e-01 : f32
    %121 = vector.broadcast %cst_40 : f32 to vector<64x32xf32>
    %122 = arith.mulf %121, %113 : vector<64x32xf32>
    %123 = math.tanh %120 : vector<64x32xf32>
    %cst_41 = arith.constant 1.000000e+00 : f32
    %124 = vector.broadcast %cst_41 : f32 to vector<64x32xf32>
    %125 = arith.addf %124, %123 : vector<64x32xf32>
    %126 = arith.mulf %122, %125 : vector<64x32xf32>
    %127 = arith.truncf %126 : vector<64x32xf32> to vector<64x32xbf16>
    %c0_42 = arith.constant 0 : index
    %c0_43 = arith.constant 0 : index
    %128 = vector.load %arg9[%c0_42, %c0_43] : memref<32x4xbf16, #tpu.memory_space<vmem>>, vector<32x4xbf16>
    %cst_44 = arith.constant dense<0.000000e+00> : vector<64x4xf32>
    %129 = tpu.matmul %127, %128, %cst_44 {dimension_numbers = #tpu.dot_dimension_numbers<[1], [0], [0], [1], [0, 0, 1, 1], [], []>} : vector<64x32xbf16>, vector<32x4xbf16>, vector<64x4xf32> -> vector<64x4xf32>
    %c0_45 = arith.constant 0 : index
    %c0_46 = arith.constant 0 : index
    %130 = vector.load %arg10[%c0_45, %c0_46] : memref<1x4xf32, #tpu.memory_space<vmem>>, vector<1x4xf32>
    %131 = vector.broadcast %130 : vector<1x4xf32> to vector<64x4xf32>
    %132 = arith.addf %129, %131 : vector<64x4xf32>
    %c0_47 = arith.constant 0 : index
    %c0_48 = arith.constant 0 : index
    %c0_49 = arith.constant 0 : index
    %133 = vector.load %arg11[%c0_47, %c0_48, %c0_49] : memref<1x64x4xf32, #tpu.memory_space<vmem>>, vector<1x64x4xf32>
    %134 = vector.shape_cast %133 : vector<1x64x4xf32> to vector<64x4xf32>
    %135 = vector.shape_cast %132 : vector<64x4xf32> to vector<1x64x4xf32>
    tpu.vector_store %arg11[%c0_47, %c0_48, %c0_49], %135 {strides = array<i32>} : memref<1x64x4xf32, #tpu.memory_space<vmem>>, vector<1x64x4xf32>,
    return
  }
  func.func @transform_0(%arg0: i32, %arg1: i32) -> (i32, i32, i32) {
    %c0_i32 = arith.constant 0 : i32
    %c0_i32_0 = arith.constant 0 : i32
    return %arg0, %arg1, %c0_i32 : i32, i32, i32
  }
  func.func @transform_1(%arg0: i32, %arg1: i32) -> (i32, i32, i32) {
    %c4_i32 = arith.constant 4 : i32
    %0 = arith.muli %arg1, %c4_i32 : i32
    %c1_i32 = arith.constant 1 : i32
    %1 = arith.subi %0, %c1_i32 : i32
    %c0_i32 = arith.constant 0 : i32
    %2 = arith.maxsi %1, %c0_i32 : i32
    %c0_i32_0 = arith.constant 0 : i32
    %c0_i32_1 = arith.constant 0 : i32
    return %arg0, %2, %c0_i32_0 : i32, i32, i32
  }
  func.func @transform_2(%arg0: i32, %arg1: i32) -> (i32, i32, i32) {
    %c1_i32 = arith.constant 1 : i32
    %0 = arith.addi %arg1, %c1_i32 : i32
    %c4_i32 = arith.constant 4 : i32
    %1 = arith.muli %0, %c4_i32 : i32
    %c15_i32 = arith.constant 15 : i32
    %2 = arith.minsi %1, %c15_i32 : i32
    %c0_i32 = arith.constant 0 : i32
    %c0_i32_0 = arith.constant 0 : i32
    return %arg0, %2, %c0_i32 : i32, i32, i32
  }
  func.func @transform_3(%arg0: i32, %arg1: i32) -> (i32, i32) {
    %c0_i32 = arith.constant 0 : i32
    %c0_i32_0 = arith.constant 0 : i32
    %c0_i32_1 = arith.constant 0 : i32
    return %c0_i32, %c0_i32_0 : i32, i32
  }
  func.func @transform_4(%arg0: i32, %arg1: i32) -> (i32, i32) {
    %c0_i32 = arith.constant 0 : i32
    %c0_i32_0 = arith.constant 0 : i32
    %c0_i32_1 = arith.constant 0 : i32
    return %c0_i32, %c0_i32_0 : i32, i32
  }
  func.func @transform_5(%arg0: i32, %arg1: i32) -> (i32, i32) {
    %c0_i32 = arith.constant 0 : i32
    %c0_i32_0 = arith.constant 0 : i32
    %c0_i32_1 = arith.constant 0 : i32
    return %c0_i32, %c0_i32_0 : i32, i32
  }
  func.func @transform_6(%arg0: i32, %arg1: i32) -> (i32, i32) {
    %c0_i32 = arith.constant 0 : i32
    %c0_i32_0 = arith.constant 0 : i32
    %c0_i32_1 = arith.constant 0 : i32
    return %c0_i32, %c0_i32_0 : i32, i32
  }
  func.func @transform_7(%arg0: i32, %arg1: i32) -> (i32, i32) {
    %c0_i32 = arith.constant 0 : i32
    %c0_i32_0 = arith.constant 0 : i32
    %c0_i32_1 = arith.constant 0 : i32
    return %c0_i32, %c0_i32_0 : i32, i32
  }
  func.func @transform_8(%arg0: i32, %arg1: i32) -> (i32, i32) {
    %c0_i32 = arith.constant 0 : i32
    %c0_i32_0 = arith.constant 0 : i32
    %c0_i32_1 = arith.constant 0 : i32
    return %c0_i32, %c0_i32_0 : i32, i32
  }
  func.func @transform_9(%arg0: i32, %arg1: i32) -> (i32, i32, i32) {
    %c0_i32 = arith.constant 0 : i32
    %c0_i32_0 = arith.constant 0 : i32
    return %arg0, %arg1, %c0_i32 : i32, i32, i32
  }
}

</mosaic_0001>

<bundles_post_ra>
// kernel: tpu_custom_call.1
= control target key start
LH: loop header
LB: loop body
LE: loop exit
PB: predicated region body
PF: predicated region fallthrough
CT: control target
= control target key end

     0   :  { %s3646_s0 = inlined_call_operand.hbm [shape: f32[2,256,4], index: 0, kind: input, shape index: {}]   ;;  %s3647_s1 = inlined_call_operand.hbm [shape: f32[2,256,4], index: 1, kind: input, shape index: {}]   ;;  %s3648_s2 = inlined_call_operand.hbm [shape: f32[2,256,4], index: 2, kind: input, shape index: {}]   ;;  %s3649_s3 = inlined_call_operand.hbm [shape: bf16[4,32], index: 3, kind: input, shape index: {}]   ;;  %s3650_s4 = inlined_call_operand.hbm [shape: f32[1,32], index: 4, kind: input, shape index: {}]   ;;  %s3651_s5 = inlined_call_operand.hbm [shape: f32[9,32], index: 5, kind: input, shape index: {}]   ;;  %s3652_s6 = inlined_call_operand.hbm [shape: f32[1,32], index: 6, kind: input, shape index: {}]   ;;  %s3653_s7 = inlined_call_operand.hbm [shape: bf16[32,4], index: 7, kind: input, shape index: {}]   ;;  %s3654_s8 = inlined_call_operand.hbm [shape: f32[1,4], index: 8, kind: input, shape index: {}]   ;;  %s3655_s9 = inlined_call_operand.hbm [shape: f32[2,256,4], index: 9, kind: output, shape index: {}]  }
   0x1   :  { %3686 = sst [smem:[#allocation40_spill]] %s3646_s0 }
   0x2   :  { %3687 = sst [smem:[#allocation41_spill]] %s3647_s1 }
   0x3   :  { %3688 = sst [smem:[#allocation42_spill]] %s3648_s2 }
   0x4   :  { %3689 = sst [smem:[#allocation43_spill]] %s3649_s3 }
   0x5   :  { %3690 = sst [smem:[#allocation44_spill]] %s3650_s4 }
   0x6   :  { %3691 = sst [smem:[#allocation45_spill]] %s3651_s5 }
   0x7   :  { %3692 = sst [smem:[#allocation46_spill]] %s3652_s6 }
   0x8   :  { %3693 = sst [smem:[#allocation47_spill]] %s3653_s7 }
   0x9   :  { %3694 = sst [smem:[#allocation48_spill]] %s3654_s8 }
   0xa   :  { %3695 = sst [smem:[#allocation49_spill]] %s3655_s9 }
   0xb   :  { %14 = vsyncpa [#allocation4], 0 }
   0xc   :  { %16 = vsyncpa [#allocation4 + $0x1], 0 }
   0xd   :  { %17 = vsyncpa [#allocation7], 0 }
   0xe   :  { %19 = vsyncpa [#allocation7 + $0x1], 0 }
   0xf   :  { %20 = vsyncpa [#allocation10], 0 }
  0x10   :  { %21 = vsyncpa [#allocation13], 0 }
  0x11   :  { %22 = vsyncpa [#allocation16], 0 }
  0x12   :  { %23 = vsyncpa [#allocation5], 0 }
  0x13   :  { %25 = vsyncpa [#allocation5 + $0x1], 0  ;;  %s2507_s30 = smov 0   ;;  %s2509_s10 = smov 0  }
  0x14   :  { %s2511_s11 = smov 0   ;;  %s2513_s12 = smov 0  }
  0x15   :  { %s2515_s13 = smov 0   ;;  %s2517_s14 = smov 0  }
  0x16   :  { %s2519_s15 = smov 0   ;;  %s2521_s16 = smov 0  }
  0x17   :  { %s2523_s17 = smov 0   ;;  %s2525_s18 = smov 0  }
  0x18   :  { %s2527_s19 = smov 0   ;;  %s2529_s20 = smov 0  }
  0x19   :  { %s2531_s21 = smov 0   ;;  %s2533_s22 = smov 0  }
  0x1a LB: > { %3696 = sst [smem:[#allocation26_spill]] %s2381_s30  ;;  %s2578_s23 = sadd.s32 4294967295, %s2433_s22   ;;  %s2433_s22 = sphi %s2533_s22, %s31_s22   ;;  %s2429_s21 = sphi %s2531_s21, %s3798_s21   ;;  %s2425_s20 = sphi %s2529_s20, %s3797_s20   ;;  %s2421_s19 = sphi %s2527_s19, %s3808_s19   ;;  %s2417_s18 = sphi %s2525_s18, %s3807_s18   ;;  %s2413_s17 = sphi %s2523_s17, %s3806_s17   ;;  %s2409_s16 = sphi %s2521_s16, %s3805_s16   ;;  %s2405_s15 = sphi %s2519_s15, %s3804_s15   ;;  %s2401_s14 = sphi %s2517_s14, %s3803_s14   ;;  %s2397_s13 = sphi %s2515_s13, %s3802_s13   ;;  %s2393_s12 = sphi %s2513_s12, %s3794_s12   ;;  %s2389_s11 = sphi %s2511_s11, %s3801_s11   ;;  %s2385_s10 = sphi %s2509_s10, %s3800_s10   ;;  %s2381_s30 = sphi %s2507_s30, %s3792_s30  }
  0x1b   : > { %3697 = sst [smem:[#allocation27_spill]] %s2385_s10  ;;  %p1659_p0 = scmp.ge.s32.totalorder %s2433_s22, 1 }
  0x1c   : > { %3698 = sst [smem:[#allocation28_spill]] %s2389_s11  ;;  %p3660_p1 = scmp.eq.s32.totalorder %s2578_s23, 0 }
  0x1d   : > { %3699 = sst [smem:[#allocation29_spill]] %s2397_s13  ;;  %p302_p2 = scmp.lt.s32.totalorder %s2433_s22, 9 }
  0x1e   : > { %3700 = sst [smem:[#allocation30_spill]] %s2417_s18  ;;  %s2435_s25 = smov [#allocation9]  }
  0x1f   : > { %3701 = sst [smem:[#allocation31_spill]] %s2421_s19  ;;  %p2583_p3 = pnand %p1659_p0, %p302_p2 }
  0x20   : > { %3702 = sst [smem:[#allocation32_spill]] %s2425_s20  ;;  %s315_s26 = sshll.u32 %s2435_s25, 4  ;;  %s316_s26 = int_to_ptr.vmem [resolvable:$true] %s315_s26 }
  0x21   : > { %3703 = sst [smem:[#allocation33_spill]] %s2429_s21  ;;  %p1814_p4 = pneg %p2583_p3 }
  0x22   : > { %s3704_s24 = scalar_select %p2583_p3, 1, 0 }
  0x23   : > { %s2436_s27 = smov [#allocation12]   ;;  %p2591_p5 = pnand %p1814_p4, %p3660_p1 }
  0x24   : > { %3705 = sst [smem:[#allocation34_spill]] %s3704_s24  ;;  %s336_s28 = sshll.u32 %s2436_s27, 4  ;;  %s2595_s28 = int_to_ptr.vmem [resolvable:$true] %s336_s28 }
  0x25   : > { %s3706_s29 = scalar_select %p2591_p5, 1, 0 }
  0x26   : > { %s2437_s9 = smov [#allocation15]   ;;  %s3707_s3 = sld [smem:[#allocation43_spill]] }
  0x27   : > { %s2597_s19 = sshll.u32 %s2437_s9, 4  ;;  %p2607_p7 = pneg %p2591_p5  ;;  %s361_s19 = int_to_ptr.vmem [resolvable:$true] %s2597_s19 }
  0x2c   : > { %s2009_s25 = scalar_lea.hbm %s3707_s3, 32 }
  0x2d   : > { %p2010_p6 = scmp.ne.s32.totalorder %s3707_s3, %s2009_s25  ;;  %p2016_p10 = scmp.lt.u32.totalorder %s2009_s25, %s3707_s3 }
  0x2f   : > { %p2012_p8 = pnand %p2607_p7, %p2010_p6 }
  0x31   : > { %p2013_p9 = pneg %p2012_p8 }
  0x33   : > { %p2018_p11 = pnand %p2016_p10, %p2013_p9 }
  0x35   : > { %2021 = shalt.err (!%p2018_p11)
}
  0x36   : > { %s2022_s2 = scalar_lea.vmem %s316_s26, 32  ;;  %p2030_p2 = scmp.lt.s32.totalorder %s316_s26, %s316_s26 }
  0x37   : > { %p2023_p12 = scmp.ne.s32.totalorder %s316_s26, %s2022_s2  ;;  %p2031_p4 = scmp.lt.s32.totalorder %s2022_s2, %s2022_s2 }
  0x39   : > { %p2025_p13 = pnand %p2023_p12, %p2607_p7  ;;  %p2032_p1 = por %p2031_p4, %p2030_p2 }
  0x3b   : > { %p2026_p0 = pneg %p2025_p13 }
  0x3d   : > { %p2033_p3 = pnand %p2032_p1, %p2026_p0 }
  0x3f   : > { %2036 = shalt.err (!%p2033_p3)
}
  0x40   : > { %1817 = dma.hbm_to_vmem [thread:$0]  (!%p2591_p5), %s3707_s3, 32, %s316_s26, [#allocation10]  }
  0x41   : > { %s3709_s5 = sld [smem:[#allocation45_spill]] }
  0x47   : > { %s2037_s25 = scalar_lea.hbm %s3709_s5, 256 }
  0x48   : > { %p2038_p6 = scmp.ne.s32.totalorder %s3709_s5, %s2037_s25  ;;  %p2044_p1 = scmp.lt.u32.totalorder %s2037_s25, %s3709_s5 }
  0x4a   : > { %p2040_p8 = pnand %p2038_p6, %p2607_p7 }
  0x4c   : > { %p2041_p9 = pneg %p2040_p8 }
  0x4e   : > { %p2046_p3 = pnand %p2044_p1, %p2041_p9 }
  0x50   : > { %2049 = shalt.err (!%p2046_p3)
}
  0x51   : > { %s2050_s26 = scalar_lea.vmem %s2595_s28, 256  ;;  %p2058_p13 = scmp.lt.s32.totalorder %s2595_s28, %s2595_s28 }
  0x52   : > { %p2051_p10 = scmp.ne.s32.totalorder %s2595_s28, %s2050_s26  ;;  %p2059_p0 = scmp.lt.s32.totalorder %s2050_s26, %s2050_s26 }
  0x54   : > { %p2053_p11 = pnand %p2051_p10, %p2607_p7  ;;  %p2060_p2 = por %p2059_p0, %p2058_p13 }
  0x56   : > { %p2054_p12 = pneg %p2053_p11 }
  0x58   : > { %p2061_p4 = pnand %p2060_p2, %p2054_p12 }
  0x5a   : > { %2064 = shalt.err (!%p2061_p4)
}
  0x5b   : > { %s3664_s11 = smov 128   ;;  %s3666_s0 = smov 8  }
  0x5c   : > { %1823 = dma.hbm_to_vmem [thread:$0]  (!%p2591_p5), %s3709_s5, 256, %s2595_s28, [#allocation13], %s3664_s11, %s3664_s11, %s3666_s0  }
  0x5d   : > { %s3710_s7 = sld [smem:[#allocation47_spill]] }
  0x63   : > { %s2065_s25 = scalar_lea.hbm %s3710_s7, 256 }
  0x64   : > { %p2066_p6 = scmp.ne.s32.totalorder %s3710_s7, %s2065_s25  ;;  %p2072_p1 = scmp.lt.u32.totalorder %s2065_s25, %s3710_s7 }
  0x66   : > { %p2068_p8 = pnand %p2066_p6, %p2607_p7 }
  0x68   : > { %p2069_p9 = pneg %p2068_p8 }
  0x6a   : > { %p2074_p3 = pnand %p2072_p1, %p2069_p9 }
  0x6c   : > { %2077 = shalt.err (!%p2074_p3)
}
  0x6d   : > { %s2078_s30 = scalar_lea.vmem %s361_s19, 256  ;;  %p2086_p13 = scmp.lt.s32.totalorder %s361_s19, %s361_s19 }
  0x6e   : > { %p2079_p10 = scmp.ne.s32.totalorder %s361_s19, %s2078_s30  ;;  %p2087_p0 = scmp.lt.s32.totalorder %s2078_s30, %s2078_s30 }
  0x70   : > { %p2081_p11 = pnand %p2079_p10, %p2607_p7  ;;  %p2088_p2 = por %p2087_p0, %p2086_p13 }
  0x72   : > { %p2082_p12 = pneg %p2081_p11 }
  0x74   : > { %p2089_p4 = pnand %p2088_p2, %p2082_p12 }
  0x76   : > { %2092 = shalt.err (!%p2089_p4)
}
  0x77   : > { %s2440_s28 = smov 64   ;;  %s2441_s3 = smov 4  }
  0x78   : > { %1829 = dma.hbm_to_vmem [thread:$0]  (!%p2591_p5), %s3710_s7, 256, %s361_s19, [#allocation16], %s2440_s28, %s2440_s28, %s2441_s3  }
  0x79   : > { %s40_s24 = sadd.s32 1, %s2425_s20  ;;  %s43_s25 = sadd.s32 1, %s2429_s21 }
  0x7a   : > { %p41_p6 = scmp.ge.s32.totalorder %s40_s24, 4  ;;  %p3678_p8 = scmp.eq.s32.totalorder %s2433_s22, 0 }
  0x7b   : > { %s1653_s9 = sshll.u32 %s2425_s20, 2  ;;  %s88_s30 = sadd.s32 1, %s2401_s14 }
  0x7c   : > { %s3810_s24 = smov (%p41_p6, %s40_s24), 0  ;;  %s3812_s25 = smov (!%p41_p6, %s43_s25), %s2429_s21 }
  0x7d   : > { %3711 = sst [smem:[#allocation35_spill]] %s3810_s24  ;;  %s48_s2 = ssub.s32 %s2425_s20, %s3810_s24 }
  0x7e   : > { %s1654_s26 = sadd.s32 4294967295, %s1653_s9  ;;  %p45_p9 = scmp.ge.s32.totalorder %s3812_s25, 2 }
  0x7f   : > { %p77_p1 = scmp.gt.s32.totalorder %s1654_s26, 0  ;;  %s1655_s19 = sshll.u32 %s3810_s24, 2 }
  0x80   : > { %s3814_s25 = smov (%p45_p9, %s3812_s25), 0  ;;  %s1656_s3 = sadd.s32 4294967295, %s1655_s19 }
  0x81   : > { %3712 = sst [smem:[#allocation36_spill]] %s3814_s25  ;;  %s3816_s26 = smov (!%p77_p1, %s1654_s26), 0 }
  0x82   : > { %s2683_s28 = ssub.s32 %s2429_s21, %s3814_s25  ;;  %p81_p3 = scmp.gt.s32.totalorder %s1656_s3, 0 }
  0x83   : > { %3713 = sst [smem:[#allocation37_spill]] %s2683_s28  ;;  %s2686_s18 = sor.u32 %s48_s2, %s2683_s28 }
  0x84   : > { %p95_p11 = scmp.ne.s32.totalorder %s2401_s14, %s2397_s13  ;;  %s3818_s3 = smov (!%p81_p3, %s1656_s3), 0 }
  0x85   : > { %p101_p13 = scmp.ne.s32.totalorder %s2397_s13, %s2393_s12  ;;  %s84_s11 = ssub.s32 %s3816_s26, %s3818_s3 }
  0x86   : > { %p2693_p12 = por %p95_p11, %p3678_p8  ;;  %s2699_s0 = sadd.s32 4, %s1653_s9 }
  0x87   : > { %3715 = sst [smem:[#allocation38_spill]] %s2699_s0  ;;  %s85_s2 = sor.u32 %s84_s11, %s2683_s28 }
  0x88   : > { %p3716_p0 = scmp.eq.s32.totalorder %s2578_s23, 0  ;;  %p86_p4 = scmp.eq.s32.totalorder %s85_s2, 0 }
  0x89   : > { %s2709_s7 = sadd.s32 4, %s1655_s19  ;;  %p3677_p9 = scmp.lt.s32.totalorder %s2433_s22, 8 }
  0x8a   : > { %p2704_p2 = por %p101_p13, %p3716_p0  ;;  %s2717_s12 = sshll.u32 %s2429_s21, 5 }
  0x8b   : > { %s2713_s25 = scalar_select %p86_p4, %s2401_s14, %s88_s30  }
  0x8c   : > { %s3717_s5 = scalar_select %p2704_p2, 1, 0 }
  0x8d   : > { %s408_s11 = sand.u32 1, %s2433_s22   ;;  %s410_s9 = sand.u32 1, %s2401_s14  }
  0x8e   : > { %3718 = sst [smem:[#allocation39_spill]] %s3717_s5  ;;  %s1671_s3 = sshll.u32 %s410_s9, 4 }
  0x8f   : > { %s1674_s24 = sshll.u32 %s3816_s26, 1  ;;  %s412_s5 = scalar_lea.vmem [#allocation6], %s1671_s3 }
  0x90   : > { %s422_s13 = sadd.s32 %s1674_s24, %s2717_s12  ;;  %s425_s2 = sshll.u32 %s412_s5, 4  ;;  %s2722_s2 = int_to_ptr.vmem [resolvable:$true] %s425_s2 }
  0x91   : > { %s1676_s28 = sshll.u32 %s422_s13, 7  ;;  %s3719_s1 = sld [smem:[#allocation41_spill]] }
  0x92   : > { %p2733_p3 = pnand %p3677_p9, %p2693_p12  ;;  %s2442_s5 = smov [#allocation11]  }
  0x93   : > { %s2737_s13 = sshll.u32 %s2442_s5, 4  ;;  %s2739_s24 = scalar_lea.sflag [#allocation7], %s408_s11  ;;  %s327_s13 = int_to_ptr.vmem [resolvable:$true] %s2737_s13 }
  0x94   : > { %p2095_p13 = pneg %p2733_p3 }
  0x97   : > { %s2727_s20 = scalar_lea.hbm %s3719_s1, %s1676_s28  ;;  %s2098_s10 = scalar_lea.hbm %s3719_s1, 8192 }
  0x98   : > { %s2093_s0 = scalar_lea.hbm %s2727_s20, 256  ;;  %p2099_p12 = scmp.lt.u32.totalorder %s2727_s20, %s3719_s1 }
  0x99   : > { %p2094_p11 = scmp.ne.s32.totalorder %s2727_s20, %s2093_s0  ;;  %p2100_p1 = scmp.lt.u32.totalorder %s2098_s10, %s2093_s0 }
  0x9a   : > { %p2102_p9 = scmp.lt.u32.totalorder %s2093_s0, %s2727_s20 }
  0x9b   : > { %p2096_p0 = pnand %p2095_p13, %p2094_p11  ;;  %p2101_p6 = por %p2100_p1, %p2099_p12 }
  0x9d   : > { %p2097_p4 = pneg %p2096_p0  ;;  %p2103_p8 = por %p2102_p9, %p2101_p6 }
  0x9f   : > { %p2104_p10 = pnand %p2103_p8, %p2097_p4 }
  0xa1   : > { %2107 = shalt.err (!%p2104_p10)
}
  0xa2   : > { %s2108_s11 = scalar_lea.vmem %s2722_s2, 256  ;;  %s2443_s19 = smov [#allocation6]  }
  0xa3   : > { %p2109_p11 = scmp.ne.s32.totalorder %s2722_s2, %s2108_s11  ;;  %s2113_s5 = sshll.u32 %s2443_s19, 4  ;;  %s2114_s5 = int_to_ptr.vmem [resolvable:$false] %s2113_s5 }
  0xa4   : > { %s2115_s26 = scalar_lea.vmem %s2114_s5, 512  ;;  %p2116_p5 = scmp.lt.s32.totalorder %s2722_s2, %s2114_s5 }
  0xa5   : > { %p2111_p0 = pnand %p2109_p11, %p2095_p13  ;;  %p2117_p1 = scmp.lt.s32.totalorder %s2115_s26, %s2108_s11 }
  0xa7   : > { %p2112_p2 = pneg %p2111_p0  ;;  %p2118_p12 = por %p2117_p1, %p2116_p5 }
  0xa9   : > { %p2119_p6 = pnand %p2118_p12, %p2112_p2 }
  0xab   : > { %2122 = shalt.err (!%p2119_p6)
}
  0xac   : > { %s3721_s0 = smov 8   ;;  %s3722_s28 = smov 128  }
  0xad   : > { %1839 = dma.hbm_to_vmem [thread:$0]  (!%p2733_p3), %s2727_s20, 256, %s2722_s2, %s2739_s24, %s3722_s28, %s3722_s28, %s3721_s0  }
  0xae   : > { %s2444_s10 = smov [#allocation14]   ;;  %s3723_s4 = sld [smem:[#allocation44_spill]] }
  0xaf   : > { %s350_s9 = sshll.u32 %s2444_s10, 4  ;;  %s351_s9 = int_to_ptr.vmem [resolvable:$true] %s350_s9 }
  0xb4   : > { %s2123_s11 = scalar_lea.hbm %s3723_s4, 16 }
  0xb5   : > { %p2124_p5 = scmp.ne.s32.totalorder %s3723_s4, %s2123_s11  ;;  %p2130_p2 = scmp.lt.u32.totalorder %s2123_s11, %s3723_s4 }
  0xb7   : > { %p2126_p8 = pnand %p2124_p5, %p2607_p7 }
  0xb9   : > { %p2127_p10 = pneg %p2126_p8 }
  0xbb   : > { %p2132_p9 = pnand %p2130_p2, %p2127_p10 }
  0xbd   : > { %2135 = shalt.err (!%p2132_p9)
}
  0xbe   : > { %s2136_s20 = scalar_lea.vmem %s327_s13, 16  ;;  %s2143_s2 = scalar_lea.vmem %s327_s13, 32 }
  0xbf   : > { %p2137_p3 = scmp.ne.s32.totalorder %s327_s13, %s2136_s20  ;;  %p2144_p11 = scmp.lt.s32.totalorder %s327_s13, %s327_s13 }
  0xc0   : > { %p2145_p0 = scmp.lt.s32.totalorder %s2143_s2, %s2136_s20 }
  0xc1   : > { %p2139_p13 = pnand %p2137_p3, %p2607_p7 }
  0xc2   : > { %p2146_p1 = por %p2145_p0, %p2144_p11 }
  0xc3   : > { %p2140_p4 = pneg %p2139_p13 }
  0xc5   : > { %p2147_p12 = pnand %p2146_p1, %p2140_p4 }
  0xc7   : > { %2150 = shalt.err (!%p2147_p12)
}
  0xc8   : > { %p3724_p6 = scmp.ne.s32.totalorder %s3706_s29, 0  ;;  %s3725_s6 = sld [smem:[#allocation46_spill]] }
  0xca   : > { %1820 = dma.hbm_to_vmem [thread:$0]  (!%p3724_p6), %s3723_s4, 16, %s327_s13, [#allocation10]  }
  0xce   : > { %s2151_s11 = scalar_lea.hbm %s3725_s6, 16 }
  0xcf   : > { %p2152_p5 = scmp.ne.s32.totalorder %s3725_s6, %s2151_s11  ;;  %p2158_p2 = scmp.lt.u32.totalorder %s2151_s11, %s3725_s6 }
  0xd1   : > { %p2154_p8 = pnand %p2152_p5, %p2607_p7 }
  0xd3   : > { %p2155_p10 = pneg %p2154_p8 }
  0xd5   : > { %p2160_p9 = pnand %p2158_p2, %p2155_p10 }
  0xd7   : > { %2163 = shalt.err (!%p2160_p9)
}
  0xd8   : > { %s2164_s2 = scalar_lea.vmem %s351_s9, 16  ;;  %s2171_s13 = scalar_lea.vmem %s351_s9, 32 }
  0xd9   : > { %p2165_p3 = scmp.ne.s32.totalorder %s351_s9, %s2164_s2  ;;  %p2172_p11 = scmp.lt.s32.totalorder %s351_s9, %s351_s9 }
  0xda   : > { %p2173_p0 = scmp.lt.s32.totalorder %s2171_s13, %s2164_s2 }
  0xdb   : > { %p2167_p13 = pnand %p2165_p3, %p2607_p7 }
  0xdc   : > { %p2174_p1 = por %p2173_p0, %p2172_p11 }
  0xdd   : > { %p2168_p4 = pneg %p2167_p13 }
  0xdf   : > { %p2175_p12 = pnand %p2174_p1, %p2168_p4 }
  0xe1   : > { %2178 = shalt.err (!%p2175_p12)
}
  0xe2   : > { %1826 = dma.hbm_to_vmem [thread:$0]  (!%p3724_p6), %s3725_s6, 16, %s351_s9, [#allocation13]  }
  0xe3   : > { %s2445_s1 = smov [#allocation17]   ;;  %s3726_s8 = sld [smem:[#allocation48_spill]] }
  0xe4   : > { %s374_s19 = sshll.u32 %s2445_s1, 4  ;;  %s375_s19 = int_to_ptr.vmem [resolvable:$true] %s374_s19 }
  0xe9   : > { %s2179_s26 = scalar_lea.hbm %s3726_s8, 16 }
  0xea   : > { %p2180_p5 = scmp.ne.s32.totalorder %s3726_s8, %s2179_s26  ;;  %p2186_p2 = scmp.lt.u32.totalorder %s2179_s26, %s3726_s8 }
  0xec   : > { %p2182_p8 = pnand %p2180_p5, %p2607_p7 }
  0xee   : > { %p2183_p10 = pneg %p2182_p8 }
  0xf0   : > { %p2188_p9 = pnand %p2186_p2, %p2183_p10 }
  0xf2   : > { %2191 = shalt.err (!%p2188_p9)
}
  0xf3   : > { %s2192_s9 = scalar_lea.vmem %s375_s19, 16  ;;  %s2199_s10 = scalar_lea.vmem %s375_s19, 32 }
  0xf4   : > { %p2193_p3 = scmp.ne.s32.totalorder %s375_s19, %s2192_s9  ;;  %p2200_p11 = scmp.lt.s32.totalorder %s375_s19, %s375_s19 }
  0xf5   : > { %p2201_p0 = scmp.lt.s32.totalorder %s2199_s10, %s2192_s9 }
  0xf6   : > { %p2195_p13 = pnand %p2193_p3, %p2607_p7 }
  0xf7   : > { %p2202_p1 = por %p2201_p0, %p2200_p11 }
  0xf8   : > { %p2196_p4 = pneg %p2195_p13 }
  0xfa   : > { %p2203_p12 = pnand %p2202_p1, %p2196_p4 }
  0xfc   : > { %2206 = shalt.err (!%p2203_p12)
}
  0xfd   : > { %s3727_s27 = sld [smem:[#allocation32_spill]]  ;;  %s1652_s11 = sadd.s32 4294967294, %s2433_s22  }
  0xfe   : > { %1832 = dma.hbm_to_vmem [thread:$0]  (!%p3724_p6), %s3726_s8, 16, %s375_s19, [#allocation16]  }
  0xff   : > { %s52_s29 = sadd.s32 1, %s2413_s17  ;;  %p3728_p7 = scmp.eq.s32.totalorder %s2686_s18, 0 }
 0x100   : > { %p59_p5 = scmp.ne.s32.totalorder %s2413_s17, %s2409_s16  ;;  %p65_p8 = scmp.ne.s32.totalorder %s2409_s16, %s2405_s15 }
 0x101   : > { %s2830_s5 = scalar_select %p3728_p7, %s2413_s17, %s52_s29  }
 0x102   : > { %p289_p10 = scmp.eq.s32.totalorder %s2578_s23, 7  ;;  %p295_p2 = scmp.eq.s32.totalorder %s1652_s11, 7 }
 0x103   : > { %p3729_p9 = scmp.eq.s32.totalorder %s2433_s22, 0  ;;  %p3731_p13 = scmp.eq.s32.totalorder %s2578_s23, 0 }
 0x104   : > { %p2849_p6 = por %p289_p10, %p59_p5  ;;  %p2853_p11 = por %p295_p2, %p65_p8 }
 0x105   : > { %p2839_p3 = por %p3729_p9, %p59_p5  ;;  %p2845_p4 = por %p3731_p13, %p65_p8 }
 0x106   : > { %s3733_s18 = scalar_select %p2849_p6, 1, 0 }
 0x107   : > { %s3734_s19 = scalar_select %p2853_p11, 1, 0 }
 0x108   : > { %s385_s20 = sand.u32 1, %s2413_s17   ;;  %s1668_s2 = sshll.u32 %s3727_s27, 3 }
 0x109   : > { %s1667_s13 = sshll.u32 %s385_s20, 6  ;;  %s395_s9 = sadd.s32 %s2717_s12, %s1668_s2 }
 0x10a   : > { %s1670_s10 = sshll.u32 %s395_s9, 7  ;;  %s389_s3 = scalar_lea.vmem [#allocation3], %s1667_s13 }
 0x10b   : > { %s398_s1 = sshll.u32 %s389_s3, 4  ;;  %s3735_s4 = sld [smem:[#allocation40_spill]]  ;;  %s2865_s1 = int_to_ptr.vmem [resolvable:$true] %s398_s1 }
 0x10c   : > { %p3736_p0 = scmp.lt.s32.totalorder %s2433_s22, 8  ;;  %s2875_s2 = scalar_lea.sflag [#allocation4], %s385_s20 }
 0x10e   : > { %p2871_p1 = pnand %p3736_p0, %p2839_p3 }
 0x110   : > { %p2209_p7 = pneg %p2871_p1 }
 0x111   : > { %s2863_s6 = scalar_lea.hbm %s3735_s4, %s1670_s10  ;;  %s2212_s26 = scalar_lea.hbm %s3735_s4, 8192 }
 0x112   : > { %s2207_s13 = scalar_lea.hbm %s2863_s6, 1024  ;;  %p2213_p10 = scmp.lt.u32.totalorder %s2863_s6, %s3735_s4 }
 0x113   : > { %p2208_p12 = scmp.ne.s32.totalorder %s2863_s6, %s2207_s13  ;;  %p2214_p2 = scmp.lt.u32.totalorder %s2212_s26, %s2207_s13 }
 0x114   : > { %p2216_p3 = scmp.lt.u32.totalorder %s2207_s13, %s2863_s6 }
 0x115   : > { %p2210_p5 = pnand %p2209_p7, %p2208_p12  ;;  %p2215_p9 = por %p2214_p2, %p2213_p10 }
 0x117   : > { %p2211_p8 = pneg %p2210_p5  ;;  %p2217_p13 = por %p2216_p3, %p2215_p9 }
 0x119   : > { %p2218_p0 = pnand %p2217_p13, %p2211_p8 }
 0x11b   : > { %2221 = shalt.err (!%p2218_p0)
}
 0x11c   : > { %s2222_s20 = scalar_lea.vmem %s2865_s1, 1024  ;;  %s2446_s29 = smov [#allocation3]  }
 0x11d   : > { %p2223_p12 = scmp.ne.s32.totalorder %s2865_s1, %s2222_s20  ;;  %s2227_s9 = sshll.u32 %s2446_s29, 4  ;;  %s2228_s9 = int_to_ptr.vmem [resolvable:$false] %s2227_s9 }
 0x11e   : > { %s2229_s10 = scalar_lea.vmem %s2228_s9, 2048  ;;  %p2230_p6 = scmp.lt.s32.totalorder %s2865_s1, %s2228_s9 }
 0x11f   : > { %p2225_p5 = pnand %p2223_p12, %p2209_p7  ;;  %p2231_p10 = scmp.lt.s32.totalorder %s2229_s10, %s2222_s20 }
 0x121   : > { %p2226_p11 = pneg %p2225_p5  ;;  %p2232_p2 = por %p2231_p10, %p2230_p6 }
 0x123   : > { %p2233_p9 = pnand %p2232_p2, %p2226_p11 }
 0x125   : > { %2236 = shalt.err (!%p2233_p9)
}
 0x126   : > { %s3738_s13 = sld [smem:[#allocation38_spill]]  ;;  %s3739_s26 = sld [smem:[#allocation28_spill]] }
 0x127   : > { %s3740_s3 = sld [smem:[#allocation27_spill]]  ;;  %s3741_s11 = sld [smem:[#allocation26_spill]] }
 0x128   : > { %s3742_s20 = sld [smem:[#allocation37_spill]]  ;;  %p3744_p11 = scmp.lt.s32.totalorder %s2709_s7, 15 }
 0x129   : > { %1836 = dma.hbm_to_vmem [thread:$0]  (!%p2871_p1), %s2863_s6, 1024, %s2865_s1, %s2875_s2, %s3722_s28, %s3722_s28, %s3721_s0  }
 0x12a   : > { %s3822_s7 = smov (!%p3744_p11, %s2709_s7), 15  ;;  %p3745_p3 = scmp.eq.s32.totalorder %s2433_s22, 0 }
 0x12b   : > { %p3747_p12 = scmp.eq.s32.totalorder %s2578_s23, 0  ;;  %p3750_p1 = scmp.lt.s32.totalorder %s2433_s22, 8 }
 0x12c   : > { %p3743_p6 = scmp.lt.s32.totalorder %s3738_s13, 15  ;;  %s124_s27 = sadd.s32 1, %s3739_s26 }
 0x12d   : > { %p131_p7 = scmp.ne.s32.totalorder %s3739_s26, %s3740_s3  ;;  %p137_p8 = scmp.ne.s32.totalorder %s3740_s3, %s3741_s11 }
 0x12e   : > { %s3820_s13 = smov (!%p3743_p6, %s3738_s13), 15  ;;  %s437_s1 = sand.u32 1, %s3739_s26  }
 0x12f   : > { %s120_s29 = ssub.s32 %s3820_s13, %s3822_s7  ;;  %p2920_p13 = por %p131_p7, %p3745_p3 }
 0x130   : > { %s121_s9 = sor.u32 %s120_s29, %s3742_s20  ;;  %p2926_p5 = por %p137_p8, %p3747_p12 }
 0x131   : > { %p122_p0 = scmp.eq.s32.totalorder %s121_s9, 0  ;;  %s1679_s2 = sshll.u32 %s3820_s13, 1 }
 0x132   : > { %s3748_s6 = scalar_select %p2926_p5, 1, 0 }
 0x133   : > { %s3824_s26 = smov (!%p122_p0, %s3739_s26), %s124_s27  ;;  %s1677_s7 = sshll.u32 %s437_s1, 4 }
 0x134   : > { %s449_s4 = sadd.s32 %s1679_s2, %s2717_s12  ;;  %s3749_s29 = sld [smem:[#allocation42_spill]] }
 0x135   : > { %s1681_s3 = sshll.u32 %s449_s4, 7  ;;  %s439_s9 = scalar_lea.vmem [#allocation8], %s1677_s7 }
 0x136   : > { %s452_s21 = sshll.u32 %s439_s9, 4  ;;  %p2946_p10 = pnand %p3750_p1, %p2920_p13  ;;  %s2940_s21 = int_to_ptr.vmem [resolvable:$true] %s452_s21 }
 0x138   : > { %p2239_p9 = pneg %p2946_p10 }
 0x13a   : > { %s2938_s8 = scalar_lea.hbm %s3749_s29, %s1681_s3  ;;  %s2242_s1 = scalar_lea.hbm %s3749_s29, 8192 }
 0x13b   : > { %s2237_s4 = scalar_lea.hbm %s2938_s8, 256  ;;  %p2243_p7 = scmp.lt.u32.totalorder %s2938_s8, %s3749_s29 }
 0x13c   : > { %p2238_p2 = scmp.ne.s32.totalorder %s2938_s8, %s2237_s4  ;;  %p2244_p8 = scmp.lt.u32.totalorder %s2242_s1, %s2237_s4 }
 0x13d   : > { %p2246_p13 = scmp.lt.u32.totalorder %s2237_s4, %s2938_s8 }
 0x13e   : > { %p2240_p6 = pnand %p2239_p9, %p2238_p2  ;;  %p2245_p3 = por %p2244_p8, %p2243_p7 }
 0x140   : > { %p2241_p11 = pneg %p2240_p6  ;;  %p2247_p0 = por %p2246_p13, %p2245_p3 }
 0x142   : > { %p2248_p12 = pnand %p2247_p0, %p2241_p11 }
 0x144   : > { %2251 = shalt.err (!%p2248_p12)
}
 0x145   : > { %s2252_s7 = scalar_lea.vmem %s2940_s21, 256  ;;  %s2447_s3 = smov [#allocation8]  }
 0x146   : > { %p2253_p1 = scmp.ne.s32.totalorder %s2940_s21, %s2252_s7  ;;  %s2257_s11 = sshll.u32 %s2447_s3, 4  ;;  %s2258_s11 = int_to_ptr.vmem [resolvable:$false] %s2257_s11 }
 0x147   : > { %s2259_s20 = scalar_lea.vmem %s2258_s11, 512  ;;  %p2260_p5 = scmp.lt.s32.totalorder %s2940_s21, %s2258_s11 }
 0x148   : > { %p2255_p2 = pnand %p2253_p1, %p2239_p9  ;;  %p2261_p7 = scmp.lt.s32.totalorder %s2259_s20, %s2252_s7 }
 0x14a   : > { %p2256_p6 = pneg %p2255_p2  ;;  %p2262_p8 = por %p2261_p7, %p2260_p5 }
 0x14c   : > { %p2263_p3 = pnand %p2262_p8, %p2256_p6 }
 0x14e   : > { %2266 = shalt.err (!%p2263_p3)
}
 0x14f   : > { %1842 = dma.hbm_to_vmem [thread:$0]  (!%p2946_p10), %s2938_s8, 256, %s2940_s21, %s2739_s24, %s3722_s28, %s3722_s28, %s3721_s0  }
 0x150   : > { %s3752_s9 = sld [smem:[#allocation34_spill]] }
 0x156   : > { %p3753_p9 = scmp.ne.s32.totalorder %s3752_s9, 0 }
 0x157   : > { %s2982_s4 = sand.u32 (!%p3753_p9), 1, %s2409_s16  }
 0x158   : > { %464 = sbr.rel (%p3753_p9) target bundleno = 1421 (0x58d), region = 56  ;;  %s1683_s12 = sshll.u32 (!%p3753_p9), %s2982_s4, 6 }
 0x159   : > { %s467_s27 = scalar_lea.sflag (!%p3753_p9), [#allocation4], %s2982_s4  ;;  %s2988_s13 = scalar_lea.vmem (!%p3753_p9), [#allocation3], %s1683_s12 }
 0x15f   : > { %2352 = dma.done.wait (%p2845_p4), %s467_s27, 1024  }
 0x160   : > { %2354 = vsyncadd (%p2845_p4), %s467_s27, 4294966272  ;;  %s3754_s8 = sld [smem:[#allocation29_spill]]  ;;  %s3755_s21 = sld [smem:[#allocation39_spill]] }
 0x161   : > { %s475_s24 = sand.u32 1, %s2578_s23  }
 0x162   : > { %s476_s1 = scalar_lea.sflag [#allocation7], %s475_s24 }
 0x166   : > { %s477_s0 = sand.u32 1, %s3754_s8   ;;  %p3756_p5 = scmp.ne.s32.totalorder %s3755_s21, 0 }
 0x167   : > { %s2996_s28 = sshll.u32 %s477_s0, 4 }
 0x168   : > { %s479_s10 = scalar_lea.vmem [#allocation6], %s2996_s28 }
 0x169   : > { %2356 = dma.done.wait (%p3756_p5), %s476_s1, 256  }
 0x16a   : > { %2358 = vsyncadd (%p3756_p5), %s476_s1, 4294967040  ;;  %s3757_s2 = sld [smem:[#allocation27_spill]]  ;;  %p3758_p4 = scmp.ne.s32.totalorder %s3748_s6, 0 }
 0x170   : > { %s486_s7 = sand.u32 1, %s3757_s2  }
 0x171   : > { %s3004_s30 = sshll.u32 %s486_s7, 4 }
 0x172   : > { %s488_s3 = scalar_lea.vmem [#allocation8], %s3004_s30 }
 0x173   : > { %2360 = dma.done.wait (%p3758_p4), %s476_s1, 256  }
 0x174   : > { %2362 = vsyncadd (%p3758_p4), %s476_s1, 4294967040  ;;  %p3759_p10 = scmp.eq.s32.totalorder %s2578_s23, 0 }
 0x176   : > { %2364 = dma.done.wait (%p3759_p10), [#allocation10], 48   ;;  %p3760_p11 = pmov %p3759_p10 }
 0x177   : > { %p3761_p13 = pmov %p3759_p10 }
 0x178   : > { %2366 = vsyncadd (%p3760_p11), [#allocation10], 4294967248 }
 0x179   : > { %2368 = dma.done.wait (%p3761_p13), [#allocation13], 272   ;;  %p3762_p0 = pmov %p3759_p10 }
 0x17b   : > { %2370 = vsyncadd (%p3762_p0), [#allocation13], 4294967024  ;;  %p3763_p12 = pmov %p3762_p0 }
 0x17c   : > { %p3764_p1 = pmov %p3762_p0 }
 0x17d   : > { %2372 = dma.done.wait (%p3763_p12), [#allocation16], 272  }
 0x17e   : > { %2374 = vsyncadd (%p3764_p1), [#allocation16], 4294967024  ;;  %vm603_vm0 = vcmask 1041408   ;;  %v570_v0 = vld [vmem:[#allocation9] sm:$0x3]  ;;  %v573_v2 = vld [vmem:[%s2988_s13 + $0x8] sm:$0xff] }
 0x17f   : > { %v572_v1 = vld [vmem:[%s2988_s13] sm:$0xff]  ;;  %vm590_vm1 = vcmask 31744   ;;  %1780 = vmatprep.subr.msk.bf16.mxu0 %vm603_vm0, %v570_v0  ;;  %1781 = vmatprep.subr.msk.bf16.mxu1 %vm603_vm0, %v570_v0  ;;  %v3025_v3 = vsel %vm603_vm0, %v570_v0, 0  ;;  %v577_v6 = vld [vmem:[%s2988_s13 + $0x28] sm:$0xff]  ;;  %v574_v7 = vld [vmem:[%s2988_s13 + $0x10] sm:$0xff]  ;;  %vm672_vm2 = vcmask 261120  }
 0x180   : > { %v580_v4 = vpack.c.bf16 %v573_v2, %v572_v1  ;;  %v576_v5 = vld [vmem:[%s2988_s13 + $0x20] sm:$0xff]  ;;  %1741 = vmatpush3.bf16.msra.mxu0 %v3025_v3  ;;  %1775 = vmatpush3.bf16.msra.mxu1 %v3025_v3  ;;  %v575_v9 = vld [vmem:[%s2988_s13 + $0x18] sm:$0xff]  ;;  %v578_v10 = vld [vmem:[%s2988_s13 + $0x30] sm:$0xff]  ;;  %s3059_s23 = scalar_lea.vmem [#allocation18], %s1683_s12  ;;  %s3765_s6 = sld [smem:[#allocation30_spill]] }
 0x181   : > { %v582_v8 = vpack.c.bf16 %v577_v6, %v576_v5  ;;  %v579_v11 = vld [vmem:[%s2988_s13 + $0x38] sm:$0xff]  ;;  %v581_v12 = vpack.c.bf16 %v575_v9, %v574_v7  ;;  %v3039_v14 = vld [vmem:[#allocation11] ss:$0 sm:$0xff] }
 0x182   : > { %1742 = vmatprep.mubr.msk.bf16.mxu0 %vm590_vm1, %v580_v4  ;;  %v583_v13 = vpack.c.bf16 %v579_v11, %v578_v10 }
 0x183   : > { %1746 = vmatprep.mubr.msk.bf16.mxu1 %vm590_vm1, %v582_v8  ;;  %1743 = vmatmul.mubr.msk.bf16.vlgmr.msra.gmra.mrb[0].mxu0 %vm590_vm1, %v581_v12 }
 0x184   : > { %1747 = vmatmul.mubr.msk.bf16.vlgmr.msra.gmra.mrb[0].mxu1 %vm590_vm1, %v583_v13 }
 0x186   : > { %p1698_p2 = scmp.ne.s32.totalorder %s3765_s6, 0 }
 0x187   : > { %v2448_v31 = vmov (!%p1698_p2), 0.0  }
 0x188   : > { %685 = vst.msk [vmem:[#allocation2] sm:$0xff] (!%p1698_p2), %vm672_vm2, %v2448_v31  ;;  %686 = vst.msk [vmem:[#allocation2 + $0x8] sm:$0xff] (!%p1698_p2), %vm672_vm2, %v2448_v31 }
 0x256   : > { %v1744_v15 = vpop.f32.mrb[0].mxu0 }
 0x257   : > { %v1748_v16 = vpop.f32.mrb[0].mxu1  ;;  %v650_v17 = vadd.f32 %v1744_v15, %v3039_v14  ;;  %v641_v19 = vpop.f32.mrb[1].mxu0  ;;  %684 = sbr.rel (%p1698_p2) target bundleno = 606 (0x25e), region = 96 }
 0x258   : > { %v666_v18 = vadd.f32 %v1748_v16, %v3039_v14  ;;  %v657_v20 = vpop.f32.mrb[1].mxu1  ;;  %v642_v21 = vadd.f32 %v3039_v14, %v641_v19  ;;  %v1745_v23 = vpop.f32.mrb[2].mxu0 }
 0x259   : > { %v658_v22 = vadd.f32 %v3039_v14, %v657_v20  ;;  %v1749_v24 = vpop.f32.mrb[2].mxu1  ;;  %675 = vst.msk [vmem:[#allocation2 + $0x20] sm:$0xff] %vm672_vm2, %v650_v17  ;;  %v653_v25 = vadd.f32 %v1745_v23, %v3039_v14  ;;  %v644_v27 = vpop.f32.mrb[3].mxu0 }
 0x25a   : > { %679 = vst.msk [vmem:[#allocation2 + $0x40] sm:$0xff] %vm672_vm2, %v666_v18  ;;  %v669_v26 = vadd.f32 %v1749_v24, %v3039_v14  ;;  %v660_v28 = vpop.f32.mrb[3].mxu1  ;;  %673 = vst.msk [vmem:[#allocation2 + $0x10] sm:$0xff] %vm672_vm2, %v642_v21  ;;  %v645_v29 = vadd.f32 %v3039_v14, %v644_v27 }
 0x25b   : > { %677 = vst.msk [vmem:[#allocation2 + $0x30] sm:$0xff] %vm672_vm2, %v658_v22  ;;  %v661_v30 = vadd.f32 %v3039_v14, %v660_v28  ;;  %676 = vst.msk [vmem:[#allocation2 + $0x28] sm:$0xff] %vm672_vm2, %v653_v25 }
 0x25c   : > { %680 = vst.msk [vmem:[#allocation2 + $0x48] sm:$0xff] %vm672_vm2, %v669_v26  ;;  %674 = vst.msk [vmem:[#allocation2 + $0x18] sm:$0xff] %vm672_vm2, %v645_v29 }
 0x25d   : > { %678 = vst.msk [vmem:[#allocation2 + $0x38] sm:$0xff] %vm672_vm2, %v661_v30 }
 0x25e PF: > { %s3766_s11 = sld [smem:[#allocation30_spill]] }
 0x264   : > { %p1699_p6 = scmp.le.s32.totalorder %s3766_s11, 0 }
 0x265   : > { %v691_v32 = vld [vmem:[%s479_s10] sm:$0xff] (!%p1699_p6)  ;;  %v692_v33 = vld [vmem:[%s479_s10 + $0x8] sm:$0xff] (!%p1699_p6)  ;;  %v2449_v34 = vmov (!%p1699_p6), 0.0   ;;  %vm2450_vm3 = vmmov (!%p1699_p6), 0  }
 0x266   : > { %690 = sbr.rel (%p1699_p6) target bundleno = 835 (0x343), region = 100  ;;  %1750 = vmatprep.subr.bf16.mxu0 (!%p1699_p6), %v2449_v34  ;;  %1752 = vmatprep.mubr.msk.bf16.mxu0 (!%p1699_p6), %vm2450_vm3, %v2449_v34  ;;  %v693_v35 = vpack.c.bf16 (!%p1699_p6), %v692_v33, %v691_v32 }
 0x267   : > { %1751 = vmatpush3.bf16.msra.mxu0 (!%p1699_p6), %v3025_v3 }
 0x26a   : > { %1753 = vmatmul.mubr.msk.bf16.vlgmr.msra.gmra.mrb[0].mxu0 (!%p1699_p6), %vm590_vm1, %v693_v35 }
 0x33d   : > { %v731_v36 = vpop.f32.mrb[0].mxu0 }
 0x33e   : > { %v732_v37 = vadd.f32 %v3039_v14, %v731_v36  ;;  %v1754_v38 = vpop.f32.mrb[1].mxu0 }
 0x33f   : > { %v734_v39 = vpop.f32.mrb[2].mxu0 }
 0x340   : > { %738 = vst.msk [vmem:[#allocation2] sm:$0xff] %vm672_vm2, %v732_v37  ;;  %v735_v40 = vadd.f32 %v3039_v14, %v734_v39  ;;  %v1755_v41 = vpop.f32.mrb[3].mxu0 }
 0x342   : > { %739 = vst.msk [vmem:[#allocation2 + $0x8] sm:$0xff] %vm672_vm2, %v735_v40 }
 0x343 PF: > { %s3767_s20 = sld [smem:[#allocation30_spill]] }
 0x349   : > { %p1701_p7 = scmp.ne.s32.totalorder %s3767_s20, 3 }
 0x34a   : > { %v2451_v42 = vmov (!%p1701_p7), 0.0  }
 0x34b   : > { %743 = sbr.rel (%p1701_p7) target bundleno = 850 (0x352), region = 104  ;;  %744 = vst.msk [vmem:[#allocation2 + $0x50] sm:$0xff] (!%p1701_p7), %vm672_vm2, %v2451_v42  ;;  %745 = vst.msk [vmem:[#allocation2 + $0x58] sm:$0xff] (!%p1701_p7), %vm672_vm2, %v2451_v42 }
 0x352 PF: > { %s3768_s9 = sld [smem:[#allocation30_spill]] }
 0x358   : > { %p1702_p8 = scmp.ge.s32.totalorder %s3768_s9, 3 }
 0x359   : > { %v750_v43 = vld [vmem:[%s488_s3] sm:$0xff] (!%p1702_p8)  ;;  %v751_v44 = vld [vmem:[%s488_s3 + $0x8] sm:$0xff] (!%p1702_p8)  ;;  %v2452_v45 = vmov (!%p1702_p8), 0.0   ;;  %vm2453_vm4 = vmmov (!%p1702_p8), 0  }
 0x35a   : > { %749 = sbr.rel (%p1702_p8) target bundleno = 1079 (0x437), region = 108  ;;  %1756 = vmatprep.subr.bf16.mxu0 (!%p1702_p8), %v2452_v45  ;;  %1758 = vmatprep.mubr.msk.bf16.mxu0 (!%p1702_p8), %vm2453_vm4, %v2452_v45  ;;  %v752_v46 = vpack.c.bf16 (!%p1702_p8), %v751_v44, %v750_v43 }
 0x35b   : > { %1757 = vmatpush3.bf16.msra.mxu0 (!%p1702_p8), %v3025_v3 }
 0x35e   : > { %1759 = vmatmul.mubr.msk.bf16.vlgmr.msra.gmra.mrb[0].mxu0 (!%p1702_p8), %vm590_vm1, %v752_v46 }
 0x431   : > { %v790_v47 = vpop.f32.mrb[0].mxu0 }
 0x432   : > { %v791_v48 = vadd.f32 %v3039_v14, %v790_v47  ;;  %v1760_v49 = vpop.f32.mrb[1].mxu0 }
 0x433   : > { %v793_v50 = vpop.f32.mrb[2].mxu0 }
 0x434   : > { %797 = vst.msk [vmem:[#allocation2 + $0x50] sm:$0xff] %vm672_vm2, %v791_v48  ;;  %v794_v51 = vadd.f32 %v3039_v14, %v793_v50  ;;  %v1761_v52 = vpop.f32.mrb[3].mxu0 }
 0x436   : > { %798 = vst.msk [vmem:[#allocation2 + $0x58] sm:$0xff] %vm672_vm2, %v794_v51 }
 0x437 PF: > { %v1991_v53 = vld [vmem:[#allocation15] sm:$0xff]   ;;  %v801_v54 = vlaneseq  ;;  %v1992_v55 = vld [vmem:[#allocation15 + $0x8] sm:$0xff]   ;;  %v3095_v59 = vld [vmem:[#allocation2 + $0x8] sm:$0xff]  ;;  %s3785_s12 = sld [smem:[#allocation30_spill]]  ;;  %s3786_s27 = sld [smem:[#allocation31_spill]] }
 0x438   : > { %1762 = vmatprep.subr.bf16.mxu0 %v1991_v53  ;;  %1776 = vmatprep.subr.bf16.mxu1 %v1991_v53  ;;  %v3089_v56 = vld [vmem:[#allocation12] sm:$0xff]  ;;  %v3097_v60 = vld [vmem:[#allocation2 + $0x10] sm:$0xff]  ;;  %v3099_v61 = vld [vmem:[#allocation2 + $0x18] sm:$0xff]  ;;  %v943_v8 = vrot.slane %v3095_v59, 7  ;;  %v1004_v37 = vrot.slane %v3095_v59, 1  ;;  %s1455_s0 = sshll.u32 %s3059_s23, 4  ;;  %s3562_s0 = int_to_ptr.vmem [resolvable:$true] %s1455_s0 }
 0x439   : > { %v3091_v57 = vshrl.u32 %v801_v54, 7  ;;  %v3093_v58 = vld [vmem:[#allocation2] sm:$0xff]  ;;  %1763 = vmatpush3.bf16.msra.mxu0 %v1991_v53  ;;  %1778 = vmatpush3.bf16.msra.mxu1 %v1991_v53  ;;  %v3109_v5 = vld [vmem:[#allocation2 + $0x28] sm:$0xff]  ;;  %v3111_v6 = vld [vmem:[#allocation2 + $0x38] sm:$0xff]  ;;  %v3116_v9 = vrot.slane %v3097_v60, 7  ;;  %v945_v10 = vrot.slane %v3099_v61, 7 }
 0x43a   : > { %v942_v62 = vrot.slane %v3093_v58, 7  ;;  %v1003_v63 = vrot.slane %v3093_v58, 1  ;;  %1764 = vmatprep.subr.bf16.mxu0 %v1992_v55  ;;  %1777 = vmatprep.subr.bf16.mxu1 %v1992_v55  ;;  %v3107_v4 = vld [vmem:[#allocation2 + $0x20] sm:$0xff]  ;;  %v947_v17 = vrot.slane %v3109_v5, 7  ;;  %v3131_v18 = vrot.slane %v3111_v6, 7  ;;  %v3173_v30 = vld [vmem:[#allocation2 + $0x30] sm:$0xff] }
 0x43b   : > { %v803_v0 = vadd.s32 8, %v3091_v57  ;;  %v804_v1 = vadd.s32 16, %v3091_v57  ;;  %v805_v2 = vadd.s32 24, %v3091_v57  ;;  %v814_v3 = vand.u32 15, %v3091_v57  ;;  %s3787_s10 = sld [smem:[#allocation49_spill]]  ;;  %s1440_s30 = scalar_lea.sflag [#allocation5], %s2982_s4 }
 0x43c   : > { %v932_v7 = vsub.s32 1, %v3091_v57  ;;  %v3127_v16 = vrot.slane %v3107_v4, 7  ;;  %vm950_vm9 = vcmp.lt.s32.totalorder %v3091_v57, 1  ;;  %v985_v34 = vsub.s32 0, %v3091_v57  ;;  %s2267_s3 = scalar_lea.vmem %s3562_s0, 1024  ;;  %p3789_p9 = scmp.ne.s32.totalorder %s3733_s18, 0 }
 0x43d   : > { %v821_v11 = vand.u32 15, %v803_v0  ;;  %v828_v12 = vand.u32 15, %v804_v1  ;;  %v835_v13 = vand.u32 15, %v805_v2  ;;  %vm3119_vm5 = vcmp.gt.s32.totalorder %v814_v3, 0  ;;  %1765 = vmatpush3.bf16.msra.mxu0 %v1992_v55  ;;  %1779 = vmatpush3.bf16.msra.mxu1 %v1992_v55  ;;  %v3225_v0 = vld [vmem:[#allocation2 + $0x48] sm:$0xff]  ;;  %s1714_s13 = sshll.u32 %s3785_s12, 3  ;;  %p2268_p3 = scmp.ne.s32.totalorder %s3562_s0, %s2267_s3 }
 0x43e   : > { %v3124_v15 = vrot.slane %v3089_v56, %v932_v7  ;;  %v3161_v27 = vsel %vm950_vm9, %v3127_v16, %v947_v17  ;;  %v3166_v28 = vsel %vm950_vm9, %v945_v10, %v3127_v16  ;;  %v3171_v29 = vsel %vm950_vm9, %v3116_v9, %v945_v10  ;;  %s1715_s8 = sshll.u32 %s3786_s27, 5  ;;  %s2454_s6 = smov [#allocation18]  }
 0x43f   : > { %vm3133_vm6 = vcmp.gt.s32.totalorder %v828_v12, 0  ;;  %vm3137_vm7 = vcmp.lt.s32.totalorder %v821_v11, 15  ;;  %vm3141_vm8 = vcmp.lt.s32.totalorder %v835_v13, 15  ;;  %v956_v31 = vsel %vm950_vm9, %v943_v8, %v3116_v9  ;;  %s1452_s21 = sadd.s32 %s1715_s8, %s1714_s13  ;;  %p2269_p5 = pnand %p2268_p3, %p3789_p9 }
 0x440   : > { %v934_v22 = vmul.f32 %v3124_v15, %v3093_v58  ;;  %v935_v23 = vmul.f32 %v3124_v15, %v3095_v59  ;;  %v936_v24 = vmul.f32 %v3124_v15, %v3097_v60  ;;  %v937_v25 = vmul.f32 %v3124_v15, %v3099_v61  ;;  %s1716_s24 = sshll.u32 %s1452_s21, 7  ;;  %s2271_s11 = sshll.u32 %s2454_s6, 4  ;;  %s2272_s11 = int_to_ptr.vmem [resolvable:$false] %s2271_s11 }
 0x441   : > { %v939_v26 = vmul.f32 %v3124_v15, %v3109_v5  ;;  %v957_v32 = vsel %vm950_vm9, %v942_v62, %v943_v8  ;;  %v958_v33 = vsel %vm950_vm9, %v3131_v18, %v942_v62  ;;  %v977_v36 = vsel %vm3133_vm6, %v956_v31, 0.0  ;;  %s3788_s2 = smov %s3787_s10  ;;  %s3560_s7 = scalar_lea.hbm %s3787_s10, %s1716_s24 }
 0x442   : > { %v975_v35 = vsel %vm3119_vm5, %v958_v33, 0.0  ;;  %v3190_v38 = vrot.slane %v3097_v60, 1  ;;  %v3193_v39 = vrot.slane %v3089_v56, %v985_v34  ;;  %v1006_v40 = vrot.slane %v3099_v61, 1  ;;  %p2270_p4 = pneg %p2269_p5  ;;  %s2273_s20 = scalar_lea.vmem %s2272_s11, 2048 }
 0x443   : > { %v3197_v41 = vrot.slane %v3107_v4, 1  ;;  %v1008_v42 = vrot.slane %v3109_v5, 1  ;;  %v1009_v43 = vrot.slane %v3173_v30, 1  ;;  %vm1011_vm10 = vcmp.lt.s32.totalorder %v3091_v57, 7  ;;  %p2274_p10 = scmp.lt.s32.totalorder %s3562_s0, %s2272_s11  ;;  %p2275_p11 = scmp.lt.s32.totalorder %s2273_s20, %s2267_s3 }
 0x444   : > { %v1046_v44 = vsub.s32 2, %v3091_v57  ;;  %v1068_v45 = vsub.s32 4, %v3091_v57  ;;  %v987_v46 = vmul.f32 %v3193_v39, %v975_v35  ;;  %v988_v47 = vmul.f32 %v3193_v39, %v957_v32 }
 0x445   : > { %v989_v48 = vmul.f32 %v3193_v39, %v977_v36  ;;  %v990_v49 = vmul.f32 %v3193_v39, %v3171_v29  ;;  %v992_v50 = vmul.f32 %v3193_v39, %v3161_v27  ;;  %v3215_v51 = vsel %vm1011_vm10, %v1008_v42, %v1009_v43  ;;  %p2276_p13 = por %p2275_p11, %p2274_p10 }
 0x446   : > { %v3220_v52 = vsel %vm1011_vm10, %v3197_v41, %v1008_v42  ;;  %v1015_v53 = vsel %vm1011_vm10, %v1006_v40, %v3197_v41  ;;  %v995_v54 = vadd.f32 %v987_v46, %v934_v22  ;;  %v996_v55 = vadd.f32 %v988_v47, %v935_v23  ;;  %v3284_v47 = vld [vmem:[#allocation2 + $0x58] sm:$0xff] }
 0x447   : > { %v997_v59 = vadd.f32 %v989_v48, %v936_v24  ;;  %v998_v62 = vadd.f32 %v990_v49, %v937_v25  ;;  %v3227_v1 = vadd.f32 %v992_v50, %v939_v26  ;;  %v1016_v2 = vsel %vm1011_vm10, %v3190_v38, %v1006_v40  ;;  %p2277_p0 = pnand %p2276_p13, %p2270_p4 }
 0x448   : > { %v1017_v3 = vsel %vm1011_vm10, %v1004_v37, %v3190_v38  ;;  %v1018_v7 = vsel %vm1011_vm10, %v1003_v63, %v1004_v37  ;;  %v1039_v10 = vsel %vm3141_vm8, %v1015_v53, 0.0  ;;  %v3244_v11 = vrot.slane %v3089_v56, %v1046_v44 }
 0x449   : > { %v1037_v8 = vsel %vm3137_vm7, %v1017_v3, 0.0  ;;  %v3247_v12 = vrot.slane %v3089_v56, %v1068_v45  ;;  %v3250_v13 = vrot.slane %v3225_v0, 7  ;;  %v1093_v22 = vsel %vm3133_vm6, %v3166_v28, 0.0 }
 0x44a   : > { %v1101_v23 = vsub.s32 3, %v3091_v57  ;;  %v1125_v24 = vsel %vm3137_vm7, %v1015_v53, 0.0  ;;  %v1048_v25 = vmul.f32 %v3244_v11, %v1018_v7  ;;  %v1049_v26 = vmul.f32 %v3244_v11, %v1037_v8 }
 0x44b   : > { %v1050_v31 = vmul.f32 %v3244_v11, %v1016_v2  ;;  %v1051_v32 = vmul.f32 %v3244_v11, %v1039_v10  ;;  %v3264_v33 = vmul.f32 %v3244_v11, %v3220_v52  ;;  %v1070_v34 = vmul.f32 %v3247_v12, %v3097_v60 }
 0x44c   : > { %v1071_v35 = vmul.f32 %v3247_v12, %v3099_v61  ;;  %v1072_v36 = vmul.f32 %v3247_v12, %v3107_v4  ;;  %v1056_v37 = vadd.f32 %v1048_v25, %v995_v54  ;;  %v1057_v40 = vadd.f32 %v1049_v26, %v996_v55 }
 0x44d   : > { %v1058_v42 = vadd.f32 %v1050_v31, %v997_v59  ;;  %v1059_v44 = vadd.f32 %v1051_v32, %v998_v62  ;;  %v1073_v45 = vmul.f32 %v3247_v12, %v3109_v5  ;;  %v1090_v46 = vsel %vm950_vm9, %v3250_v13, %v3116_v9  ;;  %v3292_v62 = vld [vmem:[#allocation12 + $0x8] ss:$0 sm:$0xff] }
 0x44e   : > { %v3279_v60 = vrot.slane %v3089_v56, %v1101_v23  ;;  %v1127_v61 = vsel %vm3141_vm8, %v3215_v51, 0.0  ;;  %v1078_v48 = vadd.f32 %v1070_v34, %v1056_v37  ;;  %v1079_v49 = vadd.f32 %v1071_v35, %v1057_v40 }
 0x44f   : > { %v1080_v50 = vadd.f32 %v1072_v36, %v1058_v42  ;;  %v1091_v53 = vsel %vm3119_vm5, %v1090_v46, 0.0  ;;  %v1081_v54 = vadd.f32 %v1073_v45, %v1059_v44  ;;  %v1134_v7 = vsub.s32 5, %v3091_v57  ;;  %v3326_v45 = vld [vmem:[#allocation2 + $0x40] sm:$0xff] }
 0x450   : > { %v1103_v55 = vmul.f32 %v3279_v60, %v1091_v53  ;;  %v1104_v9 = vmul.f32 %v3279_v60, %v3171_v29  ;;  %v1105_v59 = vmul.f32 %v3279_v60, %v1093_v22  ;;  %v1106_v3 = vmul.f32 %v3279_v60, %v3161_v27 }
 0x451   : > { %v1156_v8 = vsub.s32 7, %v3091_v57  ;;  %v1175_v10 = vrot.slane %v3284_v47, 7  ;;  %v1189_v31 = vsub.s32 6, %v3091_v57  ;;  %v3301_v29 = vrot.slane %v3089_v56, %v1134_v7 }
 0x452   : > { %v1111_v23 = vadd.f32 %v1103_v55, %v1078_v48  ;;  %v1112_v25 = vadd.f32 %v1104_v9, %v1079_v49  ;;  %v1113_v26 = vadd.f32 %v1105_v59, %v1080_v50  ;;  %v1114_v32 = vadd.f32 %v1106_v3, %v1081_v54 }
 0x453   : > { %v3304_v22 = vrot.slane %v3089_v56, %v1156_v8  ;;  %v1178_v34 = vsel %vm950_vm9, %v1175_v10, %v3127_v16  ;;  %v3314_v36 = vrot.slane %v3089_v56, %v1189_v31  ;;  %v1213_v37 = vsel %vm3137_vm7, %v3215_v51, 0.0  ;;  %v3376_v31 = vld [vmem:[#allocation14] ss:$0 sm:$0xff] }
 0x454   : > { %v1179_v35 = vsel %vm3119_vm5, %v1178_v34, 0.0  ;;  %v1224_v40 = vmul.f32 %v3292_v62, %v3220_v52  ;;  %v1136_v42 = vmul.f32 %v3301_v29, %v1016_v2  ;;  %v1137_v44 = vmul.f32 %v3301_v29, %v1125_v24 }
 0x455   : > { %v1138_v16 = vmul.f32 %v3301_v29, %v3220_v52  ;;  %v1139_v14 = vmul.f32 %v3301_v29, %v1127_v61  ;;  %v1158_v56 = vmul.f32 %v3304_v22, %v3107_v4  ;;  %v1159_v20 = vmul.f32 %v3304_v22, %v3109_v5 }
 0x456   : > { %v1191_v46 = vmul.f32 %v3314_v36, %v1179_v35  ;;  %v1192_v2 = vmul.f32 %v3314_v36, %v3161_v27  ;;  %v1144_v48 = vadd.f32 %v1136_v42, %v1111_v23  ;;  %v1145_v24 = vadd.f32 %v1137_v44, %v1112_v25 }
 0x457   : > { %v1146_v49 = vadd.f32 %v1138_v16, %v1113_v26  ;;  %v1225_v52 = vmul.f32 %v3292_v62, %v1213_v37  ;;  %v948_v61 = vrot.slane %v3173_v30, 7  ;;  %v3338_v50 = vrot.slane %v3111_v6, 1 }
 0x458   : > { %v1119_v53 = vrot.slane %v3326_v45, 1  ;;  %v1147_v54 = vadd.f32 %v1139_v14, %v1114_v32  ;;  %v1166_v55 = vadd.f32 %v1158_v56, %v1144_v48  ;;  %v1167_v9 = vadd.f32 %v1159_v20, %v1145_v24 }
 0x459   : > { %v1160_v59 = vmul.f32 %v3304_v22, %v3173_v30  ;;  %v1161_v27 = vmul.f32 %v3304_v22, %v3111_v6  ;;  %v3348_v3 = vsel %vm950_vm9, %v948_v61, %v3131_v18  ;;  %v3354_v7 = vsel %vm950_vm9, %v947_v17, %v948_v61 }
 0x45a   : > { %v3361_v8 = vsel %vm1011_vm10, %v1009_v43, %v3338_v50  ;;  %v3368_v23 = vsel %vm1011_vm10, %v3338_v50, %v1119_v53  ;;  %v1199_v25 = vadd.f32 %v1191_v46, %v1166_v55  ;;  %v1200_v5 = vadd.f32 %v1192_v2, %v1167_v9 }
 0x45b   : > { %v994_v17 = vmul.f32 %v3193_v39, %v3348_v3  ;;  %v3374_v26 = vmul.f32 %v3244_v11, %v3361_v8  ;;  %v1168_v43 = vadd.f32 %v1160_v59, %v1146_v49  ;;  %v1169_v32 = vadd.f32 %v1161_v27, %v1147_v54 }
 0x45c   : > { %v1181_v34 = vsel %vm3133_vm6, %v3354_v7, 0.0  ;;  %v1194_v35 = vmul.f32 %v3314_v36, %v3348_v3  ;;  %v1232_v37 = vadd.f32 %v1224_v40, %v1199_v25  ;;  %v1233_v42 = vadd.f32 %v1225_v52, %v1200_v5 }
 0x45d   : > { %v1193_v44 = vmul.f32 %v3314_v36, %v1181_v34  ;;  %v1215_v16 = vsel %vm3141_vm8, %v3368_v23, 0.0  ;;  %v1226_v56 = vmul.f32 %v3292_v62, %v3361_v8  ;;  %v806_v19 = vadd.s32 32, %v3091_v57 }
 0x45e   : > { %v1202_v14 = vadd.f32 %v1194_v35, %v1169_v32  ;;  %v1227_v20 = vmul.f32 %v3292_v62, %v1215_v16  ;;  %v1247_v46 = vadd.f32 %v3376_v31, %v1232_v37  ;;  %v1248_v2 = vadd.f32 %v3376_v31, %v1233_v42 }
 0x45f   : > { %v1201_v40 = vadd.f32 %v1193_v44, %v1168_v43  ;;  %v807_v48 = vadd.s32 40, %v3091_v57  ;;  %v808_v49 = vadd.s32 48, %v3091_v57  ;;  %v809_v21 = vadd.s32 56, %v3091_v57 }
 0x460   : > { %v1235_v24 = vadd.f32 %v1227_v20, %v1202_v14  ;;  %v842_v52 = vand.u32 15, %v806_v19  ;;  %v1255_v61 = vmul.f32 %v1247_v46, %v1247_v46  ;;  %v1256_v54 = vmul.f32 %v1248_v2, %v1248_v2 }
 0x461   : > { %v3396_v55 = vmul.f32 0.5, %v1247_v46  ;;  %v3398_v9 = vmul.f32 0.5, %v1248_v2  ;;  %v1234_v59 = vadd.f32 %v1226_v56, %v1201_v40  ;;  %v849_v25 = vand.u32 15, %v807_v48 }
 0x462   : > { %v1250_v27 = vadd.f32 %v3376_v31, %v1235_v24  ;;  %v856_v5 = vand.u32 15, %v808_v49  ;;  %v1263_v43 = vmul.f32 %v1255_v61, %v1247_v46  ;;  %v1264_v32 = vmul.f32 %v1256_v54, %v1248_v2 }
 0x463   : > { %v863_v34 = vand.u32 15, %v809_v21  ;;  %vm3401_vm11 = vcmp.gt.s32.totalorder %v842_v52, 0  ;;  %v1249_v37 = vadd.f32 %v3376_v31, %v1234_v59  ;;  %vm3412_vm13 = vcmp.lt.s32.totalorder %v849_v25, 15 }
 0x464   : > { %v1258_v42 = vmul.f32 %v1250_v27, %v1250_v27  ;;  %v3406_v44 = vmul.f32 0.5, %v1250_v27  ;;  %vm3408_vm12 = vcmp.gt.s32.totalorder %v856_v5, 0  ;;  %v1271_v14 = vmul.f32 0.044715, %v1263_v43 }
 0x465   : > { %v1272_v56 = vmul.f32 0.044715, %v1264_v32  ;;  %vm3416_vm14 = vcmp.lt.s32.totalorder %v863_v34, 15  ;;  %v1257_v40 = vmul.f32 %v1249_v37, %v1249_v37  ;;  %v3420_v24 = vmul.f32 0.5, %v1249_v37 }
 0x466   : > { %v1266_v48 = vmul.f32 %v1258_v42, %v1250_v27  ;;  %v938_v49 = vmul.f32 %v3124_v15, %v3107_v4  ;;  %v1279_v21 = vadd.f32 %v1271_v14, %v1247_v46  ;;  %v940_v61 = vmul.f32 %v3124_v15, %v3173_v30 }
 0x467   : > { %v1280_v52 = vadd.f32 %v1272_v56, %v1248_v2  ;;  %v941_v54 = vmul.f32 %v3124_v15, %v3111_v6  ;;  %v1265_v59 = vmul.f32 %v1257_v40, %v1249_v37  ;;  %v979_v5 = vsel %vm3401_vm11, %v3166_v28, 0.0 }
 0x468   : > { %v1274_v25 = vmul.f32 0.044715, %v1266_v48  ;;  %v981_v43 = vsel %vm3408_vm12, %v3354_v7, 0.0  ;;  %v1287_v32 = vmul.f32 0.7978846, %v1279_v21  ;;  %v991_v46 = vmul.f32 %v3193_v39, %v979_v5 }
 0x469   : > { %v1288_v4 = vmul.f32 0.7978846, %v1280_v52  ;;  %v993_v2 = vmul.f32 %v3193_v39, %v981_v43  ;;  %v1273_v34 = vmul.f32 0.044715, %v1265_v59  ;;  %v1002_v14 = vadd.f32 %v994_v17, %v941_v54 }
 0x46a   : > { %v1282_v42 = vadd.f32 %v1274_v25, %v1250_v27  ;;  %v1019_v15 = vsel %vm1011_vm10, %v3338_v50, %v1003_v63  ;;  %1993 = vtanh.f32 %v1287_v32  ;;  %v999_v28 = vadd.f32 %v991_v46, %v938_v49 }
 0x46b   : > { %v1001_v56 = vadd.f32 %v993_v2, %v940_v61  ;;  %v1041_v40 = vsel %vm3412_vm13, %v3215_v51, 0.0  ;;  %1995 = vtanh.f32 %v1288_v4  ;;  %v1281_v48 = vadd.f32 %v1273_v34, %v1249_v37 }
 0x46c   : > { %v1290_v21 = vmul.f32 0.7978846, %v1282_v42  ;;  %v1043_v39 = vsel %vm3416_vm14, %v1019_v15, 0.0  ;;  %v1053_v17 = vmul.f32 %v3244_v11, %v1041_v40  ;;  %v1060_v27 = vadd.f32 %v3264_v33, %v999_v28  ;;  %v1152_v42 = vld [vmem:[#allocation2 + $0x50] sm:$0xff] }
 0x46d   : > { %v1055_v58 = vmul.f32 %v3244_v11, %v1043_v39  ;;  %v1062_v63 = vadd.f32 %v3374_v26, %v1001_v56  ;;  %v1289_v50 = vmul.f32 0.7978846, %v1281_v48  ;;  %v1074_v49 = vmul.f32 %v3247_v12, %v3173_v30 }
 0x46e   : > { %1997 = vtanh.f32 %v1290_v21  ;;  %v1075_v51 = vmul.f32 %v3247_v12, %v3111_v6  ;;  %v1061_v37 = vadd.f32 %v1053_v17, %v3227_v1  ;;  %v1076_v61 = vmul.f32 %v3247_v12, %v3326_v45 }
 0x46f   : > { %v1063_v52 = vadd.f32 %v1055_v58, %v1002_v14  ;;  %v1077_v11 = vmul.f32 %v3247_v12, %v3225_v0  ;;  %1999 = vtanh.f32 %v1289_v50  ;;  %v1082_v33 = vadd.f32 %v1074_v49, %v1060_v27 }
 0x470   : > { %v1086_v26 = vrot.slane %v3326_v45, 7  ;;  %v1095_v30 = vsel %vm3401_vm11, %v3354_v7, 0.0  ;;  %v1083_v54 = vadd.f32 %v1075_v51, %v1061_v37  ;;  %v1084_v59 = vadd.f32 %v1076_v61, %v1062_v63 }
 0x471   : > { %v1085_v6 = vadd.f32 %v1077_v11, %v1063_v52  ;;  %v1107_v1 = vmul.f32 %v3279_v60, %v1095_v30  ;;  %v1108_v5 = vmul.f32 %v3279_v60, %v3348_v3  ;;  %v1120_v43 = vrot.slane %v3225_v0, 1 }
 0x472   : > { %v1088_v25 = vsel %vm950_vm9, %v1086_v26, %v3250_v13  ;;  %v1089_v12 = vsel %vm950_vm9, %v3131_v18, %v1086_v26  ;;  %v1129_v46 = vsel %vm3412_vm13, %v3368_v23, 0.0  ;;  %v1140_v28 = vmul.f32 %v3301_v29, %v3361_v8 }
 0x473   : > { %v1097_v7 = vsel %vm3408_vm12, %v1089_v12, 0.0  ;;  %v1110_v32 = vmul.f32 %v3279_v60, %v1088_v25  ;;  %v1115_v4 = vadd.f32 %v1107_v1, %v1082_v33  ;;  %v1116_v34 = vadd.f32 %v1108_v5, %v1083_v54 }
 0x474   : > { %v1109_v2 = vmul.f32 %v3279_v60, %v1097_v7  ;;  %v1121_v18 = vsel %vm1011_vm10, %v1119_v53, %v1120_v43  ;;  %v1123_v3 = vsel %vm1011_vm10, %v1120_v43, %v3190_v38  ;;  %v1994_v14 = vpop.eup %1993  ;;  %v1141_v23 = vmul.f32 %v3301_v29, %v1129_v46 }
 0x475   : > { %v1118_v15 = vadd.f32 %v1110_v32, %v1085_v6  ;;  %v1142_v60 = vmul.f32 %v3301_v29, %v1121_v18  ;;  %v1996_v56 = vpop.eup %1995  ;;  %v1311_v40 = vadd.f32 1.0, %v1994_v14  ;;  %v1162_v53 = vmul.f32 %v3304_v22, %v3326_v45 }
 0x476   : > { %v1117_v48 = vadd.f32 %v1109_v2, %v1084_v59  ;;  %v1163_v21 = vmul.f32 %v3304_v22, %v3225_v0  ;;  %v1312_v38 = vadd.f32 1.0, %v1996_v56  ;;  %v1148_v39 = vadd.f32 %v1140_v28, %v1115_v4 }
 0x477   : > { %v1149_v17 = vadd.f32 %v1141_v23, %v1116_v34  ;;  %v1174_v58 = vrot.slane %v1152_v42, 7  ;;  %v1319_v8 = vmul.f32 %v1311_v40, %v3396_v55  ;;  %v1183_v50 = vsel %vm3401_vm11, %v1089_v12, 0.0 }
 0x478   : > { %v1998_v27 = vpop.eup %1997  ;;  %v1150_v63 = vadd.f32 %v1142_v60, %v1117_v48  ;;  %v1196_v49 = vmul.f32 %v3314_v36, %v1088_v25  ;;  %v1320_v51 = vmul.f32 %v1312_v38, %v3398_v9  ;;  %v1170_v45 = vadd.f32 %v1162_v53, %v1148_v39 }
 0x479   : > { %v1314_v37 = vadd.f32 1.0, %v1998_v27  ;;  %v1171_v52 = vadd.f32 %v1163_v21, %v1149_v17  ;;  %v2000_v61 = vpop.eup %1999  ;;  %v1195_v0 = vmul.f32 %v3314_v36, %v1183_v50  ;;  %v1207_v11 = vrot.slane %v1152_v42, 1 }
 0x47a   : > { %v1228_v33 = vmul.f32 %v3292_v62, %v1121_v18  ;;  %v1131_v55 = vsel %vm3416_vm14, %v1123_v3, 0.0  ;;  %v1327_v26 = vpack.c.bf16 %v1320_v51, %v1319_v8  ;;  %v1313_v30 = vadd.f32 1.0, %v2000_v61 }
 0x47b   : > { %v1322_v35 = vmul.f32 %v1314_v37, %v3406_v44  ;;  %v1204_v54 = vadd.f32 %v1196_v49, %v1171_v52  ;;  %v1203_v59 = vadd.f32 %v1195_v0, %v1170_v45  ;;  %v1210_v9 = vsel %vm1011_vm10, %v1120_v43, %v1207_v11 }
 0x47c   : > { %v1143_v6 = vmul.f32 %v3301_v29, %v1131_v55  ;;  %v1164_v1 = vmul.f32 %v3304_v22, %v1152_v42  ;;  %1766 = vmatprep.mubr.msk.bf16.mxu0 %vm672_vm2, %v1327_v26  ;;  %v1321_v25 = vmul.f32 %v1313_v30, %v3420_v24  ;;  %v1217_v12 = vsel %vm3412_vm13, %v1210_v9, 0.0 }
 0x47d   : > { %v1165_v5 = vmul.f32 %v3304_v22, %v3284_v47  ;;  %v1176_v44 = vsel %vm950_vm9, %v1174_v58, %v1175_v10  ;;  %v1229_v43 = vmul.f32 %v3292_v62, %v1217_v12  ;;  %v1236_v29 = vadd.f32 %v1228_v33, %v1203_v59 }
 0x47e   : > { %v1151_v7 = vadd.f32 %v1143_v6, %v1118_v15  ;;  %v1172_v32 = vadd.f32 %v1164_v1, %v1150_v63  ;;  %v1328_v4 = vpack.c.bf16 %v1322_v35, %v1321_v25  ;;  %v1177_v24 = vsel %vm950_vm9, %v3250_v13, %v1174_v58 }
 0x47f   : > { %v1198_v20 = vmul.f32 %v3314_v36, %v1176_v44  ;;  %v1208_v46 = vrot.slane %v3284_v47, 1  ;;  %v1237_v22 = vadd.f32 %v1229_v43, %v1204_v54  ;;  %v1251_v2 = vadd.f32 %v3376_v31, %v1236_v29  ;;  %v1706_v44 = vld [vmem:[#allocation17] ss:$0 sm:$0xff] }
 0x480   : > { %v1173_v34 = vadd.f32 %v1165_v5, %v1151_v7  ;;  %v1185_v10 = vsel %vm3408_vm12, %v1177_v24, 0.0  ;;  %1767 = vmatmul.mubr.msk.bf16.vlgmr.msra.gmra.mrb[0].mxu0 %vm672_vm2, %v1328_v4 }
 0x481   : > { %v1197_v18 = vmul.f32 %v3314_v36, %v1185_v10  ;;  %v1209_v3 = vsel %vm1011_vm10, %v1207_v11, %v1208_v46  ;;  %v1211_v13 = vsel %vm1011_vm10, %v1208_v46, %v3197_v41  ;;  %v1252_v47 = vadd.f32 %v3376_v31, %v1237_v22 }
 0x482   : > { %v1259_v42 = vmul.f32 %v1251_v2, %v1251_v2  ;;  %v1206_v14 = vadd.f32 %v1198_v20, %v1173_v34  ;;  %v1219_v16 = vsel %vm3416_vm14, %v1211_v13, 0.0  ;;  %v1230_v28 = vmul.f32 %v3292_v62, %v1209_v3 }
 0x483   : > { %v1205_v15 = vadd.f32 %v1197_v18, %v1172_v32  ;;  %v1260_v23 = vmul.f32 %v1252_v47, %v1252_v47  ;;  %v1231_v36 = vmul.f32 %v3292_v62, %v1219_v16  ;;  %v1299_v52 = vmul.f32 0.5, %v1251_v2 }
 0x484   : > { %v1267_v60 = vmul.f32 %v1259_v42, %v1251_v2 }
 0x485   : > { %v1238_v56 = vadd.f32 %v1230_v28, %v1205_v15  ;;  %v1268_v40 = vmul.f32 %v1260_v23, %v1252_v47  ;;  %v1239_v53 = vadd.f32 %v1231_v36, %v1206_v14 }
 0x486   : > { %v1275_v48 = vmul.f32 0.044715, %v1267_v60 }
 0x487   : > { %v1253_v57 = vadd.f32 %v3376_v31, %v1238_v56  ;;  %v1276_v41 = vmul.f32 0.044715, %v1268_v40  ;;  %v1254_v38 = vadd.f32 %v3376_v31, %v1239_v53  ;;  %v1300_v31 = vmul.f32 0.5, %v1252_v47 }
 0x488   : > { %v1283_v21 = vadd.f32 %v1275_v48, %v1251_v2 }
 0x489   : > { %v1261_v39 = vmul.f32 %v1253_v57, %v1253_v57  ;;  %v1284_v17 = vadd.f32 %v1276_v41, %v1252_v47  ;;  %v1262_v58 = vmul.f32 %v1254_v38, %v1254_v38  ;;  %v1301_v30 = vmul.f32 0.5, %v1253_v57 }
 0x48a   : > { %v1291_v19 = vmul.f32 0.7978846, %v1283_v21  ;;  %v1302_v59 = vmul.f32 0.5, %v1254_v38 }
 0x48b   : > { %v1269_v27 = vmul.f32 %v1261_v39, %v1253_v57  ;;  %v1292_v8 = vmul.f32 0.7978846, %v1284_v17  ;;  %v1270_v63 = vmul.f32 %v1262_v58, %v1254_v38 }
 0x48c   : > { %2001 = vtanh.f32 %v1291_v19 }
 0x48d   : > { %v1277_v50 = vmul.f32 0.044715, %v1269_v27  ;;  %2003 = vtanh.f32 %v1292_v8  ;;  %v1278_v62 = vmul.f32 0.044715, %v1270_v63 }
 0x48f   : > { %v1285_v49 = vadd.f32 %v1277_v50, %v1253_v57  ;;  %v1286_v51 = vadd.f32 %v1278_v62, %v1254_v38 }
 0x491   : > { %v1293_v37 = vmul.f32 0.7978846, %v1285_v49  ;;  %v1294_v45 = vmul.f32 0.7978846, %v1286_v51 }
 0x493   : > { %2005 = vtanh.f32 %v1293_v37 }
 0x494   : > { %2007 = vtanh.f32 %v1294_v45 }
 0x496   : > { %v2002_v61 = vpop.eup %2001 }
 0x497   : > { %v1315_v0 = vadd.f32 1.0, %v2002_v61  ;;  %v2004_v11 = vpop.eup %2003 }
 0x498   : > { %v1316_v33 = vadd.f32 1.0, %v2004_v11 }
 0x499   : > { %v1323_v55 = vmul.f32 %v1315_v0, %v1299_v52 }
 0x49a   : > { %v1324_v26 = vmul.f32 %v1316_v33, %v1300_v31 }
 0x49c   : > { %v1329_v54 = vpack.c.bf16 %v1324_v26, %v1323_v55 }
 0x49d   : > { %v2006_v35 = vpop.eup %2005 }
 0x49e   : > { %v2008_v9 = vpop.eup %2007  ;;  %v1317_v6 = vadd.f32 1.0, %v2006_v35  ;;  %1770 = vmatprep.mubr.msk.bf16.mxu1 %vm672_vm2, %v1329_v54 }
 0x49f   : > { %v1318_v1 = vadd.f32 1.0, %v2008_v9 }
 0x4a0   : > { %v1325_v25 = vmul.f32 %v1317_v6, %v1301_v30 }
 0x4a1   : > { %v1326_v12 = vmul.f32 %v1318_v1, %v1302_v59 }
 0x4a3   : > { %v1330_v5 = vpack.c.bf16 %v1326_v12, %v1325_v25 }
 0x4a5   : > { %1771 = vmatmul.mubr.msk.bf16.vlgmr.msra.gmra.mrb[0].mxu1 %vm672_vm2, %v1330_v5 }
 0x553   : > { %v1768_v43 = vpop.f32.mrb[0].mxu0 }
 0x554   : > { %v1409_v29 = vadd.f32 %v1768_v43, %v1706_v44  ;;  %v1400_v7 = vpop.f32.mrb[1].mxu0 }
 0x555   : > { %v1401_v32 = vadd.f32 %v1706_v44, %v1400_v7  ;;  %v1769_v4 = vpop.f32.mrb[2].mxu0 }
 0x556   : > { %1433 = vst.msk [vmem:[%s3059_s23 + $0x10] sm:$0xff] %vm590_vm1, %v1409_v29  ;;  %v1412_v24 = vadd.f32 %v1769_v4, %v1706_v44  ;;  %v1403_v20 = vpop.f32.mrb[3].mxu0 }
 0x557   : > { %1431 = vst.msk [vmem:[%s3059_s23] sm:$0xff] %vm590_vm1, %v1401_v32  ;;  %v1404_v46 = vadd.f32 %v1706_v44, %v1403_v20 }
 0x558   : > { %1434 = vst.msk [vmem:[%s3059_s23 + $0x18] sm:$0xff] %vm590_vm1, %v1412_v24 }
 0x559   : > { %1432 = vst.msk [vmem:[%s3059_s23 + $0x8] sm:$0xff] %vm590_vm1, %v1404_v46 }
 0x578   : > { %v1772_v22 = vpop.f32.mrb[0].mxu1 }
 0x579   : > { %v1425_v2 = vadd.f32 %v1772_v22, %v1706_v44  ;;  %v1416_v34 = vpop.f32.mrb[1].mxu1 }
 0x57a   : > { %v1417_v10 = vadd.f32 %v1706_v44, %v1416_v34  ;;  %v1773_v18 = vpop.f32.mrb[2].mxu1 }
 0x57b   : > { %1437 = vst.msk [vmem:[%s3059_s23 + $0x30] sm:$0xff] %vm590_vm1, %v1425_v2  ;;  %v1428_v3 = vadd.f32 %v1773_v18, %v1706_v44  ;;  %v1419_v13 = vpop.f32.mrb[3].mxu1 }
 0x57c   : > { %1435 = vst.msk [vmem:[%s3059_s23 + $0x20] sm:$0xff] %vm590_vm1, %v1417_v10  ;;  %v1420_v47 = vadd.f32 %v1706_v44, %v1419_v13 }
 0x57d   : > { %1438 = vst.msk [vmem:[%s3059_s23 + $0x38] sm:$0xff] %vm590_vm1, %v1428_v3 }
 0x57e   : > { %1436 = vst.msk [vmem:[%s3059_s23 + $0x28] sm:$0xff] %vm590_vm1, %v1420_v47 }
 0x57f   : > { %2280 = shalt.err (!%p2277_p0)
}
 0x580   : > { %s2281_s23 = scalar_lea.hbm %s3560_s7, 1024  ;;  %s2285_s27 = scalar_lea.hbm %s3788_s2, 8192 }
 0x581   : > { %p2282_p12 = scmp.ne.s32.totalorder %s3560_s7, %s2281_s23  ;;  %p2286_p6 = scmp.lt.u32.totalorder %s3560_s7, %s3788_s2 }
 0x582   : > { %p2287_p7 = scmp.lt.u32.totalorder %s2285_s27, %s2281_s23  ;;  %p2289_p3 = scmp.lt.u32.totalorder %s2281_s23, %s3560_s7 }
 0x583   : > { %p2283_p1 = pnand %p2282_p12, %p3789_p9 }
 0x584   : > { %p2288_p8 = por %p2287_p7, %p2286_p6 }
 0x585   : > { %p2284_p2 = pneg %p2283_p1 }
 0x586   : > { %p2290_p5 = por %p2289_p3, %p2288_p8 }
 0x588   : > { %p2291_p4 = pnand %p2290_p5, %p2284_p2 }
 0x58a   : > { %2294 = shalt.err (!%p2291_p4)
}
 0x58b   : > { %s2455_s21 = smov 128   ;;  %s2456_s24 = smov 8  }
 0x58c   : > { %1812 = dma.vmem_to_hbm [thread:$0]  (%p3789_p9), %s3562_s0, 1024, %s3560_s7, %s1440_s30, %s2455_s21, %s2455_s21, %s2456_s24  }
 0x58d PF: > { %p1860_p10 = scmp.ge.s32.totalorder %s2433_s22, 2  ;;  %s1470_s28 = sand.u32 1, %s2405_s15  }
 0x58e   : > { %p3790_p11 = scmp.ne.s32.totalorder %s3734_s19, 0  ;;  %s1471_s1 = scalar_lea.sflag [#allocation5], %s1470_s28 }
 0x590   : > { %p1844_p13 = pnand %p1860_p10, %p3790_p11 }
 0x592   : > { %2376 = dma.done.wait (!%p1844_p13), %s1471_s1, 1024  }
 0x593   : > { %2378 = vsyncadd (!%p1844_p13), %s1471_s1, 4294966272  ;;  %s31_s22 = sadd.s32 1, %s2433_s22   ;;  %s3792_s30 = sld [smem:[#allocation27_spill]] }
 0x594   : > { %p3599_p0 = scmp.ge.s32.totalorder %s31_s22, 10   ;;  %s3793_s18 = sld [smem:[#allocation28_spill]] }
 0x595   : > { %s3794_s12 = sld [smem:[#allocation29_spill]]  ;;  %s3795_s19 = sld [smem:[#allocation32_spill]] }
 0x596   : > { %s3796_s4 = sld [smem:[#allocation33_spill]]  ;;  %s3797_s20 = sld [smem:[#allocation35_spill]] }
 0x597   : > { %s3798_s21 = sld [smem:[#allocation36_spill]]  ;;  %s3801_s11 = smov %s3824_s26 }
 0x598   : > { %s3802_s13 = smov %s2401_s14  ;;  %s3803_s14 = smov %s2713_s25 }
 0x599   : > { %s3804_s15 = smov %s2409_s16  ;;  %s3805_s16 = smov %s2413_s17 }
 0x59a   : > { %s3800_s10 = smov %s3793_s18  ;;  %s3806_s17 = smov %s2830_s5 }
 0x59b   : > { %s3807_s18 = smov %s3795_s19  ;;  %30 = sbr.rel (!%p3599_p0) target bundleno = 26 (0x1a), region = 165 }
 0x59c   : > { %s3808_s19 = smov %s3796_s4 }
 0x5a2   :  { %1476 = vsyncpa [#allocation4], 1 }
 0x5a3   :  { %1478 = vsyncpa [#allocation4 + $0x1], 1 }
 0x5a4   :  { %1479 = vsyncpa [#allocation7], 1 }
 0x5a5   :  { %1481 = vsyncpa [#allocation7 + $0x1], 1 }
 0x5a6   :  { %1482 = vsyncpa [#allocation10], 1 }
 0x5a7   :  { %1483 = vsyncpa [#allocation13], 1 }
 0x5a8   :  { %1484 = vsyncpa [#allocation16], 1 }
 0x5a9   :  { %1485 = vsyncpa [#allocation5], 1 }
 0x5aa   :  { %1487 = vsyncpa [#allocation5 + $0x1], 1 }

// kernel: tpu_custom_call.1
= control target key start
LH: loop header
LB: loop body
LE: loop exit
PB: predicated region body
PF: predicated region fallthrough
CT: control target
= control target key end

     0   :  { %s3646_s0 = inlined_call_operand.hbm [shape: f32[2,256,4], index: 0, kind: input, shape index: {}]   ;;  %s3647_s1 = inlined_call_operand.hbm [shape: f32[2,256,4], index: 1, kind: input, shape index: {}]   ;;  %s3648_s2 = inlined_call_operand.hbm [shape: f32[2,256,4], index: 2, kind: input, shape index: {}]   ;;  %s3649_s3 = inlined_call_operand.hbm [shape: bf16[4,32], index: 3, kind: input, shape index: {}]   ;;  %s3650_s4 = inlined_call_operand.hbm [shape: f32[1,32], index: 4, kind: input, shape index: {}]   ;;  %s3651_s5 = inlined_call_operand.hbm [shape: f32[9,32], index: 5, kind: input, shape index: {}]   ;;  %s3652_s6 = inlined_call_operand.hbm [shape: f32[1,32], index: 6, kind: input, shape index: {}]   ;;  %s3653_s7 = inlined_call_operand.hbm [shape: bf16[32,4], index: 7, kind: input, shape index: {}]   ;;  %s3654_s8 = inlined_call_operand.hbm [shape: f32[1,4], index: 8, kind: input, shape index: {}]   ;;  %s3655_s9 = inlined_call_operand.hbm [shape: f32[2,256,4], index: 9, kind: output, shape index: {}]  }
   0x1   :  { %3686 = sst [smem:[#allocation40_spill]] %s3646_s0 }
   0x2   :  { %3687 = sst [smem:[#allocation41_spill]] %s3647_s1 }
   0x3   :  { %3688 = sst [smem:[#allocation42_spill]] %s3648_s2 }
   0x4   :  { %3689 = sst [smem:[#allocation43_spill]] %s3649_s3 }
   0x5   :  { %3690 = sst [smem:[#allocation44_spill]] %s3650_s4 }
   0x6   :  { %3691 = sst [smem:[#allocation45_spill]] %s3651_s5 }
   0x7   :  { %3692 = sst [smem:[#allocation46_spill]] %s3652_s6 }
   0x8   :  { %3693 = sst [smem:[#allocation47_spill]] %s3653_s7 }
   0x9   :  { %3694 = sst [smem:[#allocation48_spill]] %s3654_s8 }
   0xa   :  { %3695 = sst [smem:[#allocation49_spill]] %s3655_s9 }
   0xb   :  { %14 = vsyncpa [#allocation4], 0 }
   0xc   :  { %16 = vsyncpa [#allocation4 + $0x1], 0 }
   0xd   :  { %17 = vsyncpa [#allocation7], 0 }
   0xe   :  { %19 = vsyncpa [#allocation7 + $0x1], 0 }
   0xf   :  { %20 = vsyncpa [#allocation10], 0 }
  0x10   :  { %21 = vsyncpa [#allocation13], 0 }
  0x11   :  { %22 = vsyncpa [#allocation16], 0 }
  0x12   :  { %23 = vsyncpa [#allocation5], 0 }
  0x13   :  { %25 = vsyncpa [#allocation5 + $0x1], 0  ;;  %s2507_s30 = smov 0   ;;  %s2509_s10 = smov 0  }
  0x14   :  { %s2511_s11 = smov 0   ;;  %s2513_s12 = smov 0  }
  0x15   :  { %s2515_s13 = smov 0   ;;  %s2517_s14 = smov 0  }
  0x16   :  { %s2519_s15 = smov 0   ;;  %s2521_s16 = smov 0  }
  0x17   :  { %s2523_s17 = smov 0   ;;  %s2525_s18 = smov 0  }
  0x18   :  { %s2527_s19 = smov 0   ;;  %s2529_s20 = smov 0  }
  0x19   :  { %s2531_s21 = smov 0   ;;  %s2533_s22 = smov 0  }
  0x1a LB: > { %3696 = sst [smem:[#allocation26_spill]] %s2381_s30  ;;  %s2578_s23 = sadd.s32 4294967295, %s2433_s22   ;;  %s2433_s22 = sphi %s2533_s22, %s31_s22   ;;  %s2429_s21 = sphi %s2531_s21, %s3798_s21   ;;  %s2425_s20 = sphi %s2529_s20, %s3797_s20   ;;  %s2421_s19 = sphi %s2527_s19, %s3808_s19   ;;  %s2417_s18 = sphi %s2525_s18, %s3807_s18   ;;  %s2413_s17 = sphi %s2523_s17, %s3806_s17   ;;  %s2409_s16 = sphi %s2521_s16, %s3805_s16   ;;  %s2405_s15 = sphi %s2519_s15, %s3804_s15   ;;  %s2401_s14 = sphi %s2517_s14, %s3803_s14   ;;  %s2397_s13 = sphi %s2515_s13, %s3802_s13   ;;  %s2393_s12 = sphi %s2513_s12, %s3794_s12   ;;  %s2389_s11 = sphi %s2511_s11, %s3801_s11   ;;  %s2385_s10 = sphi %s2509_s10, %s3800_s10   ;;  %s2381_s30 = sphi %s2507_s30, %s3792_s30  }
  0x1b   : > { %3697 = sst [smem:[#allocation27_spill]] %s2385_s10  ;;  %p1659_p0 = scmp.ge.s32.totalorder %s2433_s22, 1 }
  0x1c   : > { %3698 = sst [smem:[#allocation28_spill]] %s2389_s11  ;;  %p3660_p1 = scmp.eq.s32.totalorder %s2578_s23, 0 }
  0x1d   : > { %3699 = sst [smem:[#allocation29_spill]] %s2397_s13  ;;  %p302_p2 = scmp.lt.s32.totalorder %s2433_s22, 9 }
  0x1e   : > { %3700 = sst [smem:[#allocation30_spill]] %s2417_s18  ;;  %s2435_s25 = smov [#allocation9]  }
  0x1f   : > { %3701 = sst [smem:[#allocation31_spill]] %s2421_s19  ;;  %p2583_p3 = pnand %p1659_p0, %p302_p2 }
  0x20   : > { %3702 = sst [smem:[#allocation32_spill]] %s2425_s20  ;;  %s315_s26 = sshll.u32 %s2435_s25, 4  ;;  %s316_s26 = int_to_ptr.vmem [resolvable:$true] %s315_s26 }
  0x21   : > { %3703 = sst [smem:[#allocation33_spill]] %s2429_s21  ;;  %p1814_p4 = pneg %p2583_p3 }
  0x22   : > { %s3704_s24 = scalar_select %p2583_p3, 1, 0 }
  0x23   : > { %s2436_s27 = smov [#allocation12]   ;;  %p2591_p5 = pnand %p1814_p4, %p3660_p1 }
  0x24   : > { %3705 = sst [smem:[#allocation34_spill]] %s3704_s24  ;;  %s336_s28 = sshll.u32 %s2436_s27, 4  ;;  %s2595_s28 = int_to_ptr.vmem [resolvable:$true] %s336_s28 }
  0x25   : > { %s3706_s29 = scalar_select %p2591_p5, 1, 0 }
  0x26   : > { %s2437_s9 = smov [#allocation15]   ;;  %s3707_s3 = sld [smem:[#allocation43_spill]] }
  0x27   : > { %s2597_s19 = sshll.u32 %s2437_s9, 4  ;;  %p2607_p7 = pneg %p2591_p5  ;;  %s361_s19 = int_to_ptr.vmem [resolvable:$true] %s2597_s19 }
  0x2c   : > { %s2009_s25 = scalar_lea.hbm %s3707_s3, 32 }
  0x2d   : > { %p2010_p6 = scmp.ne.s32.totalorder %s3707_s3, %s2009_s25  ;;  %p2016_p10 = scmp.lt.u32.totalorder %s2009_s25, %s3707_s3 }
  0x2f   : > { %p2012_p8 = pnand %p2607_p7, %p2010_p6 }
  0x31   : > { %p2013_p9 = pneg %p2012_p8 }
  0x33   : > { %p2018_p11 = pnand %p2016_p10, %p2013_p9 }
  0x35   : > { %2021 = shalt.err (!%p2018_p11)
}
  0x36   : > { %s2022_s2 = scalar_lea.vmem %s316_s26, 32  ;;  %p2030_p2 = scmp.lt.s32.totalorder %s316_s26, %s316_s26 }
  0x37   : > { %p2023_p12 = scmp.ne.s32.totalorder %s316_s26, %s2022_s2  ;;  %p2031_p4 = scmp.lt.s32.totalorder %s2022_s2, %s2022_s2 }
  0x39   : > { %p2025_p13 = pnand %p2023_p12, %p2607_p7  ;;  %p2032_p1 = por %p2031_p4, %p2030_p2 }
  0x3b   : > { %p2026_p0 = pneg %p2025_p13 }
  0x3d   : > { %p2033_p3 = pnand %p2032_p1, %p2026_p0 }
  0x3f   : > { %2036 = shalt.err (!%p2033_p3)
}
  0x40   : > { %1817 = dma.hbm_to_vmem [thread:$0]  (!%p2591_p5), %s3707_s3, 32, %s316_s26, [#allocation10]  }
  0x41   : > { %s3709_s5 = sld [smem:[#allocation45_spill]] }
  0x47   : > { %s2037_s25 = scalar_lea.hbm %s3709_s5, 256 }
  0x48   : > { %p2038_p6 = scmp.ne.s32.totalorder %s3709_s5, %s2037_s25  ;;  %p2044_p1 = scmp.lt.u32.totalorder %s2037_s25, %s3709_s5 }
  0x4a   : > { %p2040_p8 = pnand %p2038_p6, %p2607_p7 }
  0x4c   : > { %p2041_p9 = pneg %p2040_p8 }
  0x4e   : > { %p2046_p3 = pnand %p2044_p1, %p2041_p9 }
  0x50   : > { %2049 = shalt.err (!%p2046_p3)
}
  0x51   : > { %s2050_s26 = scalar_lea.vmem %s2595_s28, 256  ;;  %p2058_p13 = scmp.lt.s32.totalorder %s2595_s28, %s2595_s28 }
  0x52   : > { %p2051_p10 = scmp.ne.s32.totalorder %s2595_s28, %s2050_s26  ;;  %p2059_p0 = scmp.lt.s32.totalorder %s2050_s26, %s2050_s26 }
  0x54   : > { %p2053_p11 = pnand %p2051_p10, %p2607_p7  ;;  %p2060_p2 = por %p2059_p0, %p2058_p13 }
  0x56   : > { %p2054_p12 = pneg %p2053_p11 }
  0x58   : > { %p2061_p4 = pnand %p2060_p2, %p2054_p12 }
  0x5a   : > { %2064 = shalt.err (!%p2061_p4)
}
  0x5b   : > { %s3664_s11 = smov 128   ;;  %s3666_s0 = smov 8  }
  0x5c   : > { %1823 = dma.hbm_to_vmem [thread:$0]  (!%p2591_p5), %s3709_s5, 256, %s2595_s28, [#allocation13], %s3664_s11, %s3664_s11, %s3666_s0  }
  0x5d   : > { %s3710_s7 = sld [smem:[#allocation47_spill]] }
  0x63   : > { %s2065_s25 = scalar_lea.hbm %s3710_s7, 256 }
  0x64   : > { %p2066_p6 = scmp.ne.s32.totalorder %s3710_s7, %s2065_s25  ;;  %p2072_p1 = scmp.lt.u32.totalorder %s2065_s25, %s3710_s7 }
  0x66   : > { %p2068_p8 = pnand %p2066_p6, %p2607_p7 }
  0x68   : > { %p2069_p9 = pneg %p2068_p8 }
  0x6a   : > { %p2074_p3 = pnand %p2072_p1, %p2069_p9 }
  0x6c   : > { %2077 = shalt.err (!%p2074_p3)
}
  0x6d   : > { %s2078_s30 = scalar_lea.vmem %s361_s19, 256  ;;  %p2086_p13 = scmp.lt.s32.totalorder %s361_s19, %s361_s19 }
  0x6e   : > { %p2079_p10 = scmp.ne.s32.totalorder %s361_s19, %s2078_s30  ;;  %p2087_p0 = scmp.lt.s32.totalorder %s2078_s30, %s2078_s30 }
  0x70   : > { %p2081_p11 = pnand %p2079_p10, %p2607_p7  ;;  %p2088_p2 = por %p2087_p0, %p2086_p13 }
  0x72   : > { %p2082_p12 = pneg %p2081_p11 }
  0x74   : > { %p2089_p4 = pnand %p2088_p2, %p2082_p12 }
  0x76   : > { %2092 = shalt.err (!%p2089_p4)
}
  0x77   : > { %s2440_s28 = smov 64   ;;  %s2441_s3 = smov 4  }
  0x78   : > { %1829 = dma.hbm_to_vmem [thread:$0]  (!%p2591_p5), %s3710_s7, 256, %s361_s19, [#allocation16], %s2440_s28, %s2440_s28, %s2441_s3  }
  0x79   : > { %s40_s24 = sadd.s32 1, %s2425_s20  ;;  %s43_s25 = sadd.s32 1, %s2429_s21 }
  0x7a   : > { %p41_p6 = scmp.ge.s32.totalorder %s40_s24, 4  ;;  %p3678_p8 = scmp.eq.s32.totalorder %s2433_s22, 0 }
  0x7b   : > { %s1653_s9 = sshll.u32 %s2425_s20, 2  ;;  %s88_s30 = sadd.s32 1, %s2401_s14 }
  0x7c   : > { %s3810_s24 = smov (%p41_p6, %s40_s24), 0  ;;  %s3812_s25 = smov (!%p41_p6, %s43_s25), %s2429_s21 }
  0x7d   : > { %3711 = sst [smem:[#allocation35_spill]] %s3810_s24  ;;  %s48_s2 = ssub.s32 %s2425_s20, %s3810_s24 }
  0x7e   : > { %s1654_s26 = sadd.s32 4294967295, %s1653_s9  ;;  %p45_p9 = scmp.ge.s32.totalorder %s3812_s25, 2 }
  0x7f   : > { %p77_p1 = scmp.gt.s32.totalorder %s1654_s26, 0  ;;  %s1655_s19 = sshll.u32 %s3810_s24, 2 }
  0x80   : > { %s3814_s25 = smov (%p45_p9, %s3812_s25), 0  ;;  %s1656_s3 = sadd.s32 4294967295, %s1655_s19 }
  0x81   : > { %3712 = sst [smem:[#allocation36_spill]] %s3814_s25  ;;  %s3816_s26 = smov (!%p77_p1, %s1654_s26), 0 }
  0x82   : > { %s2683_s28 = ssub.s32 %s2429_s21, %s3814_s25  ;;  %p81_p3 = scmp.gt.s32.totalorder %s1656_s3, 0 }
  0x83   : > { %3713 = sst [smem:[#allocation37_spill]] %s2683_s28  ;;  %s2686_s18 = sor.u32 %s48_s2, %s2683_s28 }
  0x84   : > { %p95_p11 = scmp.ne.s32.totalorder %s2401_s14, %s2397_s13  ;;  %s3818_s3 = smov (!%p81_p3, %s1656_s3), 0 }
  0x85   : > { %p101_p13 = scmp.ne.s32.totalorder %s2397_s13, %s2393_s12  ;;  %s84_s11 = ssub.s32 %s3816_s26, %s3818_s3 }
  0x86   : > { %p2693_p12 = por %p95_p11, %p3678_p8  ;;  %s2699_s0 = sadd.s32 4, %s1653_s9 }
  0x87   : > { %3715 = sst [smem:[#allocation38_spill]] %s2699_s0  ;;  %s85_s2 = sor.u32 %s84_s11, %s2683_s28 }
  0x88   : > { %p3716_p0 = scmp.eq.s32.totalorder %s2578_s23, 0  ;;  %p86_p4 = scmp.eq.s32.totalorder %s85_s2, 0 }
  0x89   : > { %s2709_s7 = sadd.s32 4, %s1655_s19  ;;  %p3677_p9 = scmp.lt.s32.totalorder %s2433_s22, 8 }
  0x8a   : > { %p2704_p2 = por %p101_p13, %p3716_p0  ;;  %s2717_s12 = sshll.u32 %s2429_s21, 5 }
  0x8b   : > { %s2713_s25 = scalar_select %p86_p4, %s2401_s14, %s88_s30  }
  0x8c   : > { %s3717_s5 = scalar_select %p2704_p2, 1, 0 }
  0x8d   : > { %s408_s11 = sand.u32 1, %s2433_s22   ;;  %s410_s9 = sand.u32 1, %s2401_s14  }
  0x8e   : > { %3718 = sst [smem:[#allocation39_spill]] %s3717_s5  ;;  %s1671_s3 = sshll.u32 %s410_s9, 4 }
  0x8f   : > { %s1674_s24 = sshll.u32 %s3816_s26, 1  ;;  %s412_s5 = scalar_lea.vmem [#allocation6], %s1671_s3 }
  0x90   : > { %s422_s13 = sadd.s32 %s1674_s24, %s2717_s12  ;;  %s425_s2 = sshll.u32 %s412_s5, 4  ;;  %s2722_s2 = int_to_ptr.vmem [resolvable:$true] %s425_s2 }
  0x91   : > { %s1676_s28 = sshll.u32 %s422_s13, 7  ;;  %s3719_s1 = sld [smem:[#allocation41_spill]] }
  0x92   : > { %p2733_p3 = pnand %p3677_p9, %p2693_p12  ;;  %s2442_s5 = smov [#allocation11]  }
  0x93   : > { %s2737_s13 = sshll.u32 %s2442_s5, 4  ;;  %s2739_s24 = scalar_lea.sflag [#allocation7], %s408_s11  ;;  %s327_s13 = int_to_ptr.vmem [resolvable:$true] %s2737_s13 }
  0x94   : > { %p2095_p13 = pneg %p2733_p3 }
  0x97   : > { %s2727_s20 = scalar_lea.hbm %s3719_s1, %s1676_s28  ;;  %s2098_s10 = scalar_lea.hbm %s3719_s1, 8192 }
  0x98   : > { %s2093_s0 = scalar_lea.hbm %s2727_s20, 256  ;;  %p2099_p12 = scmp.lt.u32.totalorder %s2727_s20, %s3719_s1 }
  0x99   : > { %p2094_p11 = scmp.ne.s32.totalorder %s2727_s20, %s2093_s0  ;;  %p2100_p1 = scmp.lt.u32.totalorder %s2098_s10, %s2093_s0 }
  0x9a   : > { %p2102_p9 = scmp.lt.u32.totalorder %s2093_s0, %s2727_s20 }
  0x9b   : > { %p2096_p0 = pnand %p2095_p13, %p2094_p11  ;;  %p2101_p6 = por %p2100_p1, %p2099_p12 }
  0x9d   : > { %p2097_p4 = pneg %p2096_p0  ;;  %p2103_p8 = por %p2102_p9, %p2101_p6 }
  0x9f   : > { %p2104_p10 = pnand %p2103_p8, %p2097_p4 }
  0xa1   : > { %2107 = shalt.err (!%p2104_p10)
}
  0xa2   : > { %s2108_s11 = scalar_lea.vmem %s2722_s2, 256  ;;  %s2443_s19 = smov [#allocation6]  }
  0xa3   : > { %p2109_p11 = scmp.ne.s32.totalorder %s2722_s2, %s2108_s11  ;;  %s2113_s5 = sshll.u32 %s2443_s19, 4  ;;  %s2114_s5 = int_to_ptr.vmem [resolvable:$false] %s2113_s5 }
  0xa4   : > { %s2115_s26 = scalar_lea.vmem %s2114_s5, 512  ;;  %p2116_p5 = scmp.lt.s32.totalorder %s2722_s2, %s2114_s5 }
  0xa5   : > { %p2111_p0 = pnand %p2109_p11, %p2095_p13  ;;  %p2117_p1 = scmp.lt.s32.totalorder %s2115_s26, %s2108_s11 }
  0xa7   : > { %p2112_p2 = pneg %p2111_p0  ;;  %p2118_p12 = por %p2117_p1, %p2116_p5 }
  0xa9   : > { %p2119_p6 = pnand %p2118_p12, %p2112_p2 }
  0xab   : > { %2122 = shalt.err (!%p2119_p6)
}
  0xac   : > { %s3721_s0 = smov 8   ;;  %s3722_s28 = smov 128  }
  0xad   : > { %1839 = dma.hbm_to_vmem [thread:$0]  (!%p2733_p3), %s2727_s20, 256, %s2722_s2, %s2739_s24, %s3722_s28, %s3722_s28, %s3721_s0  }
  0xae   : > { %s2444_s10 = smov [#allocation14]   ;;  %s3723_s4 = sld [smem:[#allocation44_spill]] }
  0xaf   : > { %s350_s9 = sshll.u32 %s2444_s10, 4  ;;  %s351_s9 = int_to_ptr.vmem [resolvable:$true] %s350_s9 }
  0xb4   : > { %s2123_s11 = scalar_lea.hbm %s3723_s4, 16 }
  0xb5   : > { %p2124_p5 = scmp.ne.s32.totalorder %s3723_s4, %s2123_s11  ;;  %p2130_p2 = scmp.lt.u32.totalorder %s2123_s11, %s3723_s4 }
  0xb7   : > { %p2126_p8 = pnand %p2124_p5, %p2607_p7 }
  0xb9   : > { %p2127_p10 = pneg %p2126_p8 }
  0xbb   : > { %p2132_p9 = pnand %p2130_p2, %p2127_p10 }
  0xbd   : > { %2135 = shalt.err (!%p2132_p9)
}
  0xbe   : > { %s2136_s20 = scalar_lea.vmem %s327_s13, 16  ;;  %s2143_s2 = scalar_lea.vmem %s327_s13, 32 }
  0xbf   : > { %p2137_p3 = scmp.ne.s32.totalorder %s327_s13, %s2136_s20  ;;  %p2144_p11 = scmp.lt.s32.totalorder %s327_s13, %s327_s13 }
  0xc0   : > { %p2145_p0 = scmp.lt.s32.totalorder %s2143_s2, %s2136_s20 }
  0xc1   : > { %p2139_p13 = pnand %p2137_p3, %p2607_p7 }
  0xc2   : > { %p2146_p1 = por %p2145_p0, %p2144_p11 }
  0xc3   : > { %p2140_p4 = pneg %p2139_p13 }
  0xc5   : > { %p2147_p12 = pnand %p2146_p1, %p2140_p4 }
  0xc7   : > { %2150 = shalt.err (!%p2147_p12)
}
  0xc8   : > { %p3724_p6 = scmp.ne.s32.totalorder %s3706_s29, 0  ;;  %s3725_s6 = sld [smem:[#allocation46_spill]] }
  0xca   : > { %1820 = dma.hbm_to_vmem [thread:$0]  (!%p3724_p6), %s3723_s4, 16, %s327_s13, [#allocation10]  }
  0xce   : > { %s2151_s11 = scalar_lea.hbm %s3725_s6, 16 }
  0xcf   : > { %p2152_p5 = scmp.ne.s32.totalorder %s3725_s6, %s2151_s11  ;;  %p2158_p2 = scmp.lt.u32.totalorder %s2151_s11, %s3725_s6 }
  0xd1   : > { %p2154_p8 = pnand %p2152_p5, %p2607_p7 }
  0xd3   : > { %p2155_p10 = pneg %p2154_p8 }
  0xd5   : > { %p2160_p9 = pnand %p2158_p2, %p2155_p10 }
  0xd7   : > { %2163 = shalt.err (!%p2160_p9)
}
  0xd8   : > { %s2164_s2 = scalar_lea.vmem %s351_s9, 16  ;;  %s2171_s13 = scalar_lea.vmem %s351_s9, 32 }
  0xd9   : > { %p2165_p3 = scmp.ne.s32.totalorder %s351_s9, %s2164_s2  ;;  %p2172_p11 = scmp.lt.s32.totalorder %s351_s9, %s351_s9 }
  0xda   : > { %p2173_p0 = scmp.lt.s32.totalorder %s2171_s13, %s2164_s2 }
  0xdb   : > { %p2167_p13 = pnand %p2165_p3, %p2607_p7 }
  0xdc   : > { %p2174_p1 = por %p2173_p0, %p2172_p11 }
  0xdd   : > { %p2168_p4 = pneg %p2167_p13 }
  0xdf   : > { %p2175_p12 = pnand %p2174_p1, %p2168_p4 }
  0xe1   : > { %2178 = shalt.err (!%p2175_p12)
}
  0xe2   : > { %1826 = dma.hbm_to_vmem [thread:$0]  (!%p3724_p6), %s3725_s6, 16, %s351_s9, [#allocation13]  }
  0xe3   : > { %s2445_s1 = smov [#allocation17]   ;;  %s3726_s8 = sld [smem:[#allocation48_spill]] }
  0xe4   : > { %s374_s19 = sshll.u32 %s2445_s1, 4  ;;  %s375_s19 = int_to_ptr.vmem [resolvable:$true] %s374_s19 }
  0xe9   : > { %s2179_s26 = scalar_lea.hbm %s3726_s8, 16 }
  0xea   : > { %p2180_p5 = scmp.ne.s32.totalorder %s3726_s8, %s2179_s26  ;;  %p2186_p2 = scmp.lt.u32.totalorder %s2179_s26, %s3726_s8 }
  0xec   : > { %p2182_p8 = pnand %p2180_p5, %p2607_p7 }
  0xee   : > { %p2183_p10 = pneg %p2182_p8 }
  0xf0   : > { %p2188_p9 = pnand %p2186_p2, %p2183_p10 }
  0xf2   : > { %2191 = shalt.err (!%p2188_p9)
}
  0xf3   : > { %s2192_s9 = scalar_lea.vmem %s375_s19, 16  ;;  %s2199_s10 = scalar_lea.vmem %s375_s19, 32 }
  0xf4   : > { %p2193_p3 = scmp.ne.s32.totalorder %s375_s19, %s2192_s9  ;;  %p2200_p11 = scmp.lt.s32.totalorder %s375_s19, %s375_s19 }
  0xf5   : > { %p2201_p0 = scmp.lt.s32.totalorder %s2199_s10, %s2192_s9 }
  0xf6   : > { %p2195_p13 = pnand %p2193_p3, %p2607_p7 }
  0xf7   : > { %p2202_p1 = por %p2201_p0, %p2200_p11 }
  0xf8   : > { %p2196_p4 = pneg %p2195_p13 }
  0xfa   : > { %p2203_p12 = pnand %p2202_p1, %p2196_p4 }
  0xfc   : > { %2206 = shalt.err (!%p2203_p12)
}
  0xfd   : > { %s3727_s27 = sld [smem:[#allocation32_spill]]  ;;  %s1652_s11 = sadd.s32 4294967294, %s2433_s22  }
  0xfe   : > { %1832 = dma.hbm_to_vmem [thread:$0]  (!%p3724_p6), %s3726_s8, 16, %s375_s19, [#allocation16]  }
  0xff   : > { %s52_s29 = sadd.s32 1, %s2413_s17  ;;  %p3728_p7 = scmp.eq.s32.totalorder %s2686_s18, 0 }
 0x100   : > { %p59_p5 = scmp.ne.s32.totalorder %s2413_s17, %s2409_s16  ;;  %p65_p8 = scmp.ne.s32.totalorder %s2409_s16, %s2405_s15 }
 0x101   : > { %s2830_s5 = scalar_select %p3728_p7, %s2413_s17, %s52_s29  }
 0x102   : > { %p289_p10 = scmp.eq.s32.totalorder %s2578_s23, 7  ;;  %p295_p2 = scmp.eq.s32.totalorder %s1652_s11, 7 }
 0x103   : > { %p3729_p9 = scmp.eq.s32.totalorder %s2433_s22, 0  ;;  %p3731_p13 = scmp.eq.s32.totalorder %s2578_s23, 0 }
 0x104   : > { %p2849_p6 = por %p289_p10, %p59_p5  ;;  %p2853_p11 = por %p295_p2, %p65_p8 }
 0x105   : > { %p2839_p3 = por %p3729_p9, %p59_p5  ;;  %p2845_p4 = por %p3731_p13, %p65_p8 }
 0x106   : > { %s3733_s18 = scalar_select %p2849_p6, 1, 0 }
 0x107   : > { %s3734_s19 = scalar_select %p2853_p11, 1, 0 }
 0x108   : > { %s385_s20 = sand.u32 1, %s2413_s17   ;;  %s1668_s2 = sshll.u32 %s3727_s27, 3 }
 0x109   : > { %s1667_s13 = sshll.u32 %s385_s20, 6  ;;  %s395_s9 = sadd.s32 %s2717_s12, %s1668_s2 }
 0x10a   : > { %s1670_s10 = sshll.u32 %s395_s9, 7  ;;  %s389_s3 = scalar_lea.vmem [#allocation3], %s1667_s13 }
 0x10b   : > { %s398_s1 = sshll.u32 %s389_s3, 4  ;;  %s3735_s4 = sld [smem:[#allocation40_spill]]  ;;  %s2865_s1 = int_to_ptr.vmem [resolvable:$true] %s398_s1 }
 0x10c   : > { %p3736_p0 = scmp.lt.s32.totalorder %s2433_s22, 8  ;;  %s2875_s2 = scalar_lea.sflag [#allocation4], %s385_s20 }
 0x10e   : > { %p2871_p1 = pnand %p3736_p0, %p2839_p3 }
 0x110   : > { %p2209_p7 = pneg %p2871_p1 }
 0x111   : > { %s2863_s6 = scalar_lea.hbm %s3735_s4, %s1670_s10  ;;  %s2212_s26 = scalar_lea.hbm %s3735_s4, 8192 }
 0x112   : > { %s2207_s13 = scalar_lea.hbm %s2863_s6, 1024  ;;  %p2213_p10 = scmp.lt.u32.totalorder %s2863_s6, %s3735_s4 }
 0x113   : > { %p2208_p12 = scmp.ne.s32.totalorder %s2863_s6, %s2207_s13  ;;  %p2214_p2 = scmp.lt.u32.totalorder %s2212_s26, %s2207_s13 }
 0x114   : > { %p2216_p3 = scmp.lt.u32.totalorder %s2207_s13, %s2863_s6 }
 0x115   : > { %p2210_p5 = pnand %p2209_p7, %p2208_p12  ;;  %p2215_p9 = por %p2214_p2, %p2213_p10 }
 0x117   : > { %p2211_p8 = pneg %p2210_p5  ;;  %p2217_p13 = por %p2216_p3, %p2215_p9 }
 0x119   : > { %p2218_p0 = pnand %p2217_p13, %p2211_p8 }
 0x11b   : > { %2221 = shalt.err (!%p2218_p0)
}
 0x11c   : > { %s2222_s20 = scalar_lea.vmem %s2865_s1, 1024  ;;  %s2446_s29 = smov [#allocation3]  }
 0x11d   : > { %p2223_p12 = scmp.ne.s32.totalorder %s2865_s1, %s2222_s20  ;;  %s2227_s9 = sshll.u32 %s2446_s29, 4  ;;  %s2228_s9 = int_to_ptr.vmem [resolvable:$false] %s2227_s9 }
 0x11e   : > { %s2229_s10 = scalar_lea.vmem %s2228_s9, 2048  ;;  %p2230_p6 = scmp.lt.s32.totalorder %s2865_s1, %s2228_s9 }
 0x11f   : > { %p2225_p5 = pnand %p2223_p12, %p2209_p7  ;;  %p2231_p10 = scmp.lt.s32.totalorder %s2229_s10, %s2222_s20 }
 0x121   : > { %p2226_p11 = pneg %p2225_p5  ;;  %p2232_p2 = por %p2231_p10, %p2230_p6 }
 0x123   : > { %p2233_p9 = pnand %p2232_p2, %p2226_p11 }
 0x125   : > { %2236 = shalt.err (!%p2233_p9)
}
 0x126   : > { %s3738_s13 = sld [smem:[#allocation38_spill]]  ;;  %s3739_s26 = sld [smem:[#allocation28_spill]] }
 0x127   : > { %s3740_s3 = sld [smem:[#allocation27_spill]]  ;;  %s3741_s11 = sld [smem:[#allocation26_spill]] }
 0x128   : > { %s3742_s20 = sld [smem:[#allocation37_spill]]  ;;  %p3744_p11 = scmp.lt.s32.totalorder %s2709_s7, 15 }
 0x129   : > { %1836 = dma.hbm_to_vmem [thread:$0]  (!%p2871_p1), %s2863_s6, 1024, %s2865_s1, %s2875_s2, %s3722_s28, %s3722_s28, %s3721_s0  }
 0x12a   : > { %s3822_s7 = smov (!%p3744_p11, %s2709_s7), 15  ;;  %p3745_p3 = scmp.eq.s32.totalorder %s2433_s22, 0 }
 0x12b   : > { %p3747_p12 = scmp.eq.s32.totalorder %s2578_s23, 0  ;;  %p3750_p1 = scmp.lt.s32.totalorder %s2433_s22, 8 }
 0x12c   : > { %p3743_p6 = scmp.lt.s32.totalorder %s3738_s13, 15  ;;  %s124_s27 = sadd.s32 1, %s3739_s26 }
 0x12d   : > { %p131_p7 = scmp.ne.s32.totalorder %s3739_s26, %s3740_s3  ;;  %p137_p8 = scmp.ne.s32.totalorder %s3740_s3, %s3741_s11 }
 0x12e   : > { %s3820_s13 = smov (!%p3743_p6, %s3738_s13), 15  ;;  %s437_s1 = sand.u32 1, %s3739_s26  }
 0x12f   : > { %s120_s29 = ssub.s32 %s3820_s13, %s3822_s7  ;;  %p2920_p13 = por %p131_p7, %p3745_p3 }
 0x130   : > { %s121_s9 = sor.u32 %s120_s29, %s3742_s20  ;;  %p2926_p5 = por %p137_p8, %p3747_p12 }
 0x131   : > { %p122_p0 = scmp.eq.s32.totalorder %s121_s9, 0  ;;  %s1679_s2 = sshll.u32 %s3820_s13, 1 }
 0x132   : > { %s3748_s6 = scalar_select %p2926_p5, 1, 0 }
 0x133   : > { %s3824_s26 = smov (!%p122_p0, %s3739_s26), %s124_s27  ;;  %s1677_s7 = sshll.u32 %s437_s1, 4 }
 0x134   : > { %s449_s4 = sadd.s32 %s1679_s2, %s2717_s12  ;;  %s3749_s29 = sld [smem:[#allocation42_spill]] }
 0x135   : > { %s1681_s3 = sshll.u32 %s449_s4, 7  ;;  %s439_s9 = scalar_lea.vmem [#allocation8], %s1677_s7 }
 0x136   : > { %s452_s21 = sshll.u32 %s439_s9, 4  ;;  %p2946_p10 = pnand %p3750_p1, %p2920_p13  ;;  %s2940_s21 = int_to_ptr.vmem [resolvable:$true] %s452_s21 }
 0x138   : > { %p2239_p9 = pneg %p2946_p10 }
 0x13a   : > { %s2938_s8 = scalar_lea.hbm %s3749_s29, %s1681_s3  ;;  %s2242_s1 = scalar_lea.hbm %s3749_s29, 8192 }
 0x13b   : > { %s2237_s4 = scalar_lea.hbm %s2938_s8, 256  ;;  %p2243_p7 = scmp.lt.u32.totalorder %s2938_s8, %s3749_s29 }
 0x13c   : > { %p2238_p2 = scmp.ne.s32.totalorder %s2938_s8, %s2237_s4  ;;  %p2244_p8 = scmp.lt.u32.totalorder %s2242_s1, %s2237_s4 }
 0x13d   : > { %p2246_p13 = scmp.lt.u32.totalorder %s2237_s4, %s2938_s8 }
 0x13e   : > { %p2240_p6 = pnand %p2239_p9, %p2238_p2  ;;  %p2245_p3 = por %p2244_p8, %p2243_p7 }
 0x140   : > { %p2241_p11 = pneg %p2240_p6  ;;  %p2247_p0 = por %p2246_p13, %p2245_p3 }
 0x142   : > { %p2248_p12 = pnand %p2247_p0, %p2241_p11 }
 0x144   : > { %2251 = shalt.err (!%p2248_p12)
}
 0x145   : > { %s2252_s7 = scalar_lea.vmem %s2940_s21, 256  ;;  %s2447_s3 = smov [#allocation8]  }
 0x146   : > { %p2253_p1 = scmp.ne.s32.totalorder %s2940_s21, %s2252_s7  ;;  %s2257_s11 = sshll.u32 %s2447_s3, 4  ;;  %s2258_s11 = int_to_ptr.vmem [resolvable:$false] %s2257_s11 }
 0x147   : > { %s2259_s20 = scalar_lea.vmem %s2258_s11, 512  ;;  %p2260_p5 = scmp.lt.s32.totalorder %s2940_s21, %s2258_s11 }
 0x148   : > { %p2255_p2 = pnand %p2253_p1, %p2239_p9  ;;  %p2261_p7 = scmp.lt.s32.totalorder %s2259_s20, %s2252_s7 }
 0x14a   : > { %p2256_p6 = pneg %p2255_p2  ;;  %p2262_p8 = por %p2261_p7, %p2260_p5 }
 0x14c   : > { %p2263_p3 = pnand %p2262_p8, %p2256_p6 }
 0x14e   : > { %2266 = shalt.err (!%p2263_p3)
}
 0x14f   : > { %1842 = dma.hbm_to_vmem [thread:$0]  (!%p2946_p10), %s2938_s8, 256, %s2940_s21, %s2739_s24, %s3722_s28, %s3722_s28, %s3721_s0  }
 0x150   : > { %s3752_s9 = sld [smem:[#allocation34_spill]] }
 0x156   : > { %p3753_p9 = scmp.ne.s32.totalorder %s3752_s9, 0 }
 0x157   : > { %s2982_s4 = sand.u32 (!%p3753_p9), 1, %s2409_s16  }
 0x158   : > { %464 = sbr.rel (%p3753_p9) target bundleno = 1421 (0x58d), region = 56  ;;  %s1683_s12 = sshll.u32 (!%p3753_p9), %s2982_s4, 6 }
 0x159   : > { %s467_s27 = scalar_lea.sflag (!%p3753_p9), [#allocation4], %s2982_s4  ;;  %s2988_s13 = scalar_lea.vmem (!%p3753_p9), [#allocation3], %s1683_s12 }
 0x15f   : > { %2352 = dma.done.wait (%p2845_p4), %s467_s27, 1024  }
 0x160   : > { %2354 = vsyncadd (%p2845_p4), %s467_s27, 4294966272  ;;  %s3754_s8 = sld [smem:[#allocation29_spill]]  ;;  %s3755_s21 = sld [smem:[#allocation39_spill]] }
 0x161   : > { %s475_s24 = sand.u32 1, %s2578_s23  }
 0x162   : > { %s476_s1 = scalar_lea.sflag [#allocation7], %s475_s24 }
 0x166   : > { %s477_s0 = sand.u32 1, %s3754_s8   ;;  %p3756_p5 = scmp.ne.s32.totalorder %s3755_s21, 0 }
 0x167   : > { %s2996_s28 = sshll.u32 %s477_s0, 4 }
 0x168   : > { %s479_s10 = scalar_lea.vmem [#allocation6], %s2996_s28 }
 0x169   : > { %2356 = dma.done.wait (%p3756_p5), %s476_s1, 256  }
 0x16a   : > { %2358 = vsyncadd (%p3756_p5), %s476_s1, 4294967040  ;;  %s3757_s2 = sld [smem:[#allocation27_spill]]  ;;  %p3758_p4 = scmp.ne.s32.totalorder %s3748_s6, 0 }
 0x170   : > { %s486_s7 = sand.u32 1, %s3757_s2  }
 0x171   : > { %s3004_s30 = sshll.u32 %s486_s7, 4 }
 0x172   : > { %s488_s3 = scalar_lea.vmem [#allocation8], %s3004_s30 }
 0x173   : > { %2360 = dma.done.wait (%p3758_p4), %s476_s1, 256  }
 0x174   : > { %2362 = vsyncadd (%p3758_p4), %s476_s1, 4294967040  ;;  %p3759_p10 = scmp.eq.s32.totalorder %s2578_s23, 0 }
 0x176   : > { %2364 = dma.done.wait (%p3759_p10), [#allocation10], 48   ;;  %p3760_p11 = pmov %p3759_p10 }
 0x177   : > { %p3761_p13 = pmov %p3759_p10 }
 0x178   : > { %2366 = vsyncadd (%p3760_p11), [#allocation10], 4294967248 }
 0x179   : > { %2368 = dma.done.wait (%p3761_p13), [#allocation13], 272   ;;  %p3762_p0 = pmov %p3759_p10 }
 0x17b   : > { %2370 = vsyncadd (%p3762_p0), [#allocation13], 4294967024  ;;  %p3763_p12 = pmov %p3762_p0 }
 0x17c   : > { %p3764_p1 = pmov %p3762_p0 }
 0x17d   : > { %2372 = dma.done.wait (%p3763_p12), [#allocation16], 272  }
 0x17e   : > { %2374 = vsyncadd (%p3764_p1), [#allocation16], 4294967024  ;;  %vm603_vm0 = vcmask 1041408   ;;  %v570_v0 = vld [vmem:[#allocation9] sm:$0x3]  ;;  %v573_v2 = vld [vmem:[%s2988_s13 + $0x8] sm:$0xff] }
 0x17f   : > { %v572_v1 = vld [vmem:[%s2988_s13] sm:$0xff]  ;;  %vm590_vm1 = vcmask 31744   ;;  %1780 = vmatprep.subr.msk.bf16.mxu0 %vm603_vm0, %v570_v0  ;;  %1781 = vmatprep.subr.msk.bf16.mxu1 %vm603_vm0, %v570_v0  ;;  %v3025_v3 = vsel %vm603_vm0, %v570_v0, 0  ;;  %v577_v6 = vld [vmem:[%s2988_s13 + $0x28] sm:$0xff]  ;;  %v574_v7 = vld [vmem:[%s2988_s13 + $0x10] sm:$0xff]  ;;  %vm672_vm2 = vcmask 261120  }
 0x180   : > { %v580_v4 = vpack.c.bf16 %v573_v2, %v572_v1  ;;  %v576_v5 = vld [vmem:[%s2988_s13 + $0x20] sm:$0xff]  ;;  %1741 = vmatpush3.bf16.msra.mxu0 %v3025_v3  ;;  %1775 = vmatpush3.bf16.msra.mxu1 %v3025_v3  ;;  %v575_v9 = vld [vmem:[%s2988_s13 + $0x18] sm:$0xff]  ;;  %v578_v10 = vld [vmem:[%s2988_s13 + $0x30] sm:$0xff]  ;;  %s3059_s23 = scalar_lea.vmem [#allocation18], %s1683_s12  ;;  %s3765_s6 = sld [smem:[#allocation30_spill]] }
 0x181   : > { %v582_v8 = vpack.c.bf16 %v577_v6, %v576_v5  ;;  %v579_v11 = vld [vmem:[%s2988_s13 + $0x38] sm:$0xff]  ;;  %v581_v12 = vpack.c.bf16 %v575_v9, %v574_v7  ;;  %v3039_v14 = vld [vmem:[#allocation11] ss:$0 sm:$0xff] }
 0x182   : > { %1742 = vmatprep.mubr.msk.bf16.mxu0 %vm590_vm1, %v580_v4  ;;  %v583_v13 = vpack.c.bf16 %v579_v11, %v578_v10 }
 0x183   : > { %1746 = vmatprep.mubr.msk.bf16.mxu1 %vm590_vm1, %v582_v8  ;;  %1743 = vmatmul.mubr.msk.bf16.vlgmr.msra.gmra.mrb[0].mxu0 %vm590_vm1, %v581_v12 }
 0x184   : > { %1747 = vmatmul.mubr.msk.bf16.vlgmr.msra.gmra.mrb[0].mxu1 %vm590_vm1, %v583_v13 }
 0x186   : > { %p1698_p2 = scmp.ne.s32.totalorder %s3765_s6, 0 }
 0x187   : > { %v2448_v31 = vmov (!%p1698_p2), 0.0  }
 0x188   : > { %685 = vst.msk [vmem:[#allocation2] sm:$0xff] (!%p1698_p2), %vm672_vm2, %v2448_v31  ;;  %686 = vst.msk [vmem:[#allocation2 + $0x8] sm:$0xff] (!%p1698_p2), %vm672_vm2, %v2448_v31 }
 0x256   : > { %v1744_v15 = vpop.f32.mrb[0].mxu0 }
 0x257   : > { %v1748_v16 = vpop.f32.mrb[0].mxu1  ;;  %v650_v17 = vadd.f32 %v1744_v15, %v3039_v14  ;;  %v641_v19 = vpop.f32.mrb[1].mxu0  ;;  %684 = sbr.rel (%p1698_p2) target bundleno = 606 (0x25e), region = 96 }
 0x258   : > { %v666_v18 = vadd.f32 %v1748_v16, %v3039_v14  ;;  %v657_v20 = vpop.f32.mrb[1].mxu1  ;;  %v642_v21 = vadd.f32 %v3039_v14, %v641_v19  ;;  %v1745_v23 = vpop.f32.mrb[2].mxu0 }
 0x259   : > { %v658_v22 = vadd.f32 %v3039_v14, %v657_v20  ;;  %v1749_v24 = vpop.f32.mrb[2].mxu1  ;;  %675 = vst.msk [vmem:[#allocation2 + $0x20] sm:$0xff] %vm672_vm2, %v650_v17  ;;  %v653_v25 = vadd.f32 %v1745_v23, %v3039_v14  ;;  %v644_v27 = vpop.f32.mrb[3].mxu0 }
 0x25a   : > { %679 = vst.msk [vmem:[#allocation2 + $0x40] sm:$0xff] %vm672_vm2, %v666_v18  ;;  %v669_v26 = vadd.f32 %v1749_v24, %v3039_v14  ;;  %v660_v28 = vpop.f32.mrb[3].mxu1  ;;  %673 = vst.msk [vmem:[#allocation2 + $0x10] sm:$0xff] %vm672_vm2, %v642_v21  ;;  %v645_v29 = vadd.f32 %v3039_v14, %v644_v27 }
 0x25b   : > { %677 = vst.msk [vmem:[#allocation2 + $0x30] sm:$0xff] %vm672_vm2, %v658_v22  ;;  %v661_v30 = vadd.f32 %v3039_v14, %v660_v28  ;;  %676 = vst.msk [vmem:[#allocation2 + $0x28] sm:$0xff] %vm672_vm2, %v653_v25 }
 0x25c   : > { %680 = vst.msk [vmem:[#allocation2 + $0x48] sm:$0xff] %vm672_vm2, %v669_v26  ;;  %674 = vst.msk [vmem:[#allocation2 + $0x18] sm:$0xff] %vm672_vm2, %v645_v29 }
 0x25d   : > { %678 = vst.msk [vmem:[#allocation2 + $0x38] sm:$0xff] %vm672_vm2, %v661_v30 }
 0x25e PF: > { %s3766_s11 = sld [smem:[#allocation30_spill]] }
 0x264   : > { %p1699_p6 = scmp.le.s32.totalorder %s3766_s11, 0 }
 0x265   : > { %v691_v32 = vld [vmem:[%s479_s10] sm:$0xff] (!%p1699_p6)  ;;  %v692_v33 = vld [vmem:[%s479_s10 + $0x8] sm:$0xff] (!%p1699_p6)  ;;  %v2449_v34 = vmov (!%p1699_p6), 0.0   ;;  %vm2450_vm3 = vmmov (!%p1699_p6), 0  }
 0x266   : > { %690 = sbr.rel (%p1699_p6) target bundleno = 835 (0x343), region = 100  ;;  %1750 = vmatprep.subr.bf16.mxu0 (!%p1699_p6), %v2449_v34  ;;  %1752 = vmatprep.mubr.msk.bf16.mxu0 (!%p1699_p6), %vm2450_vm3, %v2449_v34  ;;  %v693_v35 = vpack.c.bf16 (!%p1699_p6), %v692_v33, %v691_v32 }
 0x267   : > { %1751 = vmatpush3.bf16.msra.mxu0 (!%p1699_p6), %v3025_v3 }
 0x26a   : > { %1753 = vmatmul.mubr.msk.bf16.vlgmr.msra.gmra.mrb[0].mxu0 (!%p1699_p6), %vm590_vm1, %v693_v35 }
 0x33d   : > { %v731_v36 = vpop.f32.mrb[0].mxu0 }
 0x33e   : > { %v732_v37 = vadd.f32 %v3039_v14, %v731_v36  ;;  %v1754_v38 = vpop.f32.mrb[1].mxu0 }
 0x33f   : > { %v734_v39 = vpop.f32.mrb[2].mxu0 }
 0x340   : > { %738 = vst.msk [vmem:[#allocation2] sm:$0xff] %vm672_vm2, %v732_v37  ;;  %v735_v40 = vadd.f32 %v3039_v14, %v734_v39  ;;  %v1755_v41 = vpop.f32.mrb[3].mxu0 }
 0x342   : > { %739 = vst.msk [vmem:[#allocation2 + $0x8] sm:$0xff] %vm672_vm2, %v735_v40 }
 0x343 PF: > { %s3767_s20 = sld [smem:[#allocation30_spill]] }
 0x349   : > { %p1701_p7 = scmp.ne.s32.totalorder %s3767_s20, 3 }
 0x34a   : > { %v2451_v42 = vmov (!%p1701_p7), 0.0  }
 0x34b   : > { %743 = sbr.rel (%p1701_p7) target bundleno = 850 (0x352), region = 104  ;;  %744 = vst.msk [vmem:[#allocation2 + $0x50] sm:$0xff] (!%p1701_p7), %vm672_vm2, %v2451_v42  ;;  %745 = vst.msk [vmem:[#allocation2 + $0x58] sm:$0xff] (!%p1701_p7), %vm672_vm2, %v2451_v42 }
 0x352 PF: > { %s3768_s9 = sld [smem:[#allocation30_spill]] }
 0x358   : > { %p1702_p8 = scmp.ge.s32.totalorder %s3768_s9, 3 }
 0x359   : > { %v750_v43 = vld [vmem:[%s488_s3] sm:$0xff] (!%p1702_p8)  ;;  %v751_v44 = vld [vmem:[%s488_s3 + $0x8] sm:$0xff] (!%p1702_p8)  ;;  %v2452_v45 = vmov (!%p1702_p8), 0.0   ;;  %vm2453_vm4 = vmmov (!%p1702_p8), 0  }
 0x35a   : > { %749 = sbr.rel (%p1702_p8) target bundleno = 1079 (0x437), region = 108  ;;  %1756 = vmatprep.subr.bf16.mxu0 (!%p1702_p8), %v2452_v45  ;;  %1758 = vmatprep.mubr.msk.bf16.mxu0 (!%p1702_p8), %vm2453_vm4, %v2452_v45  ;;  %v752_v46 = vpack.c.bf16 (!%p1702_p8), %v751_v44, %v750_v43 }
 0x35b   : > { %1757 = vmatpush3.bf16.msra.mxu0 (!%p1702_p8), %v3025_v3 }
 0x35e   : > { %1759 = vmatmul.mubr.msk.bf16.vlgmr.msra.gmra.mrb[0].mxu0 (!%p1702_p8), %vm590_vm1, %v752_v46 }
 0x431   : > { %v790_v47 = vpop.f32.mrb[0].mxu0 }
 0x432   : > { %v791_v48 = vadd.f32 %v3039_v14, %v790_v47  ;;  %v1760_v49 = vpop.f32.mrb[1].mxu0 }
 0x433   : > { %v793_v50 = vpop.f32.mrb[2].mxu0 }
 0x434   : > { %797 = vst.msk [vmem:[#allocation2 + $0x50] sm:$0xff] %vm672_vm2, %v791_v48  ;;  %v794_v51 = vadd.f32 %v3039_v14, %v793_v50  ;;  %v1761_v52 = vpop.f32.mrb[3].mxu0 }
 0x436   : > { %798 = vst.msk [vmem:[#allocation2 + $0x58] sm:$0xff] %vm672_vm2, %v794_v51 }
 0x437 PF: > { %v1991_v53 = vld [vmem:[#allocation15] sm:$0xff]   ;;  %v801_v54 = vlaneseq  ;;  %v1992_v55 = vld [vmem:[#allocation15 + $0x8] sm:$0xff]   ;;  %v3095_v59 = vld [vmem:[#allocation2 + $0x8] sm:$0xff]  ;;  %s3785_s12 = sld [smem:[#allocation30_spill]]  ;;  %s3786_s27 = sld [smem:[#allocation31_spill]] }
 0x438   : > { %1762 = vmatprep.subr.bf16.mxu0 %v1991_v53  ;;  %1776 = vmatprep.subr.bf16.mxu1 %v1991_v53  ;;  %v3089_v56 = vld [vmem:[#allocation12] sm:$0xff]  ;;  %v3097_v60 = vld [vmem:[#allocation2 + $0x10] sm:$0xff]  ;;  %v3099_v61 = vld [vmem:[#allocation2 + $0x18] sm:$0xff]  ;;  %v943_v8 = vrot.slane %v3095_v59, 7  ;;  %v1004_v37 = vrot.slane %v3095_v59, 1  ;;  %s1455_s0 = sshll.u32 %s3059_s23, 4  ;;  %s3562_s0 = int_to_ptr.vmem [resolvable:$true] %s1455_s0 }
 0x439   : > { %v3091_v57 = vshrl.u32 %v801_v54, 7  ;;  %v3093_v58 = vld [vmem:[#allocation2] sm:$0xff]  ;;  %1763 = vmatpush3.bf16.msra.mxu0 %v1991_v53  ;;  %1778 = vmatpush3.bf16.msra.mxu1 %v1991_v53  ;;  %v3109_v5 = vld [vmem:[#allocation2 + $0x28] sm:$0xff]  ;;  %v3111_v6 = vld [vmem:[#allocation2 + $0x38] sm:$0xff]  ;;  %v3116_v9 = vrot.slane %v3097_v60, 7  ;;  %v945_v10 = vrot.slane %v3099_v61, 7 }
 0x43a   : > { %v942_v62 = vrot.slane %v3093_v58, 7  ;;  %v1003_v63 = vrot.slane %v3093_v58, 1  ;;  %1764 = vmatprep.subr.bf16.mxu0 %v1992_v55  ;;  %1777 = vmatprep.subr.bf16.mxu1 %v1992_v55  ;;  %v3107_v4 = vld [vmem:[#allocation2 + $0x20] sm:$0xff]  ;;  %v947_v17 = vrot.slane %v3109_v5, 7  ;;  %v3131_v18 = vrot.slane %v3111_v6, 7  ;;  %v3173_v30 = vld [vmem:[#allocation2 + $0x30] sm:$0xff] }
 0x43b   : > { %v803_v0 = vadd.s32 8, %v3091_v57  ;;  %v804_v1 = vadd.s32 16, %v3091_v57  ;;  %v805_v2 = vadd.s32 24, %v3091_v57  ;;  %v814_v3 = vand.u32 15, %v3091_v57  ;;  %s3787_s10 = sld [smem:[#allocation49_spill]]  ;;  %s1440_s30 = scalar_lea.sflag [#allocation5], %s2982_s4 }
 0x43c   : > { %v932_v7 = vsub.s32 1, %v3091_v57  ;;  %v3127_v16 = vrot.slane %v3107_v4, 7  ;;  %vm950_vm9 = vcmp.lt.s32.totalorder %v3091_v57, 1  ;;  %v985_v34 = vsub.s32 0, %v3091_v57  ;;  %s2267_s3 = scalar_lea.vmem %s3562_s0, 1024  ;;  %p3789_p9 = scmp.ne.s32.totalorder %s3733_s18, 0 }
 0x43d   : > { %v821_v11 = vand.u32 15, %v803_v0  ;;  %v828_v12 = vand.u32 15, %v804_v1  ;;  %v835_v13 = vand.u32 15, %v805_v2  ;;  %vm3119_vm5 = vcmp.gt.s32.totalorder %v814_v3, 0  ;;  %1765 = vmatpush3.bf16.msra.mxu0 %v1992_v55  ;;  %1779 = vmatpush3.bf16.msra.mxu1 %v1992_v55  ;;  %v3225_v0 = vld [vmem:[#allocation2 + $0x48] sm:$0xff]  ;;  %s1714_s13 = sshll.u32 %s3785_s12, 3  ;;  %p2268_p3 = scmp.ne.s32.totalorder %s3562_s0, %s2267_s3 }
 0x43e   : > { %v3124_v15 = vrot.slane %v3089_v56, %v932_v7  ;;  %v3161_v27 = vsel %vm950_vm9, %v3127_v16, %v947_v17  ;;  %v3166_v28 = vsel %vm950_vm9, %v945_v10, %v3127_v16  ;;  %v3171_v29 = vsel %vm950_vm9, %v3116_v9, %v945_v10  ;;  %s1715_s8 = sshll.u32 %s3786_s27, 5  ;;  %s2454_s6 = smov [#allocation18]  }
 0x43f   : > { %vm3133_vm6 = vcmp.gt.s32.totalorder %v828_v12, 0  ;;  %vm3137_vm7 = vcmp.lt.s32.totalorder %v821_v11, 15  ;;  %vm3141_vm8 = vcmp.lt.s32.totalorder %v835_v13, 15  ;;  %v956_v31 = vsel %vm950_vm9, %v943_v8, %v3116_v9  ;;  %s1452_s21 = sadd.s32 %s1715_s8, %s1714_s13  ;;  %p2269_p5 = pnand %p2268_p3, %p3789_p9 }
 0x440   : > { %v934_v22 = vmul.f32 %v3124_v15, %v3093_v58  ;;  %v935_v23 = vmul.f32 %v3124_v15, %v3095_v59  ;;  %v936_v24 = vmul.f32 %v3124_v15, %v3097_v60  ;;  %v937_v25 = vmul.f32 %v3124_v15, %v3099_v61  ;;  %s1716_s24 = sshll.u32 %s1452_s21, 7  ;;  %s2271_s11 = sshll.u32 %s2454_s6, 4  ;;  %s2272_s11 = int_to_ptr.vmem [resolvable:$false] %s2271_s11 }
 0x441   : > { %v939_v26 = vmul.f32 %v3124_v15, %v3109_v5  ;;  %v957_v32 = vsel %vm950_vm9, %v942_v62, %v943_v8  ;;  %v958_v33 = vsel %vm950_vm9, %v3131_v18, %v942_v62  ;;  %v977_v36 = vsel %vm3133_vm6, %v956_v31, 0.0  ;;  %s3788_s2 = smov %s3787_s10  ;;  %s3560_s7 = scalar_lea.hbm %s3787_s10, %s1716_s24 }
 0x442   : > { %v975_v35 = vsel %vm3119_vm5, %v958_v33, 0.0  ;;  %v3190_v38 = vrot.slane %v3097_v60, 1  ;;  %v3193_v39 = vrot.slane %v3089_v56, %v985_v34  ;;  %v1006_v40 = vrot.slane %v3099_v61, 1  ;;  %p2270_p4 = pneg %p2269_p5  ;;  %s2273_s20 = scalar_lea.vmem %s2272_s11, 2048 }
 0x443   : > { %v3197_v41 = vrot.slane %v3107_v4, 1  ;;  %v1008_v42 = vrot.slane %v3109_v5, 1  ;;  %v1009_v43 = vrot.slane %v3173_v30, 1  ;;  %vm1011_vm10 = vcmp.lt.s32.totalorder %v3091_v57, 7  ;;  %p2274_p10 = scmp.lt.s32.totalorder %s3562_s0, %s2272_s11  ;;  %p2275_p11 = scmp.lt.s32.totalorder %s2273_s20, %s2267_s3 }
 0x444   : > { %v1046_v44 = vsub.s32 2, %v3091_v57  ;;  %v1068_v45 = vsub.s32 4, %v3091_v57  ;;  %v987_v46 = vmul.f32 %v3193_v39, %v975_v35  ;;  %v988_v47 = vmul.f32 %v3193_v39, %v957_v32 }
 0x445   : > { %v989_v48 = vmul.f32 %v3193_v39, %v977_v36  ;;  %v990_v49 = vmul.f32 %v3193_v39, %v3171_v29  ;;  %v992_v50 = vmul.f32 %v3193_v39, %v3161_v27  ;;  %v3215_v51 = vsel %vm1011_vm10, %v1008_v42, %v1009_v43  ;;  %p2276_p13 = por %p2275_p11, %p2274_p10 }
 0x446   : > { %v3220_v52 = vsel %vm1011_vm10, %v3197_v41, %v1008_v42  ;;  %v1015_v53 = vsel %vm1011_vm10, %v1006_v40, %v3197_v41  ;;  %v995_v54 = vadd.f32 %v987_v46, %v934_v22  ;;  %v996_v55 = vadd.f32 %v988_v47, %v935_v23  ;;  %v3284_v47 = vld [vmem:[#allocation2 + $0x58] sm:$0xff] }
 0x447   : > { %v997_v59 = vadd.f32 %v989_v48, %v936_v24  ;;  %v998_v62 = vadd.f32 %v990_v49, %v937_v25  ;;  %v3227_v1 = vadd.f32 %v992_v50, %v939_v26  ;;  %v1016_v2 = vsel %vm1011_vm10, %v3190_v38, %v1006_v40  ;;  %p2277_p0 = pnand %p2276_p13, %p2270_p4 }
 0x448   : > { %v1017_v3 = vsel %vm1011_vm10, %v1004_v37, %v3190_v38  ;;  %v1018_v7 = vsel %vm1011_vm10, %v1003_v63, %v1004_v37  ;;  %v1039_v10 = vsel %vm3141_vm8, %v1015_v53, 0.0  ;;  %v3244_v11 = vrot.slane %v3089_v56, %v1046_v44 }
 0x449   : > { %v1037_v8 = vsel %vm3137_vm7, %v1017_v3, 0.0  ;;  %v3247_v12 = vrot.slane %v3089_v56, %v1068_v45  ;;  %v3250_v13 = vrot.slane %v3225_v0, 7  ;;  %v1093_v22 = vsel %vm3133_vm6, %v3166_v28, 0.0 }
 0x44a   : > { %v1101_v23 = vsub.s32 3, %v3091_v57  ;;  %v1125_v24 = vsel %vm3137_vm7, %v1015_v53, 0.0  ;;  %v1048_v25 = vmul.f32 %v3244_v11, %v1018_v7  ;;  %v1049_v26 = vmul.f32 %v3244_v11, %v1037_v8 }
 0x44b   : > { %v1050_v31 = vmul.f32 %v3244_v11, %v1016_v2  ;;  %v1051_v32 = vmul.f32 %v3244_v11, %v1039_v10  ;;  %v3264_v33 = vmul.f32 %v3244_v11, %v3220_v52  ;;  %v1070_v34 = vmul.f32 %v3247_v12, %v3097_v60 }
 0x44c   : > { %v1071_v35 = vmul.f32 %v3247_v12, %v3099_v61  ;;  %v1072_v36 = vmul.f32 %v3247_v12, %v3107_v4  ;;  %v1056_v37 = vadd.f32 %v1048_v25, %v995_v54  ;;  %v1057_v40 = vadd.f32 %v1049_v26, %v996_v55 }
 0x44d   : > { %v1058_v42 = vadd.f32 %v1050_v31, %v997_v59  ;;  %v1059_v44 = vadd.f32 %v1051_v32, %v998_v62  ;;  %v1073_v45 = vmul.f32 %v3247_v12, %v3109_v5  ;;  %v1090_v46 = vsel %vm950_vm9, %v3250_v13, %v3116_v9  ;;  %v3292_v62 = vld [vmem:[#allocation12 + $0x8] ss:$0 sm:$0xff] }
 0x44e   : > { %v3279_v60 = vrot.slane %v3089_v56, %v1101_v23  ;;  %v1127_v61 = vsel %vm3141_vm8, %v3215_v51, 0.0  ;;  %v1078_v48 = vadd.f32 %v1070_v34, %v1056_v37  ;;  %v1079_v49 = vadd.f32 %v1071_v35, %v1057_v40 }
 0x44f   : > { %v1080_v50 = vadd.f32 %v1072_v36, %v1058_v42  ;;  %v1091_v53 = vsel %vm3119_vm5, %v1090_v46, 0.0  ;;  %v1081_v54 = vadd.f32 %v1073_v45, %v1059_v44  ;;  %v1134_v7 = vsub.s32 5, %v3091_v57  ;;  %v3326_v45 = vld [vmem:[#allocation2 + $0x40] sm:$0xff] }
 0x450   : > { %v1103_v55 = vmul.f32 %v3279_v60, %v1091_v53  ;;  %v1104_v9 = vmul.f32 %v3279_v60, %v3171_v29  ;;  %v1105_v59 = vmul.f32 %v3279_v60, %v1093_v22  ;;  %v1106_v3 = vmul.f32 %v3279_v60, %v3161_v27 }
 0x451   : > { %v1156_v8 = vsub.s32 7, %v3091_v57  ;;  %v1175_v10 = vrot.slane %v3284_v47, 7  ;;  %v1189_v31 = vsub.s32 6, %v3091_v57  ;;  %v3301_v29 = vrot.slane %v3089_v56, %v1134_v7 }
 0x452   : > { %v1111_v23 = vadd.f32 %v1103_v55, %v1078_v48  ;;  %v1112_v25 = vadd.f32 %v1104_v9, %v1079_v49  ;;  %v1113_v26 = vadd.f32 %v1105_v59, %v1080_v50  ;;  %v1114_v32 = vadd.f32 %v1106_v3, %v1081_v54 }
 0x453   : > { %v3304_v22 = vrot.slane %v3089_v56, %v1156_v8  ;;  %v1178_v34 = vsel %vm950_vm9, %v1175_v10, %v3127_v16  ;;  %v3314_v36 = vrot.slane %v3089_v56, %v1189_v31  ;;  %v1213_v37 = vsel %vm3137_vm7, %v3215_v51, 0.0  ;;  %v3376_v31 = vld [vmem:[#allocation14] ss:$0 sm:$0xff] }
 0x454   : > { %v1179_v35 = vsel %vm3119_vm5, %v1178_v34, 0.0  ;;  %v1224_v40 = vmul.f32 %v3292_v62, %v3220_v52  ;;  %v1136_v42 = vmul.f32 %v3301_v29, %v1016_v2  ;;  %v1137_v44 = vmul.f32 %v3301_v29, %v1125_v24 }
 0x455   : > { %v1138_v16 = vmul.f32 %v3301_v29, %v3220_v52  ;;  %v1139_v14 = vmul.f32 %v3301_v29, %v1127_v61  ;;  %v1158_v56 = vmul.f32 %v3304_v22, %v3107_v4  ;;  %v1159_v20 = vmul.f32 %v3304_v22, %v3109_v5 }
 0x456   : > { %v1191_v46 = vmul.f32 %v3314_v36, %v1179_v35  ;;  %v1192_v2 = vmul.f32 %v3314_v36, %v3161_v27  ;;  %v1144_v48 = vadd.f32 %v1136_v42, %v1111_v23  ;;  %v1145_v24 = vadd.f32 %v1137_v44, %v1112_v25 }
 0x457   : > { %v1146_v49 = vadd.f32 %v1138_v16, %v1113_v26  ;;  %v1225_v52 = vmul.f32 %v3292_v62, %v1213_v37  ;;  %v948_v61 = vrot.slane %v3173_v30, 7  ;;  %v3338_v50 = vrot.slane %v3111_v6, 1 }
 0x458   : > { %v1119_v53 = vrot.slane %v3326_v45, 1  ;;  %v1147_v54 = vadd.f32 %v1139_v14, %v1114_v32  ;;  %v1166_v55 = vadd.f32 %v1158_v56, %v1144_v48  ;;  %v1167_v9 = vadd.f32 %v1159_v20, %v1145_v24 }
 0x459   : > { %v1160_v59 = vmul.f32 %v3304_v22, %v3173_v30  ;;  %v1161_v27 = vmul.f32 %v3304_v22, %v3111_v6  ;;  %v3348_v3 = vsel %vm950_vm9, %v948_v61, %v3131_v18  ;;  %v3354_v7 = vsel %vm950_vm9, %v947_v17, %v948_v61 }
 0x45a   : > { %v3361_v8 = vsel %vm1011_vm10, %v1009_v43, %v3338_v50  ;;  %v3368_v23 = vsel %vm1011_vm10, %v3338_v50, %v1119_v53  ;;  %v1199_v25 = vadd.f32 %v1191_v46, %v1166_v55  ;;  %v1200_v5 = vadd.f32 %v1192_v2, %v1167_v9 }
 0x45b   : > { %v994_v17 = vmul.f32 %v3193_v39, %v3348_v3  ;;  %v3374_v26 = vmul.f32 %v3244_v11, %v3361_v8  ;;  %v1168_v43 = vadd.f32 %v1160_v59, %v1146_v49  ;;  %v1169_v32 = vadd.f32 %v1161_v27, %v1147_v54 }
 0x45c   : > { %v1181_v34 = vsel %vm3133_vm6, %v3354_v7, 0.0  ;;  %v1194_v35 = vmul.f32 %v3314_v36, %v3348_v3  ;;  %v1232_v37 = vadd.f32 %v1224_v40, %v1199_v25  ;;  %v1233_v42 = vadd.f32 %v1225_v52, %v1200_v5 }
 0x45d   : > { %v1193_v44 = vmul.f32 %v3314_v36, %v1181_v34  ;;  %v1215_v16 = vsel %vm3141_vm8, %v3368_v23, 0.0  ;;  %v1226_v56 = vmul.f32 %v3292_v62, %v3361_v8  ;;  %v806_v19 = vadd.s32 32, %v3091_v57 }
 0x45e   : > { %v1202_v14 = vadd.f32 %v1194_v35, %v1169_v32  ;;  %v1227_v20 = vmul.f32 %v3292_v62, %v1215_v16  ;;  %v1247_v46 = vadd.f32 %v3376_v31, %v1232_v37  ;;  %v1248_v2 = vadd.f32 %v3376_v31, %v1233_v42 }
 0x45f   : > { %v1201_v40 = vadd.f32 %v1193_v44, %v1168_v43  ;;  %v807_v48 = vadd.s32 40, %v3091_v57  ;;  %v808_v49 = vadd.s32 48, %v3091_v57  ;;  %v809_v21 = vadd.s32 56, %v3091_v57 }
 0x460   : > { %v1235_v24 = vadd.f32 %v1227_v20, %v1202_v14  ;;  %v842_v52 = vand.u32 15, %v806_v19  ;;  %v1255_v61 = vmul.f32 %v1247_v46, %v1247_v46  ;;  %v1256_v54 = vmul.f32 %v1248_v2, %v1248_v2 }
 0x461   : > { %v3396_v55 = vmul.f32 0.5, %v1247_v46  ;;  %v3398_v9 = vmul.f32 0.5, %v1248_v2  ;;  %v1234_v59 = vadd.f32 %v1226_v56, %v1201_v40  ;;  %v849_v25 = vand.u32 15, %v807_v48 }
 0x462   : > { %v1250_v27 = vadd.f32 %v3376_v31, %v1235_v24  ;;  %v856_v5 = vand.u32 15, %v808_v49  ;;  %v1263_v43 = vmul.f32 %v1255_v61, %v1247_v46  ;;  %v1264_v32 = vmul.f32 %v1256_v54, %v1248_v2 }
 0x463   : > { %v863_v34 = vand.u32 15, %v809_v21  ;;  %vm3401_vm11 = vcmp.gt.s32.totalorder %v842_v52, 0  ;;  %v1249_v37 = vadd.f32 %v3376_v31, %v1234_v59  ;;  %vm3412_vm13 = vcmp.lt.s32.totalorder %v849_v25, 15 }
 0x464   : > { %v1258_v42 = vmul.f32 %v1250_v27, %v1250_v27  ;;  %v3406_v44 = vmul.f32 0.5, %v1250_v27  ;;  %vm3408_vm12 = vcmp.gt.s32.totalorder %v856_v5, 0  ;;  %v1271_v14 = vmul.f32 0.044715, %v1263_v43 }
 0x465   : > { %v1272_v56 = vmul.f32 0.044715, %v1264_v32  ;;  %vm3416_vm14 = vcmp.lt.s32.totalorder %v863_v34, 15  ;;  %v1257_v40 = vmul.f32 %v1249_v37, %v1249_v37  ;;  %v3420_v24 = vmul.f32 0.5, %v1249_v37 }
 0x466   : > { %v1266_v48 = vmul.f32 %v1258_v42, %v1250_v27  ;;  %v938_v49 = vmul.f32 %v3124_v15, %v3107_v4  ;;  %v1279_v21 = vadd.f32 %v1271_v14, %v1247_v46  ;;  %v940_v61 = vmul.f32 %v3124_v15, %v3173_v30 }
 0x467   : > { %v1280_v52 = vadd.f32 %v1272_v56, %v1248_v2  ;;  %v941_v54 = vmul.f32 %v3124_v15, %v3111_v6  ;;  %v1265_v59 = vmul.f32 %v1257_v40, %v1249_v37  ;;  %v979_v5 = vsel %vm3401_vm11, %v3166_v28, 0.0 }
 0x468   : > { %v1274_v25 = vmul.f32 0.044715, %v1266_v48  ;;  %v981_v43 = vsel %vm3408_vm12, %v3354_v7, 0.0  ;;  %v1287_v32 = vmul.f32 0.7978846, %v1279_v21  ;;  %v991_v46 = vmul.f32 %v3193_v39, %v979_v5 }
 0x469   : > { %v1288_v4 = vmul.f32 0.7978846, %v1280_v52  ;;  %v993_v2 = vmul.f32 %v3193_v39, %v981_v43  ;;  %v1273_v34 = vmul.f32 0.044715, %v1265_v59  ;;  %v1002_v14 = vadd.f32 %v994_v17, %v941_v54 }
 0x46a   : > { %v1282_v42 = vadd.f32 %v1274_v25, %v1250_v27  ;;  %v1019_v15 = vsel %vm1011_vm10, %v3338_v50, %v1003_v63  ;;  %1993 = vtanh.f32 %v1287_v32  ;;  %v999_v28 = vadd.f32 %v991_v46, %v938_v49 }
 0x46b   : > { %v1001_v56 = vadd.f32 %v993_v2, %v940_v61  ;;  %v1041_v40 = vsel %vm3412_vm13, %v3215_v51, 0.0  ;;  %1995 = vtanh.f32 %v1288_v4  ;;  %v1281_v48 = vadd.f32 %v1273_v34, %v1249_v37 }
 0x46c   : > { %v1290_v21 = vmul.f32 0.7978846, %v1282_v42  ;;  %v1043_v39 = vsel %vm3416_vm14, %v1019_v15, 0.0  ;;  %v1053_v17 = vmul.f32 %v3244_v11, %v1041_v40  ;;  %v1060_v27 = vadd.f32 %v3264_v33, %v999_v28  ;;  %v1152_v42 = vld [vmem:[#allocation2 + $0x50] sm:$0xff] }
 0x46d   : > { %v1055_v58 = vmul.f32 %v3244_v11, %v1043_v39  ;;  %v1062_v63 = vadd.f32 %v3374_v26, %v1001_v56  ;;  %v1289_v50 = vmul.f32 0.7978846, %v1281_v48  ;;  %v1074_v49 = vmul.f32 %v3247_v12, %v3173_v30 }
 0x46e   : > { %1997 = vtanh.f32 %v1290_v21  ;;  %v1075_v51 = vmul.f32 %v3247_v12, %v3111_v6  ;;  %v1061_v37 = vadd.f32 %v1053_v17, %v3227_v1  ;;  %v1076_v61 = vmul.f32 %v3247_v12, %v3326_v45 }
 0x46f   : > { %v1063_v52 = vadd.f32 %v1055_v58, %v1002_v14  ;;  %v1077_v11 = vmul.f32 %v3247_v12, %v3225_v0  ;;  %1999 = vtanh.f32 %v1289_v50  ;;  %v1082_v33 = vadd.f32 %v1074_v49, %v1060_v27 }
 0x470   : > { %v1086_v26 = vrot.slane %v3326_v45, 7  ;;  %v1095_v30 = vsel %vm3401_vm11, %v3354_v7, 0.0  ;;  %v1083_v54 = vadd.f32 %v1075_v51, %v1061_v37  ;;  %v1084_v59 = vadd.f32 %v1076_v61, %v1062_v63 }
 0x471   : > { %v1085_v6 = vadd.f32 %v1077_v11, %v1063_v52  ;;  %v1107_v1 = vmul.f32 %v3279_v60, %v1095_v30  ;;  %v1108_v5 = vmul.f32 %v3279_v60, %v3348_v3  ;;  %v1120_v43 = vrot.slane %v3225_v0, 1 }
 0x472   : > { %v1088_v25 = vsel %vm950_vm9, %v1086_v26, %v3250_v13  ;;  %v1089_v12 = vsel %vm950_vm9, %v3131_v18, %v1086_v26  ;;  %v1129_v46 = vsel %vm3412_vm13, %v3368_v23, 0.0  ;;  %v1140_v28 = vmul.f32 %v3301_v29, %v3361_v8 }
 0x473   : > { %v1097_v7 = vsel %vm3408_vm12, %v1089_v12, 0.0  ;;  %v1110_v32 = vmul.f32 %v3279_v60, %v1088_v25  ;;  %v1115_v4 = vadd.f32 %v1107_v1, %v1082_v33  ;;  %v1116_v34 = vadd.f32 %v1108_v5, %v1083_v54 }
 0x474   : > { %v1109_v2 = vmul.f32 %v3279_v60, %v1097_v7  ;;  %v1121_v18 = vsel %vm1011_vm10, %v1119_v53, %v1120_v43  ;;  %v1123_v3 = vsel %vm1011_vm10, %v1120_v43, %v3190_v38  ;;  %v1994_v14 = vpop.eup %1993  ;;  %v1141_v23 = vmul.f32 %v3301_v29, %v1129_v46 }
 0x475   : > { %v1118_v15 = vadd.f32 %v1110_v32, %v1085_v6  ;;  %v1142_v60 = vmul.f32 %v3301_v29, %v1121_v18  ;;  %v1996_v56 = vpop.eup %1995  ;;  %v1311_v40 = vadd.f32 1.0, %v1994_v14  ;;  %v1162_v53 = vmul.f32 %v3304_v22, %v3326_v45 }
 0x476   : > { %v1117_v48 = vadd.f32 %v1109_v2, %v1084_v59  ;;  %v1163_v21 = vmul.f32 %v3304_v22, %v3225_v0  ;;  %v1312_v38 = vadd.f32 1.0, %v1996_v56  ;;  %v1148_v39 = vadd.f32 %v1140_v28, %v1115_v4 }
 0x477   : > { %v1149_v17 = vadd.f32 %v1141_v23, %v1116_v34  ;;  %v1174_v58 = vrot.slane %v1152_v42, 7  ;;  %v1319_v8 = vmul.f32 %v1311_v40, %v3396_v55  ;;  %v1183_v50 = vsel %vm3401_vm11, %v1089_v12, 0.0 }
 0x478   : > { %v1998_v27 = vpop.eup %1997  ;;  %v1150_v63 = vadd.f32 %v1142_v60, %v1117_v48  ;;  %v1196_v49 = vmul.f32 %v3314_v36, %v1088_v25  ;;  %v1320_v51 = vmul.f32 %v1312_v38, %v3398_v9  ;;  %v1170_v45 = vadd.f32 %v1162_v53, %v1148_v39 }
 0x479   : > { %v1314_v37 = vadd.f32 1.0, %v1998_v27  ;;  %v1171_v52 = vadd.f32 %v1163_v21, %v1149_v17  ;;  %v2000_v61 = vpop.eup %1999  ;;  %v1195_v0 = vmul.f32 %v3314_v36, %v1183_v50  ;;  %v1207_v11 = vrot.slane %v1152_v42, 1 }
 0x47a   : > { %v1228_v33 = vmul.f32 %v3292_v62, %v1121_v18  ;;  %v1131_v55 = vsel %vm3416_vm14, %v1123_v3, 0.0  ;;  %v1327_v26 = vpack.c.bf16 %v1320_v51, %v1319_v8  ;;  %v1313_v30 = vadd.f32 1.0, %v2000_v61 }
 0x47b   : > { %v1322_v35 = vmul.f32 %v1314_v37, %v3406_v44  ;;  %v1204_v54 = vadd.f32 %v1196_v49, %v1171_v52  ;;  %v1203_v59 = vadd.f32 %v1195_v0, %v1170_v45  ;;  %v1210_v9 = vsel %vm1011_vm10, %v1120_v43, %v1207_v11 }
 0x47c   : > { %v1143_v6 = vmul.f32 %v3301_v29, %v1131_v55  ;;  %v1164_v1 = vmul.f32 %v3304_v22, %v1152_v42  ;;  %1766 = vmatprep.mubr.msk.bf16.mxu0 %vm672_vm2, %v1327_v26  ;;  %v1321_v25 = vmul.f32 %v1313_v30, %v3420_v24  ;;  %v1217_v12 = vsel %vm3412_vm13, %v1210_v9, 0.0 }
 0x47d   : > { %v1165_v5 = vmul.f32 %v3304_v22, %v3284_v47  ;;  %v1176_v44 = vsel %vm950_vm9, %v1174_v58, %v1175_v10  ;;  %v1229_v43 = vmul.f32 %v3292_v62, %v1217_v12  ;;  %v1236_v29 = vadd.f32 %v1228_v33, %v1203_v59 }
 0x47e   : > { %v1151_v7 = vadd.f32 %v1143_v6, %v1118_v15  ;;  %v1172_v32 = vadd.f32 %v1164_v1, %v1150_v63  ;;  %v1328_v4 = vpack.c.bf16 %v1322_v35, %v1321_v25  ;;  %v1177_v24 = vsel %vm950_vm9, %v3250_v13, %v1174_v58 }
 0x47f   : > { %v1198_v20 = vmul.f32 %v3314_v36, %v1176_v44  ;;  %v1208_v46 = vrot.slane %v3284_v47, 1  ;;  %v1237_v22 = vadd.f32 %v1229_v43, %v1204_v54  ;;  %v1251_v2 = vadd.f32 %v3376_v31, %v1236_v29  ;;  %v1706_v44 = vld [vmem:[#allocation17] ss:$0 sm:$0xff] }
 0x480   : > { %v1173_v34 = vadd.f32 %v1165_v5, %v1151_v7  ;;  %v1185_v10 = vsel %vm3408_vm12, %v1177_v24, 0.0  ;;  %1767 = vmatmul.mubr.msk.bf16.vlgmr.msra.gmra.mrb[0].mxu0 %vm672_vm2, %v1328_v4 }
 0x481   : > { %v1197_v18 = vmul.f32 %v3314_v36, %v1185_v10  ;;  %v1209_v3 = vsel %vm1011_vm10, %v1207_v11, %v1208_v46  ;;  %v1211_v13 = vsel %vm1011_vm10, %v1208_v46, %v3197_v41  ;;  %v1252_v47 = vadd.f32 %v3376_v31, %v1237_v22 }
 0x482   : > { %v1259_v42 = vmul.f32 %v1251_v2, %v1251_v2  ;;  %v1206_v14 = vadd.f32 %v1198_v20, %v1173_v34  ;;  %v1219_v16 = vsel %vm3416_vm14, %v1211_v13, 0.0  ;;  %v1230_v28 = vmul.f32 %v3292_v62, %v1209_v3 }
 0x483   : > { %v1205_v15 = vadd.f32 %v1197_v18, %v1172_v32  ;;  %v1260_v23 = vmul.f32 %v1252_v47, %v1252_v47  ;;  %v1231_v36 = vmul.f32 %v3292_v62, %v1219_v16  ;;  %v1299_v52 = vmul.f32 0.5, %v1251_v2 }
 0x484   : > { %v1267_v60 = vmul.f32 %v1259_v42, %v1251_v2 }
 0x485   : > { %v1238_v56 = vadd.f32 %v1230_v28, %v1205_v15  ;;  %v1268_v40 = vmul.f32 %v1260_v23, %v1252_v47  ;;  %v1239_v53 = vadd.f32 %v1231_v36, %v1206_v14 }
 0x486   : > { %v1275_v48 = vmul.f32 0.044715, %v1267_v60 }
 0x487   : > { %v1253_v57 = vadd.f32 %v3376_v31, %v1238_v56  ;;  %v1276_v41 = vmul.f32 0.044715, %v1268_v40  ;;  %v1254_v38 = vadd.f32 %v3376_v31, %v1239_v53  ;;  %v1300_v31 = vmul.f32 0.5, %v1252_v47 }
 0x488   : > { %v1283_v21 = vadd.f32 %v1275_v48, %v1251_v2 }
 0x489   : > { %v1261_v39 = vmul.f32 %v1253_v57, %v1253_v57  ;;  %v1284_v17 = vadd.f32 %v1276_v41, %v1252_v47  ;;  %v1262_v58 = vmul.f32 %v1254_v38, %v1254_v38  ;;  %v1301_v30 = vmul.f32 0.5, %v1253_v57 }
 0x48a   : > { %v1291_v19 = vmul.f32 0.7978846, %v1283_v21  ;;  %v1302_v59 = vmul.f32 0.5, %v1254_v38 }
 0x48b   : > { %v1269_v27 = vmul.f32 %v1261_v39, %v1253_v57  ;;  %v1292_v8 = vmul.f32 0.7978846, %v1284_v17  ;;  %v1270_v63 = vmul.f32 %v1262_v58, %v1254_v38 }
 0x48c   : > { %2001 = vtanh.f32 %v1291_v19 }
 0x48d   : > { %v1277_v50 = vmul.f32 0.044715, %v1269_v27  ;;  %2003 = vtanh.f32 %v1292_v8  ;;  %v1278_v62 = vmul.f32 0.044715, %v1270_v63 }
 0x48f   : > { %v1285_v49 = vadd.f32 %v1277_v50, %v1253_v57  ;;  %v1286_v51 = vadd.f32 %v1278_v62, %v1254_v38 }
 0x491   : > { %v1293_v37 = vmul.f32 0.7978846, %v1285_v49  ;;  %v1294_v45 = vmul.f32 0.7978846, %v1286_v51 }
 0x493   : > { %2005 = vtanh.f32 %v1293_v37 }
 0x494   : > { %2007 = vtanh.f32 %v1294_v45 }
 0x496   : > { %v2002_v61 = vpop.eup %2001 }
 0x497   : > { %v1315_v0 = vadd.f32 1.0, %v2002_v61  ;;  %v2004_v11 = vpop.eup %2003 }
 0x498   : > { %v1316_v33 = vadd.f32 1.0, %v2004_v11 }
 0x499   : > { %v1323_v55 = vmul.f32 %v1315_v0, %v1299_v52 }
 0x49a   : > { %v1324_v26 = vmul.f32 %v1316_v33, %v1300_v31 }
 0x49c   : > { %v1329_v54 = vpack.c.bf16 %v1324_v26, %v1323_v55 }
 0x49d   : > { %v2006_v35 = vpop.eup %2005 }
 0x49e   : > { %v2008_v9 = vpop.eup %2007  ;;  %v1317_v6 = vadd.f32 1.0, %v2006_v35  ;;  %1770 = vmatprep.mubr.msk.bf16.mxu1 %vm672_vm2, %v1329_v54 }
 0x49f   : > { %v1318_v1 = vadd.f32 1.0, %v2008_v9 }
 0x4a0   : > { %v1325_v25 = vmul.f32 %v1317_v6, %v1301_v30 }
 0x4a1   : > { %v1326_v12 = vmul.f32 %v1318_v1, %v1302_v59 }
 0x4a3   : > { %v1330_v5 = vpack.c.bf16 %v1326_v12, %v1325_v25 }
 0x4a5   : > { %1771 = vmatmul.mubr.msk.bf16.vlgmr.msra.gmra.mrb[0].mxu1 %vm672_vm2, %v1330_v5 }
 0x553   : > { %v1768_v43 = vpop.f32.mrb[0].mxu0 }
 0x554   : > { %v1409_v29 = vadd.f32 %v1768_v43, %v1706_v44  ;;  %v1400_v7 = vpop.f32.mrb[1].mxu0 }
 0x555   : > { %v1401_v32 = vadd.f32 %v1706_v44, %v1400_v7  ;;  %v1769_v4 = vpop.f32.mrb[2].mxu0 }
 0x556   : > { %1433 = vst.msk [vmem:[%s3059_s23 + $0x10] sm:$0xff] %vm590_vm1, %v1409_v29  ;;  %v1412_v24 = vadd.f32 %v1769_v4, %v1706_v44  ;;  %v1403_v20 = vpop.f32.mrb[3].mxu0 }
 0x557   : > { %1431 = vst.msk [vmem:[%s3059_s23] sm:$0xff] %vm590_vm1, %v1401_v32  ;;  %v1404_v46 = vadd.f32 %v1706_v44, %v1403_v20 }
 0x558   : > { %1434 = vst.msk [vmem:[%s3059_s23 + $0x18] sm:$0xff] %vm590_vm1, %v1412_v24 }
 0x559   : > { %1432 = vst.msk [vmem:[%s3059_s23 + $0x8] sm:$0xff] %vm590_vm1, %v1404_v46 }
 0x578   : > { %v1772_v22 = vpop.f32.mrb[0].mxu1 }
 0x579   : > { %v1425_v2 = vadd.f32 %v1772_v22, %v1706_v44  ;;  %v1416_v34 = vpop.f32.mrb[1].mxu1 }
 0x57a   : > { %v1417_v10 = vadd.f32 %v1706_v44, %v1416_v34  ;;  %v1773_v18 = vpop.f32.mrb[2].mxu1 }
 0x57b   : > { %1437 = vst.msk [vmem:[%s3059_s23 + $0x30] sm:$0xff] %vm590_vm1, %v1425_v2  ;;  %v1428_v3 = vadd.f32 %v1773_v18, %v1706_v44  ;;  %v1419_v13 = vpop.f32.mrb[3].mxu1 }
 0x57c   : > { %1435 = vst.msk [vmem:[%s3059_s23 + $0x20] sm:$0xff] %vm590_vm1, %v1417_v10  ;;  %v1420_v47 = vadd.f32 %v1706_v44, %v1419_v13 }
 0x57d   : > { %1438 = vst.msk [vmem:[%s3059_s23 + $0x38] sm:$0xff] %vm590_vm1, %v1428_v3 }
 0x57e   : > { %1436 = vst.msk [vmem:[%s3059_s23 + $0x28] sm:$0xff] %vm590_vm1, %v1420_v47 }
 0x57f   : > { %2280 = shalt.err (!%p2277_p0)
}
 0x580   : > { %s2281_s23 = scalar_lea.hbm %s3560_s7, 1024  ;;  %s2285_s27 = scalar_lea.hbm %s3788_s2, 8192 }
 0x581   : > { %p2282_p12 = scmp.ne.s32.totalorder %s3560_s7, %s2281_s23  ;;  %p2286_p6 = scmp.lt.u32.totalorder %s3560_s7, %s3788_s2 }
 0x582   : > { %p2287_p7 = scmp.lt.u32.totalorder %s2285_s27, %s2281_s23  ;;  %p2289_p3 = scmp.lt.u32.totalorder %s2281_s23, %s3560_s7 }
 0x583   : > { %p2283_p1 = pnand %p2282_p12, %p3789_p9 }
 0x584   : > { %p2288_p8 = por %p2287_p7, %p2286_p6 }
 0x585   : > { %p2284_p2 = pneg %p2283_p1 }
 0x586   : > { %p2290_p5 = por %p2289_p3, %p2288_p8 }
 0x588   : > { %p2291_p4 = pnand %p2290_p5, %p2284_p2 }
 0x58a   : > { %2294 = shalt.err (!%p2291_p4)
}
 0x58b   : > { %s2455_s21 = smov 128   ;;  %s2456_s24 = smov 8  }
 0x58c   : > { %1812 = dma.vmem_to_hbm [thread:$0]  (%p3789_p9), %s3562_s0, 1024, %s3560_s7, %s1440_s30, %s2455_s21, %s2455_s21, %s2456_s24  }
 0x58d PF: > { %p1860_p10 = scmp.ge.s32.totalorder %s2433_s22, 2  ;;  %s1470_s28 = sand.u32 1, %s2405_s15  }
 0x58e   : > { %p3790_p11 = scmp.ne.s32.totalorder %s3734_s19, 0  ;;  %s1471_s1 = scalar_lea.sflag [#allocation5], %s1470_s28 }
 0x590   : > { %p1844_p13 = pnand %p1860_p10, %p3790_p11 }
 0x592   : > { %2376 = dma.done.wait (!%p1844_p13), %s1471_s1, 1024  }
 0x593   : > { %2378 = vsyncadd (!%p1844_p13), %s1471_s1, 4294966272  ;;  %s31_s22 = sadd.s32 1, %s2433_s22   ;;  %s3792_s30 = sld [smem:[#allocation27_spill]] }
 0x594   : > { %p3599_p0 = scmp.ge.s32.totalorder %s31_s22, 10   ;;  %s3793_s18 = sld [smem:[#allocation28_spill]] }
 0x595   : > { %s3794_s12 = sld [smem:[#allocation29_spill]]  ;;  %s3795_s19 = sld [smem:[#allocation32_spill]] }
 0x596   : > { %s3796_s4 = sld [smem:[#allocation33_spill]]  ;;  %s3797_s20 = sld [smem:[#allocation35_spill]] }
 0x597   : > { %s3798_s21 = sld [smem:[#allocation36_spill]]  ;;  %s3801_s11 = smov %s3824_s26 }
 0x598   : > { %s3802_s13 = smov %s2401_s14  ;;  %s3803_s14 = smov %s2713_s25 }
 0x599   : > { %s3804_s15 = smov %s2409_s16  ;;  %s3805_s16 = smov %s2413_s17 }
 0x59a   : > { %s3800_s10 = smov %s3793_s18  ;;  %s3806_s17 = smov %s2830_s5 }
 0x59b   : > { %s3807_s18 = smov %s3795_s19  ;;  %30 = sbr.rel (!%p3599_p0) target bundleno = 26 (0x1a), region = 165 }
 0x59c   : > { %s3808_s19 = smov %s3796_s4 }
 0x5a2   :  { %1476 = vsyncpa [#allocation4], 1 }
 0x5a3   :  { %1478 = vsyncpa [#allocation4 + $0x1], 1 }
 0x5a4   :  { %1479 = vsyncpa [#allocation7], 1 }
 0x5a5   :  { %1481 = vsyncpa [#allocation7 + $0x1], 1 }
 0x5a6   :  { %1482 = vsyncpa [#allocation10], 1 }
 0x5a7   :  { %1483 = vsyncpa [#allocation13], 1 }
 0x5a8   :  { %1484 = vsyncpa [#allocation16], 1 }
 0x5a9   :  { %1485 = vsyncpa [#allocation5], 1 }
 0x5aa   :  { %1487 = vsyncpa [#allocation5 + $0x1], 1 }

</bundles_post_ra>
